<compile_context>
chip_gen: v7x
topology: tpu7x:2x2x1
jax: 0.10.0
libtpu: 0.0.40
codegen_flags: <defaults>
</compile_context>

<pallas_src>
import numpy as np
import jax
import jax.numpy as jnp
from jax import lax
from jax.experimental import pallas as pl
from jax.experimental.pallas import tpu as pltpu

EPS = 1e-5


# ----------------------------------------------------------------------------
# Fused kernel
# ----------------------------------------------------------------------------
def _fused_resblock_kernel(B, H, W, Ho, Wo, Cin, Cm, Cout, stride,
                           has_sc_conv):
    WC_in = W * Cin
    WC_m = Wo * Cm
    M = B * Ho                     # matmul M dimension (batch-blocked)

    def rows_idx(kh, s):
        # Output row i <- padded rows kh + i*s  (padding=1 along H).
        return pl.ds(kh, Ho) if s == 1 else pl.ds(kh, Ho, stride=s)

    def hconv3(pad_ref, w_ref, s):
        """3 H-taps of a 3x3 conv as lane-dense matmuls.

        pad_ref : (B, Hin+2, K)   H-padded activation slab (VMEM scratch)
        w_ref   : (3, K, Ncol)    block-Toeplitz weights (W taps + W padding baked)
        Returns (acc (M, Ncol) f32, center (M, K)) where `center` is the
        kh==1 rows = the H-strided input rows (reused by the shortcut).
        """
        ncol = w_ref.shape[2]
        acc = jnp.zeros((M, ncol), jnp.float32)
        center = None
        for kh in range(3):
            rows = pad_ref[:, rows_idx(kh, s), :]      # strided ref read
            rows = rows.reshape(M, rows.shape[-1])     # leading-dim merge only
            if kh == 1:
                center = rows
            acc = acc + jnp.dot(rows, w_ref[kh],
                                preferred_element_type=jnp.float32)
        return acc, center

    def kernel(*refs):
        if has_sc_conv:
            (x_ref, w1_ref, s1_ref, b1_ref, w2_ref, s2_ref, b2_ref,
             w3_ref, s3_ref, b3_ref, wsc_ref, ssc_ref, bsc_ref,
             o_ref, pad0, pad1, pad2) = refs
        else:
            (x_ref, w1_ref, s1_ref, b1_ref, w2_ref, s2_ref, b2_ref,
             w3_ref, s3_ref, b3_ref,
             o_ref, pad0, pad1, pad2) = refs

        cdt = pad0.dtype

        # Stage the batch-block into the H-padded VMEM slab.  The two zero
        # pad rows per image are rewritten every grid step (6 tiny stores):
        # with dimension_semantics=("parallel",) the grid may be sharded
        # across TensorCores (v7x), so a pl.program_id(0)==0 gate would leave
        # the second core's scratch uninitialized.
        zin = jnp.zeros((B, 1, WC_in), cdt)
        pad0[:, pl.ds(0, 1), :] = zin
        pad0[:, pl.ds(H + 1, 1), :] = zin
        pad0[:, pl.ds(1, H), :] = x_ref[...].astype(cdt)

        # ---- conv1 (3x3, stride) + BN1 + ReLU ------------------------------
        a1, center = hconv3(pad0, w1_ref, stride)          # (M, Wo*Cm)
        a1 = jnp.maximum(a1 * s1_ref[...] + b1_ref[...], 0.0)

        zm = jnp.zeros((B, 1, WC_m), cdt)
        pad1[:, pl.ds(0, 1), :] = zm
        pad1[:, pl.ds(Ho + 1, 1), :] = zm
        pad1[:, pl.ds(1, Ho), :] = a1.reshape(B, Ho, WC_m).astype(cdt)

        # ---- conv2 (3x3, stride 1) + BN2 (no ReLU, as in the module) -------
        a2, _ = hconv3(pad1, w2_ref, 1)
        a2 = a2 * s2_ref[...] + b2_ref[...]

        pad2[:, pl.ds(0, 1), :] = zm
        pad2[:, pl.ds(Ho + 1, 1), :] = zm
        pad2[:, pl.ds(1, Ho), :] = a2.reshape(B, Ho, WC_m).astype(cdt)

        # ---- conv3 (3x3, stride 1) + BN3 -----------------------------------
        a3, _ = hconv3(pad2, w3_ref, 1)
        a3 = a3 * s3_ref[...] + b3_ref[...]

        # ---- shortcut (1x1 conv + BN or identity), residual add, ReLU ------
        # `center` == the H-strided rows of x, so no second strided slice.
        if has_sc_conv:
            sc = jnp.dot(center, wsc_ref[...],
                         preferred_element_type=jnp.float32)
            sc = sc * ssc_ref[...] + bsc_ref[...]
        else:
            sc = center.astype(jnp.float32)      # stride==1, Cin==Cout

        out = jnp.maximum(a3 + sc, 0.0)                     # (M, Wo*Cout)
        o_ref[...] = out.reshape(B, Ho, -1).astype(o_ref.dtype)

    return kernel


# ----------------------------------------------------------------------------
# Wrapper-side weight / BN preparation (runs once, tiny)
# ----------------------------------------------------------------------------
def _toeplitz3(w_hwio, w_in, w_out, stride):
    """Bake kw (k=3, pad=1, stride) of a 3x3 conv into a block-Toeplitz matrix:
    returns (3, w_in*Cin, w_out*Cout), one slab per kh tap."""
    _, kw, cin, cout = w_hwio.shape
    sel = np.zeros((kw, w_in, w_out), np.float32)
    for k in range(kw):
        for wo in range(w_out):
            wi = wo * stride + k - 1            # padding = 1 along W
            if 0 <= wi < w_in:
                sel[k, wi, wo] = 1.0
    wb = jnp.einsum("kwv,akio->awivo", jnp.asarray(sel),
                    w_hwio.astype(jnp.float32))
    return wb.reshape(3, w_in * cin, w_out * cout)


def _toeplitz1(w_io, w_in, w_out, stride):
    """Bake the strided W subsample of a 1x1 conv into (w_in*Cin, w_out*Cout)."""
    cin, cout = w_io.shape
    sel = np.zeros((w_in, w_out), np.float32)
    for wo in range(w_out):
        sel[wo * stride, wo] = 1.0
    wb = jnp.einsum("wv,io->wivo", jnp.asarray(sel), w_io.astype(jnp.float32))
    return wb.reshape(w_in * cin, w_out * cout)


def _bn_fold_row(bn, w_out):
    scale = bn["gamma"] / jnp.sqrt(bn["var"] + EPS)
    bias = bn["beta"] - bn["mean"] * scale
    return (jnp.tile(scale, w_out).reshape(1, -1).astype(jnp.float32),
            jnp.tile(bias, w_out).reshape(1, -1).astype(jnp.float32))


def _pick_batch_block(n, ho, target_rows=256):
    """Largest divisor of n with b*Ho <= target_rows, preferring grid >= 2."""
    divs = [d for d in range(1, n + 1) if n % d == 0]
    fit = [d for d in divs if d * ho <= target_rows] or [1]
    multi = [d for d in fit if n // d >= 2]
    return max(multi) if multi else max(fit)


def _const_index_map(nd):
    return lambda n: (0,) * nd


# ----------------------------------------------------------------------------
# RESblock forward (single fused pallas_call)
# ----------------------------------------------------------------------------
def resblock_forward(x_nhwc, params, *, stride=1, batch_block=None,
                     compute_dtype=jnp.float32):
    N, H, W, Cin = x_nhwc.shape
    Cm = params["w1_hwio"].shape[-1]
    Cout = params["w3_hwio"].shape[-1]
    Ho = (H - 1) // stride + 1
    Wo = (W - 1) // stride + 1
    has_sc_conv = params["w_sc_io"] is not None
    if not has_sc_conv:
        assert stride == 1 and Cin == Cout, (
            "identity shortcut requires stride == 1 and in_planes == planes")

    cdt = compute_dtype

    # --- lane-pad the input channel dim so W*Cin is a multiple of 128 -------
    # (only when the shortcut is a conv, so padded channels never reach the
    #  residual add; the matching Toeplitz weight rows are zero)
    Cin_p = Cin
    if has_sc_conv and (W * Cin) % 128 != 0:
        step = 128 // int(np.gcd(W, 128))
        Cin_p = int(-(-Cin // step) * step)
    if Cin_p != Cin:
        x_p = jnp.pad(x_nhwc, ((0, 0), (0, 0), (0, 0), (0, Cin_p - Cin)))
        w1_hwio = jnp.pad(params["w1_hwio"],
                          ((0, 0), (0, 0), (0, Cin_p - Cin), (0, 0)))
        w_sc_io = jnp.pad(params["w_sc_io"], ((0, Cin_p - Cin), (0, 0)))
    else:
        x_p, w1_hwio, w_sc_io = x_nhwc, params["w1_hwio"], params["w_sc_io"]

    x_slab = x_p.reshape(N, H, W * Cin_p)        # lane-dense activation slab

    wb1 = _toeplitz3(w1_hwio, W, Wo, stride).astype(cdt)
    wb2 = _toeplitz3(params["w2_hwio"], Wo, Wo, 1).astype(cdt)
    wb3 = _toeplitz3(params["w3_hwio"], Wo, Wo, 1).astype(cdt)
    s1, b1 = _bn_fold_row(params["bn1"], Wo)
    s2, b2 = _bn_fold_row(params["bn2"], Wo)
    s3, b3 = _bn_fold_row(params["bn3"], Wo)
    if has_sc_conv:
        wbsc = _toeplitz1(w_sc_io, W, Wo, stride).astype(cdt)
        ssc, bsc = _bn_fold_row(params["bnsc"], Wo)

    # --- batch-blocked grid --------------------------------------------------
    B_blk = batch_block or _pick_batch_block(N, Ho)
    assert N % B_blk == 0, (N, B_blk)
    grid = (N // B_blk,)

    # --- VMEM budget (weights single-buffered, x/out double-buffered) -------
    itm = jnp.dtype(cdt).itemsize
    w_elems = wb1.size + wb2.size + wb3.size + (wbsc.size if has_sc_conv else 0)
    bn_bytes = 4 * sum(a.size for a in (s1, b1, s2, b2, s3, b3))
    io_bytes = 2 * (B_blk * H * W * Cin_p + B_blk * Ho * Wo * Cout) * \
        x_nhwc.dtype.itemsize
    scratch_bytes = (B_blk * (H + 2) * W * Cin_p +
                     2 * B_blk * (Ho + 2) * Wo * Cm) * itm
    est = w_elems * itm + bn_bytes + io_bytes + scratch_bytes
    vmem_limit = int(min(max(2 * est + (8 << 20), 32 << 20), 64 << 20))

    kernel = _fused_resblock_kernel(B_blk, H, W, Ho, Wo, Cin_p, Cm, Cout,
                                    stride, has_sc_conv)

    args = [x_slab, wb1, s1, b1, wb2, s2, b2, wb3, s3, b3]
    if has_sc_conv:
        args += [wbsc, ssc, bsc]

    def build_in_specs(single_buffer_weights):
        extra = ({"pipeline_mode": pl.Buffered(1)}
                 if single_buffer_weights else {})

        def inv(arr):
            return pl.BlockSpec(arr.shape, _const_index_map(arr.ndim), **extra)

        specs = [pl.BlockSpec((B_blk, H, W * Cin_p), lambda n: (n, 0, 0))]
        specs += [inv(wb1), inv(s1), inv(b1),
                  inv(wb2), inv(s2), inv(b2),
                  inv(wb3), inv(s3), inv(b3)]
        if has_sc_conv:
            specs += [inv(wbsc), inv(ssc), inv(bsc)]
        return specs

    def run(single_buffer_weights):
        return pl.pallas_call(
            kernel,
            out_shape=jax.ShapeDtypeStruct((N, Ho, Wo * Cout), x_nhwc.dtype),
            grid=grid,
            in_specs=build_in_specs(single_buffer_weights),
            out_specs=pl.BlockSpec((B_blk, Ho, Wo * Cout),
                                   lambda n: (n, 0, 0)),
            scratch_shapes=[
                pltpu.VMEM((B_blk, H + 2, W * Cin_p), cdt),    # padded input
                pltpu.VMEM((B_blk, Ho + 2, Wo * Cm), cdt),     # padded conv1
                pltpu.VMEM((B_blk, Ho + 2, Wo * Cm), cdt),     # padded conv2
            ],
            compiler_params=pltpu.CompilerParams(
                dimension_semantics=("parallel",),
                vmem_limit_bytes=vmem_limit),
        )(*args)

    try:
        # Single-buffer the grid-invariant weights / BN rows.
        out_slab = jax.block_until_ready(run(True))
    except Exception:
        # Some jax versions reject pl.Buffered(1); fall back to defaults.
        out_slab = run(False)

    return out_slab.reshape(N, Ho, Wo, Cout)


# ----------------------------------------------------------------------------
# Pure-JAX reference (eval-mode BN) for correctness check
# ----------------------------------------------------------------------------
def resblock_ref(x_nhwc, params, *, stride=1):
    def conv(x, w_oihw, s, pad):
        w = jnp.transpose(w_oihw, (2, 3, 1, 0))  # OIHW -> HWIO
        return lax.conv_general_dilated(
            x, w, (s, s), ((pad, pad), (pad, pad)),
            dimension_numbers=("NHWC", "HWIO", "NHWC"))

    def bn(x, p):
        return (x - p["mean"]) / jnp.sqrt(p["var"] + EPS) * p["gamma"] + p["beta"]

    out = jax.nn.relu(bn(conv(x_nhwc, params["w1_oihw"], stride, 1), params["bn1"]))
    out = bn(conv(out, params["w2_oihw"], 1, 1), params["bn2"])
    out = bn(conv(out, params["w3_oihw"], 1, 1), params["bn3"])
    if params["w_sc_oihw"] is not None:
        sc = bn(conv(x_nhwc, params["w_sc_oihw"], stride, 0), params["bnsc"])
    else:
        sc = x_nhwc
    return jax.nn.relu(out + sc)


# ----------------------------------------------------------------------------
# Main
# ----------------------------------------------------------------------------
if __name__ == "__main__":
    key = jax.random.PRNGKey(0)
    N, in_planes, planes, H, W = 8, 4, 8, 16, 16
    stride = 1  # shortcut is still a 1x1 conv + BN because in_planes != planes

    keys = jax.random.split(key, 16)

    # input (PyTorch convention NCHW) -> NHWC for the kernel
    x_nchw = jax.random.normal(keys[0], (N, in_planes, H, W), jnp.float32)
    x = jnp.transpose(x_nchw, (0, 2, 3, 1))

    def make_bn(k, c):
        k1, k2, k3, k4 = jax.random.split(k, 4)
        return {
            "gamma": 1.0 + 0.1 * jax.random.normal(k1, (c,), jnp.float32),
            "beta": 0.1 * jax.random.normal(k2, (c,), jnp.float32),
            "mean": 0.1 * jax.random.normal(k3, (c,), jnp.float32),
            "var": jax.random.uniform(k4, (c,), jnp.float32, 0.5, 1.5),
        }

    w1 = 0.1 * jax.random.normal(keys[1], (planes, in_planes, 3, 3), jnp.float32)
    w2 = 0.1 * jax.random.normal(keys[2], (planes, planes, 3, 3), jnp.float32)
    w3 = 0.1 * jax.random.normal(keys[3], (planes, planes, 3, 3), jnp.float32)
    need_shortcut_conv = (stride != 1) or (in_planes != planes)
    w_sc = (0.1 * jax.random.normal(keys[4], (planes, in_planes, 1, 1), jnp.float32)
            if need_shortcut_conv else None)

    params = {
        "w1_oihw": w1, "w1_hwio": jnp.transpose(w1, (2, 3, 1, 0)),
        "w2_oihw": w2, "w2_hwio": jnp.transpose(w2, (2, 3, 1, 0)),
        "w3_oihw": w3, "w3_hwio": jnp.transpose(w3, (2, 3, 1, 0)),
        "w_sc_oihw": w_sc,
        "w_sc_io": (jnp.transpose(w_sc[:, :, 0, 0], (1, 0)) if w_sc is not None else None),
        "bn1": make_bn(keys[5], planes),
        "bn2": make_bn(keys[6], planes),
        "bn3": make_bn(keys[7], planes),
        "bnsc": make_bn(keys[8], planes) if need_shortcut_conv else None,
    }

    out = resblock_forward(x, params, stride=stride)
    out = jax.block_until_ready(out)

    ref = resblock_ref(x, params, stride=stride)
    ref = jax.block_until_ready(ref)

    assert out.shape == (N, H // stride, W // stride, planes), out.shape
    assert jnp.allclose(out, ref, rtol=1e-3, atol=1e-3), (
        float(jnp.max(jnp.abs(out - ref))))

    print("KERNEL_OK")
</pallas_src>

<mosaic_0001>
module attributes {stable_mosaic.version = 11 : i64} {
  func.func @kernel(%arg0: i32, %arg1: memref<4x16x128xf32, #tpu.memory_space<vmem>>, %arg2: memref<3x128x128xf32, #tpu.memory_space<vmem>>, %arg3: memref<1x128xf32, #tpu.memory_space<vmem>>, %arg4: memref<1x128xf32, #tpu.memory_space<vmem>>, %arg5: memref<3x128x128xf32, #tpu.memory_space<vmem>>, %arg6: memref<1x128xf32, #tpu.memory_space<vmem>>, %arg7: memref<1x128xf32, #tpu.memory_space<vmem>>, %arg8: memref<3x128x128xf32, #tpu.memory_space<vmem>>, %arg9: memref<1x128xf32, #tpu.memory_space<vmem>>, %arg10: memref<1x128xf32, #tpu.memory_space<vmem>>, %arg11: memref<128x128xf32, #tpu.memory_space<vmem>>, %arg12: memref<1x128xf32, #tpu.memory_space<vmem>>, %arg13: memref<1x128xf32, #tpu.memory_space<vmem>>, %arg14: memref<4x16x128xf32, #tpu.memory_space<vmem>>, %arg15: memref<4x18x128xf32, #tpu.memory_space<vmem>>, %arg16: memref<4x18x128xf32, #tpu.memory_space<vmem>>, %arg17: memref<4x18x128xf32, #tpu.memory_space<vmem>>) attributes {dimension_semantics = [#tpu.dimension_semantics<parallel>], iteration_bounds = array<i64: 2>, scalar_prefetch = 0 : i64, scratch_operands = 3 : i64, tpu.core_type = #tpu.core_type<tc>, window_params = [{transform_indices = @transform_0, window_bounds = array<i64: 4, 16, 128>}, {pipeline_mode = #tpu.pipeline_mode<synchronous>, transform_indices = @transform_1, window_bounds = array<i64: 3, 128, 128>}, {pipeline_mode = #tpu.pipeline_mode<synchronous>, transform_indices = @transform_2, window_bounds = array<i64: 1, 128>}, {pipeline_mode = #tpu.pipeline_mode<synchronous>, transform_indices = @transform_3, window_bounds = array<i64: 1, 128>}, {pipeline_mode = #tpu.pipeline_mode<synchronous>, transform_indices = @transform_4, window_bounds = array<i64: 3, 128, 128>}, {pipeline_mode = #tpu.pipeline_mode<synchronous>, transform_indices = @transform_5, window_bounds = array<i64: 1, 128>}, {pipeline_mode = #tpu.pipeline_mode<synchronous>, transform_indices = @transform_6, window_bounds = array<i64: 1, 128>}, {pipeline_mode = #tpu.pipeline_mode<synchronous>, transform_indices = @transform_7, window_bounds = array<i64: 3, 128, 128>}, {pipeline_mode = #tpu.pipeline_mode<synchronous>, transform_indices = @transform_8, window_bounds = array<i64: 1, 128>}, {pipeline_mode = #tpu.pipeline_mode<synchronous>, transform_indices = @transform_9, window_bounds = array<i64: 1, 128>}, {pipeline_mode = #tpu.pipeline_mode<synchronous>, transform_indices = @transform_10, window_bounds = array<i64: 128, 128>}, {pipeline_mode = #tpu.pipeline_mode<synchronous>, transform_indices = @transform_11, window_bounds = array<i64: 1, 128>}, {pipeline_mode = #tpu.pipeline_mode<synchronous>, transform_indices = @transform_12, window_bounds = array<i64: 1, 128>}, {transform_indices = @transform_13, window_bounds = array<i64: 4, 16, 128>}]} {
    %cst = arith.constant 0.000000e+00 : f32
    %0 = vector.broadcast %cst : f32 to vector<4x1x128xf32>
    %c0 = arith.constant 0 : index
    %c0_0 = arith.constant 0 : index
    %c0_1 = arith.constant 0 : index
    %1 = vector.load %arg15[%c0, %c0_0, %c0_1] : memref<4x18x128xf32, #tpu.memory_space<vmem>>, vector<4x1x128xf32>
    tpu.vector_store %arg15[%c0, %c0_0, %c0_1], %0 {strides = array<i32>} : memref<4x18x128xf32, #tpu.memory_space<vmem>>, vector<4x1x128xf32>,
    %c0_2 = arith.constant 0 : index
    %c17 = arith.constant 17 : index
    %c0_3 = arith.constant 0 : index
    %2 = vector.load %arg15[%c0_2, %c17, %c0_3] : memref<4x18x128xf32, #tpu.memory_space<vmem>>, vector<4x1x128xf32>
    tpu.vector_store %arg15[%c0_2, %c17, %c0_3], %0 {strides = array<i32>} : memref<4x18x128xf32, #tpu.memory_space<vmem>>, vector<4x1x128xf32>,
    %c0_4 = arith.constant 0 : index
    %c0_5 = arith.constant 0 : index
    %c0_6 = arith.constant 0 : index
    %3 = vector.load %arg1[%c0_4, %c0_5, %c0_6] : memref<4x16x128xf32, #tpu.memory_space<vmem>>, vector<4x16x128xf32>
    %c0_7 = arith.constant 0 : index
    %c1 = arith.constant 1 : index
    %c0_8 = arith.constant 0 : index
    %4 = vector.load %arg15[%c0_7, %c1, %c0_8] : memref<4x18x128xf32, #tpu.memory_space<vmem>>, vector<4x16x128xf32>
    tpu.vector_store %arg15[%c0_7, %c1, %c0_8], %3 {strides = array<i32>} : memref<4x18x128xf32, #tpu.memory_space<vmem>>, vector<4x16x128xf32>,
    %cst_9 = arith.constant 0.000000e+00 : f32
    %5 = vector.broadcast %cst_9 : f32 to vector<64x128xf32>
    %c0_10 = arith.constant 0 : index
    %c0_11 = arith.constant 0 : index
    %c0_12 = arith.constant 0 : index
    %6 = vector.load %arg15[%c0_10, %c0_11, %c0_12] : memref<4x18x128xf32, #tpu.memory_space<vmem>>, vector<4x16x128xf32>
    %7 = vector.shape_cast %6 : vector<4x16x128xf32> to vector<64x128xf32>
    %c0_13 = arith.constant 0 : index
    %c0_14 = arith.constant 0 : index
    %c0_15 = arith.constant 0 : index
    %8 = vector.load %arg2[%c0_13, %c0_14, %c0_15] : memref<3x128x128xf32, #tpu.memory_space<vmem>>, vector<1x128x128xf32>
    %9 = vector.shape_cast %8 : vector<1x128x128xf32> to vector<128x128xf32>
    %cst_16 = arith.constant dense<0.000000e+00> : vector<64x128xf32>
    %10 = tpu.matmul %7, %9, %cst_16 {dimension_numbers = #tpu.dot_dimension_numbers<[1], [0], [0], [1], [0, 0, 1, 1], [], []>} : vector<64x128xf32>, vector<128x128xf32>, vector<64x128xf32> -> vector<64x128xf32>
    %11 = arith.addf %5, %10 : vector<64x128xf32>
    %c0_17 = arith.constant 0 : index
    %c1_18 = arith.constant 1 : index
    %c0_19 = arith.constant 0 : index
    %12 = vector.load %arg15[%c0_17, %c1_18, %c0_19] : memref<4x18x128xf32, #tpu.memory_space<vmem>>, vector<4x16x128xf32>
    %13 = vector.shape_cast %12 : vector<4x16x128xf32> to vector<64x128xf32>
    %c1_20 = arith.constant 1 : index
    %c0_21 = arith.constant 0 : index
    %c0_22 = arith.constant 0 : index
    %14 = vector.load %arg2[%c1_20, %c0_21, %c0_22] : memref<3x128x128xf32, #tpu.memory_space<vmem>>, vector<1x128x128xf32>
    %15 = vector.shape_cast %14 : vector<1x128x128xf32> to vector<128x128xf32>
    %cst_23 = arith.constant dense<0.000000e+00> : vector<64x128xf32>
    %16 = tpu.matmul %13, %15, %cst_23 {dimension_numbers = #tpu.dot_dimension_numbers<[1], [0], [0], [1], [0, 0, 1, 1], [], []>} : vector<64x128xf32>, vector<128x128xf32>, vector<64x128xf32> -> vector<64x128xf32>
    %17 = arith.addf %11, %16 : vector<64x128xf32>
    %c0_24 = arith.constant 0 : index
    %c2 = arith.constant 2 : index
    %c0_25 = arith.constant 0 : index
    %18 = vector.load %arg15[%c0_24, %c2, %c0_25] : memref<4x18x128xf32, #tpu.memory_space<vmem>>, vector<4x16x128xf32>
    %19 = vector.shape_cast %18 : vector<4x16x128xf32> to vector<64x128xf32>
    %c2_26 = arith.constant 2 : index
    %c0_27 = arith.constant 0 : index
    %c0_28 = arith.constant 0 : index
    %20 = vector.load %arg2[%c2_26, %c0_27, %c0_28] : memref<3x128x128xf32, #tpu.memory_space<vmem>>, vector<1x128x128xf32>
    %21 = vector.shape_cast %20 : vector<1x128x128xf32> to vector<128x128xf32>
    %cst_29 = arith.constant dense<0.000000e+00> : vector<64x128xf32>
    %22 = tpu.matmul %19, %21, %cst_29 {dimension_numbers = #tpu.dot_dimension_numbers<[1], [0], [0], [1], [0, 0, 1, 1], [], []>} : vector<64x128xf32>, vector<128x128xf32>, vector<64x128xf32> -> vector<64x128xf32>
    %23 = arith.addf %17, %22 : vector<64x128xf32>
    %c0_30 = arith.constant 0 : index
    %c0_31 = arith.constant 0 : index
    %24 = vector.load %arg3[%c0_30, %c0_31] : memref<1x128xf32, #tpu.memory_space<vmem>>, vector<1x128xf32>
    %25 = vector.broadcast %24 : vector<1x128xf32> to vector<64x128xf32>
    %26 = arith.mulf %23, %25 : vector<64x128xf32>
    %c0_32 = arith.constant 0 : index
    %c0_33 = arith.constant 0 : index
    %27 = vector.load %arg4[%c0_32, %c0_33] : memref<1x128xf32, #tpu.memory_space<vmem>>, vector<1x128xf32>
    %28 = vector.broadcast %27 : vector<1x128xf32> to vector<64x128xf32>
    %29 = arith.addf %26, %28 : vector<64x128xf32>
    %cst_34 = arith.constant 0.000000e+00 : f32
    %30 = vector.broadcast %cst_34 : f32 to vector<64x128xf32>
    %31 = arith.maximumf %29, %30 : vector<64x128xf32>
    %cst_35 = arith.constant 0.000000e+00 : f32
    %32 = vector.broadcast %cst_35 : f32 to vector<4x1x128xf32>
    %c0_36 = arith.constant 0 : index
    %c0_37 = arith.constant 0 : index
    %c0_38 = arith.constant 0 : index
    %33 = vector.load %arg16[%c0_36, %c0_37, %c0_38] : memref<4x18x128xf32, #tpu.memory_space<vmem>>, vector<4x1x128xf32>
    tpu.vector_store %arg16[%c0_36, %c0_37, %c0_38], %32 {strides = array<i32>} : memref<4x18x128xf32, #tpu.memory_space<vmem>>, vector<4x1x128xf32>,
    %c0_39 = arith.constant 0 : index
    %c17_40 = arith.constant 17 : index
    %c0_41 = arith.constant 0 : index
    %34 = vector.load %arg16[%c0_39, %c17_40, %c0_41] : memref<4x18x128xf32, #tpu.memory_space<vmem>>, vector<4x1x128xf32>
    tpu.vector_store %arg16[%c0_39, %c17_40, %c0_41], %32 {strides = array<i32>} : memref<4x18x128xf32, #tpu.memory_space<vmem>>, vector<4x1x128xf32>,
    %35 = vector.shape_cast %31 : vector<64x128xf32> to vector<4x16x128xf32>
    %c0_42 = arith.constant 0 : index
    %c1_43 = arith.constant 1 : index
    %c0_44 = arith.constant 0 : index
    %36 = vector.load %arg16[%c0_42, %c1_43, %c0_44] : memref<4x18x128xf32, #tpu.memory_space<vmem>>, vector<4x16x128xf32>
    tpu.vector_store %arg16[%c0_42, %c1_43, %c0_44], %35 {strides = array<i32>} : memref<4x18x128xf32, #tpu.memory_space<vmem>>, vector<4x16x128xf32>,
    %cst_45 = arith.constant 0.000000e+00 : f32
    %37 = vector.broadcast %cst_45 : f32 to vector<64x128xf32>
    %c0_46 = arith.constant 0 : index
    %c0_47 = arith.constant 0 : index
    %c0_48 = arith.constant 0 : index
    %38 = vector.load %arg16[%c0_46, %c0_47, %c0_48] : memref<4x18x128xf32, #tpu.memory_space<vmem>>, vector<4x16x128xf32>
    %39 = vector.shape_cast %38 : vector<4x16x128xf32> to vector<64x128xf32>
    %c0_49 = arith.constant 0 : index
    %c0_50 = arith.constant 0 : index
    %c0_51 = arith.constant 0 : index
    %40 = vector.load %arg5[%c0_49, %c0_50, %c0_51] : memref<3x128x128xf32, #tpu.memory_space<vmem>>, vector<1x128x128xf32>
    %41 = vector.shape_cast %40 : vector<1x128x128xf32> to vector<128x128xf32>
    %cst_52 = arith.constant dense<0.000000e+00> : vector<64x128xf32>
    %42 = tpu.matmul %39, %41, %cst_52 {dimension_numbers = #tpu.dot_dimension_numbers<[1], [0], [0], [1], [0, 0, 1, 1], [], []>} : vector<64x128xf32>, vector<128x128xf32>, vector<64x128xf32> -> vector<64x128xf32>
    %43 = arith.addf %37, %42 : vector<64x128xf32>
    %c0_53 = arith.constant 0 : index
    %c1_54 = arith.constant 1 : index
    %c0_55 = arith.constant 0 : index
    %44 = vector.load %arg16[%c0_53, %c1_54, %c0_55] : memref<4x18x128xf32, #tpu.memory_space<vmem>>, vector<4x16x128xf32>
    %45 = vector.shape_cast %44 : vector<4x16x128xf32> to vector<64x128xf32>
    %c1_56 = arith.constant 1 : index
    %c0_57 = arith.constant 0 : index
    %c0_58 = arith.constant 0 : index
    %46 = vector.load %arg5[%c1_56, %c0_57, %c0_58] : memref<3x128x128xf32, #tpu.memory_space<vmem>>, vector<1x128x128xf32>
    %47 = vector.shape_cast %46 : vector<1x128x128xf32> to vector<128x128xf32>
    %cst_59 = arith.constant dense<0.000000e+00> : vector<64x128xf32>
    %48 = tpu.matmul %45, %47, %cst_59 {dimension_numbers = #tpu.dot_dimension_numbers<[1], [0], [0], [1], [0, 0, 1, 1], [], []>} : vector<64x128xf32>, vector<128x128xf32>, vector<64x128xf32> -> vector<64x128xf32>
    %49 = arith.addf %43, %48 : vector<64x128xf32>
    %c0_60 = arith.constant 0 : index
    %c2_61 = arith.constant 2 : index
    %c0_62 = arith.constant 0 : index
    %50 = vector.load %arg16[%c0_60, %c2_61, %c0_62] : memref<4x18x128xf32, #tpu.memory_space<vmem>>, vector<4x16x128xf32>
    %51 = vector.shape_cast %50 : vector<4x16x128xf32> to vector<64x128xf32>
    %c2_63 = arith.constant 2 : index
    %c0_64 = arith.constant 0 : index
    %c0_65 = arith.constant 0 : index
    %52 = vector.load %arg5[%c2_63, %c0_64, %c0_65] : memref<3x128x128xf32, #tpu.memory_space<vmem>>, vector<1x128x128xf32>
    %53 = vector.shape_cast %52 : vector<1x128x128xf32> to vector<128x128xf32>
    %cst_66 = arith.constant dense<0.000000e+00> : vector<64x128xf32>
    %54 = tpu.matmul %51, %53, %cst_66 {dimension_numbers = #tpu.dot_dimension_numbers<[1], [0], [0], [1], [0, 0, 1, 1], [], []>} : vector<64x128xf32>, vector<128x128xf32>, vector<64x128xf32> -> vector<64x128xf32>
    %55 = arith.addf %49, %54 : vector<64x128xf32>
    %c0_67 = arith.constant 0 : index
    %c0_68 = arith.constant 0 : index
    %56 = vector.load %arg6[%c0_67, %c0_68] : memref<1x128xf32, #tpu.memory_space<vmem>>, vector<1x128xf32>
    %57 = vector.broadcast %56 : vector<1x128xf32> to vector<64x128xf32>
    %58 = arith.mulf %55, %57 : vector<64x128xf32>
    %c0_69 = arith.constant 0 : index
    %c0_70 = arith.constant 0 : index
    %59 = vector.load %arg7[%c0_69, %c0_70] : memref<1x128xf32, #tpu.memory_space<vmem>>, vector<1x128xf32>
    %60 = vector.broadcast %59 : vector<1x128xf32> to vector<64x128xf32>
    %61 = arith.addf %58, %60 : vector<64x128xf32>
    %c0_71 = arith.constant 0 : index
    %c0_72 = arith.constant 0 : index
    %c0_73 = arith.constant 0 : index
    %62 = vector.load %arg17[%c0_71, %c0_72, %c0_73] : memref<4x18x128xf32, #tpu.memory_space<vmem>>, vector<4x1x128xf32>
    tpu.vector_store %arg17[%c0_71, %c0_72, %c0_73], %32 {strides = array<i32>} : memref<4x18x128xf32, #tpu.memory_space<vmem>>, vector<4x1x128xf32>,
    %c0_74 = arith.constant 0 : index
    %c17_75 = arith.constant 17 : index
    %c0_76 = arith.constant 0 : index
    %63 = vector.load %arg17[%c0_74, %c17_75, %c0_76] : memref<4x18x128xf32, #tpu.memory_space<vmem>>, vector<4x1x128xf32>
    tpu.vector_store %arg17[%c0_74, %c17_75, %c0_76], %32 {strides = array<i32>} : memref<4x18x128xf32, #tpu.memory_space<vmem>>, vector<4x1x128xf32>,
    %64 = vector.shape_cast %61 : vector<64x128xf32> to vector<4x16x128xf32>
    %c0_77 = arith.constant 0 : index
    %c1_78 = arith.constant 1 : index
    %c0_79 = arith.constant 0 : index
    %65 = vector.load %arg17[%c0_77, %c1_78, %c0_79] : memref<4x18x128xf32, #tpu.memory_space<vmem>>, vector<4x16x128xf32>
    tpu.vector_store %arg17[%c0_77, %c1_78, %c0_79], %64 {strides = array<i32>} : memref<4x18x128xf32, #tpu.memory_space<vmem>>, vector<4x16x128xf32>,
    %cst_80 = arith.constant 0.000000e+00 : f32
    %66 = vector.broadcast %cst_80 : f32 to vector<64x128xf32>
    %c0_81 = arith.constant 0 : index
    %c0_82 = arith.constant 0 : index
    %c0_83 = arith.constant 0 : index
    %67 = vector.load %arg17[%c0_81, %c0_82, %c0_83] : memref<4x18x128xf32, #tpu.memory_space<vmem>>, vector<4x16x128xf32>
    %68 = vector.shape_cast %67 : vector<4x16x128xf32> to vector<64x128xf32>
    %c0_84 = arith.constant 0 : index
    %c0_85 = arith.constant 0 : index
    %c0_86 = arith.constant 0 : index
    %69 = vector.load %arg8[%c0_84, %c0_85, %c0_86] : memref<3x128x128xf32, #tpu.memory_space<vmem>>, vector<1x128x128xf32>
    %70 = vector.shape_cast %69 : vector<1x128x128xf32> to vector<128x128xf32>
    %cst_87 = arith.constant dense<0.000000e+00> : vector<64x128xf32>
    %71 = tpu.matmul %68, %70, %cst_87 {dimension_numbers = #tpu.dot_dimension_numbers<[1], [0], [0], [1], [0, 0, 1, 1], [], []>} : vector<64x128xf32>, vector<128x128xf32>, vector<64x128xf32> -> vector<64x128xf32>
    %72 = arith.addf %66, %71 : vector<64x128xf32>
    %c0_88 = arith.constant 0 : index
    %c1_89 = arith.constant 1 : index
    %c0_90 = arith.constant 0 : index
    %73 = vector.load %arg17[%c0_88, %c1_89, %c0_90] : memref<4x18x128xf32, #tpu.memory_space<vmem>>, vector<4x16x128xf32>
    %74 = vector.shape_cast %73 : vector<4x16x128xf32> to vector<64x128xf32>
    %c1_91 = arith.constant 1 : index
    %c0_92 = arith.constant 0 : index
    %c0_93 = arith.constant 0 : index
    %75 = vector.load %arg8[%c1_91, %c0_92, %c0_93] : memref<3x128x128xf32, #tpu.memory_space<vmem>>, vector<1x128x128xf32>
    %76 = vector.shape_cast %75 : vector<1x128x128xf32> to vector<128x128xf32>
    %cst_94 = arith.constant dense<0.000000e+00> : vector<64x128xf32>
    %77 = tpu.matmul %74, %76, %cst_94 {dimension_numbers = #tpu.dot_dimension_numbers<[1], [0], [0], [1], [0, 0, 1, 1], [], []>} : vector<64x128xf32>, vector<128x128xf32>, vector<64x128xf32> -> vector<64x128xf32>
    %78 = arith.addf %72, %77 : vector<64x128xf32>
    %c0_95 = arith.constant 0 : index
    %c2_96 = arith.constant 2 : index
    %c0_97 = arith.constant 0 : index
    %79 = vector.load %arg17[%c0_95, %c2_96, %c0_97] : memref<4x18x128xf32, #tpu.memory_space<vmem>>, vector<4x16x128xf32>
    %80 = vector.shape_cast %79 : vector<4x16x128xf32> to vector<64x128xf32>
    %c2_98 = arith.constant 2 : index
    %c0_99 = arith.constant 0 : index
    %c0_100 = arith.constant 0 : index
    %81 = vector.load %arg8[%c2_98, %c0_99, %c0_100] : memref<3x128x128xf32, #tpu.memory_space<vmem>>, vector<1x128x128xf32>
    %82 = vector.shape_cast %81 : vector<1x128x128xf32> to vector<128x128xf32>
    %cst_101 = arith.constant dense<0.000000e+00> : vector<64x128xf32>
    %83 = tpu.matmul %80, %82, %cst_101 {dimension_numbers = #tpu.dot_dimension_numbers<[1], [0], [0], [1], [0, 0, 1, 1], [], []>} : vector<64x128xf32>, vector<128x128xf32>, vector<64x128xf32> -> vector<64x128xf32>
    %84 = arith.addf %78, %83 : vector<64x128xf32>
    %c0_102 = arith.constant 0 : index
    %c0_103 = arith.constant 0 : index
    %85 = vector.load %arg9[%c0_102, %c0_103] : memref<1x128xf32, #tpu.memory_space<vmem>>, vector<1x128xf32>
    %86 = vector.broadcast %85 : vector<1x128xf32> to vector<64x128xf32>
    %87 = arith.mulf %84, %86 : vector<64x128xf32>
    %c0_104 = arith.constant 0 : index
    %c0_105 = arith.constant 0 : index
    %88 = vector.load %arg10[%c0_104, %c0_105] : memref<1x128xf32, #tpu.memory_space<vmem>>, vector<1x128xf32>
    %89 = vector.broadcast %88 : vector<1x128xf32> to vector<64x128xf32>
    %90 = arith.addf %87, %89 : vector<64x128xf32>
    %c0_106 = arith.constant 0 : index
    %c0_107 = arith.constant 0 : index
    %91 = vector.load %arg11[%c0_106, %c0_107] : memref<128x128xf32, #tpu.memory_space<vmem>>, vector<128x128xf32>
    %cst_108 = arith.constant dense<0.000000e+00> : vector<64x128xf32>
    %92 = tpu.matmul %13, %91, %cst_108 {dimension_numbers = #tpu.dot_dimension_numbers<[1], [0], [0], [1], [0, 0, 1, 1], [], []>} : vector<64x128xf32>, vector<128x128xf32>, vector<64x128xf32> -> vector<64x128xf32>
    %c0_109 = arith.constant 0 : index
    %c0_110 = arith.constant 0 : index
    %93 = vector.load %arg12[%c0_109, %c0_110] : memref<1x128xf32, #tpu.memory_space<vmem>>, vector<1x128xf32>
    %94 = vector.broadcast %93 : vector<1x128xf32> to vector<64x128xf32>
    %95 = arith.mulf %92, %94 : vector<64x128xf32>
    %c0_111 = arith.constant 0 : index
    %c0_112 = arith.constant 0 : index
    %96 = vector.load %arg13[%c0_111, %c0_112] : memref<1x128xf32, #tpu.memory_space<vmem>>, vector<1x128xf32>
    %97 = vector.broadcast %96 : vector<1x128xf32> to vector<64x128xf32>
    %98 = arith.addf %95, %97 : vector<64x128xf32>
    %99 = arith.addf %90, %98 : vector<64x128xf32>
    %cst_113 = arith.constant 0.000000e+00 : f32
    %100 = vector.broadcast %cst_113 : f32 to vector<64x128xf32>
    %101 = arith.maximumf %99, %100 : vector<64x128xf32>
    %102 = vector.shape_cast %101 : vector<64x128xf32> to vector<4x16x128xf32>
    %c0_114 = arith.constant 0 : index
    %c0_115 = arith.constant 0 : index
    %c0_116 = arith.constant 0 : index
    %103 = vector.load %arg14[%c0_114, %c0_115, %c0_116] : memref<4x16x128xf32, #tpu.memory_space<vmem>>, vector<4x16x128xf32>
    tpu.vector_store %arg14[%c0_114, %c0_115, %c0_116], %102 {strides = array<i32>} : memref<4x16x128xf32, #tpu.memory_space<vmem>>, vector<4x16x128xf32>,
    return
  }
  func.func @transform_0(%arg0: i32) -> (i32, i32, i32) {
    %c0_i32 = arith.constant 0 : i32
    %c0_i32_0 = arith.constant 0 : i32
    %c0_i32_1 = arith.constant 0 : i32
    return %arg0, %c0_i32, %c0_i32_0 : i32, i32, i32
  }
  func.func @transform_1(%arg0: i32) -> (i32, i32, i32) {
    %c0_i32 = arith.constant 0 : i32
    %c0_i32_0 = arith.constant 0 : i32
    %c0_i32_1 = arith.constant 0 : i32
    %c0_i32_2 = arith.constant 0 : i32
    return %c0_i32, %c0_i32_0, %c0_i32_1 : i32, i32, i32
  }
  func.func @transform_2(%arg0: i32) -> (i32, i32) {
    %c0_i32 = arith.constant 0 : i32
    %c0_i32_0 = arith.constant 0 : i32
    %c0_i32_1 = arith.constant 0 : i32
    return %c0_i32, %c0_i32_0 : i32, i32
  }
  func.func @transform_3(%arg0: i32) -> (i32, i32) {
    %c0_i32 = arith.constant 0 : i32
    %c0_i32_0 = arith.constant 0 : i32
    %c0_i32_1 = arith.constant 0 : i32
    return %c0_i32, %c0_i32_0 : i32, i32
  }
  func.func @transform_4(%arg0: i32) -> (i32, i32, i32) {
    %c0_i32 = arith.constant 0 : i32
    %c0_i32_0 = arith.constant 0 : i32
    %c0_i32_1 = arith.constant 0 : i32
    %c0_i32_2 = arith.constant 0 : i32
    return %c0_i32, %c0_i32_0, %c0_i32_1 : i32, i32, i32
  }
  func.func @transform_5(%arg0: i32) -> (i32, i32) {
    %c0_i32 = arith.constant 0 : i32
    %c0_i32_0 = arith.constant 0 : i32
    %c0_i32_1 = arith.constant 0 : i32
    return %c0_i32, %c0_i32_0 : i32, i32
  }
  func.func @transform_6(%arg0: i32) -> (i32, i32) {
    %c0_i32 = arith.constant 0 : i32
    %c0_i32_0 = arith.constant 0 : i32
    %c0_i32_1 = arith.constant 0 : i32
    return %c0_i32, %c0_i32_0 : i32, i32
  }
  func.func @transform_7(%arg0: i32) -> (i32, i32, i32) {
    %c0_i32 = arith.constant 0 : i32
    %c0_i32_0 = arith.constant 0 : i32
    %c0_i32_1 = arith.constant 0 : i32
    %c0_i32_2 = arith.constant 0 : i32
    return %c0_i32, %c0_i32_0, %c0_i32_1 : i32, i32, i32
  }
  func.func @transform_8(%arg0: i32) -> (i32, i32) {
    %c0_i32 = arith.constant 0 : i32
    %c0_i32_0 = arith.constant 0 : i32
    %c0_i32_1 = arith.constant 0 : i32
    return %c0_i32, %c0_i32_0 : i32, i32
  }
  func.func @transform_9(%arg0: i32) -> (i32, i32) {
    %c0_i32 = arith.constant 0 : i32
    %c0_i32_0 = arith.constant 0 : i32
    %c0_i32_1 = arith.constant 0 : i32
    return %c0_i32, %c0_i32_0 : i32, i32
  }
  func.func @transform_10(%arg0: i32) -> (i32, i32) {
    %c0_i32 = arith.constant 0 : i32
    %c0_i32_0 = arith.constant 0 : i32
    %c0_i32_1 = arith.constant 0 : i32
    return %c0_i32, %c0_i32_0 : i32, i32
  }
  func.func @transform_11(%arg0: i32) -> (i32, i32) {
    %c0_i32 = arith.constant 0 : i32
    %c0_i32_0 = arith.constant 0 : i32
    %c0_i32_1 = arith.constant 0 : i32
    return %c0_i32, %c0_i32_0 : i32, i32
  }
  func.func @transform_12(%arg0: i32) -> (i32, i32) {
    %c0_i32 = arith.constant 0 : i32
    %c0_i32_0 = arith.constant 0 : i32
    %c0_i32_1 = arith.constant 0 : i32
    return %c0_i32, %c0_i32_0 : i32, i32
  }
  func.func @transform_13(%arg0: i32) -> (i32, i32, i32) {
    %c0_i32 = arith.constant 0 : i32
    %c0_i32_0 = arith.constant 0 : i32
    %c0_i32_1 = arith.constant 0 : i32
    return %arg0, %c0_i32, %c0_i32_0 : i32, i32, i32
  }
}

module attributes {stable_mosaic.version = 11 : i64} {
  func.func @kernel(%arg0: i32, %arg1: memref<4x16x128xf32, #tpu.memory_space<vmem>>, %arg2: memref<3x128x128xf32, #tpu.memory_space<vmem>>, %arg3: memref<1x128xf32, #tpu.memory_space<vmem>>, %arg4: memref<1x128xf32, #tpu.memory_space<vmem>>, %arg5: memref<3x128x128xf32, #tpu.memory_space<vmem>>, %arg6: memref<1x128xf32, #tpu.memory_space<vmem>>, %arg7: memref<1x128xf32, #tpu.memory_space<vmem>>, %arg8: memref<3x128x128xf32, #tpu.memory_space<vmem>>, %arg9: memref<1x128xf32, #tpu.memory_space<vmem>>, %arg10: memref<1x128xf32, #tpu.memory_space<vmem>>, %arg11: memref<128x128xf32, #tpu.memory_space<vmem>>, %arg12: memref<1x128xf32, #tpu.memory_space<vmem>>, %arg13: memref<1x128xf32, #tpu.memory_space<vmem>>, %arg14: memref<4x16x128xf32, #tpu.memory_space<vmem>>, %arg15: memref<4x18x128xf32, #tpu.memory_space<vmem>>, %arg16: memref<4x18x128xf32, #tpu.memory_space<vmem>>, %arg17: memref<4x18x128xf32, #tpu.memory_space<vmem>>) attributes {dimension_semantics = [#tpu.dimension_semantics<parallel>], iteration_bounds = array<i64: 2>, scalar_prefetch = 0 : i64, scratch_operands = 3 : i64, tpu.core_type = #tpu.core_type<tc>, window_params = [{transform_indices = @transform_0, window_bounds = array<i64: 4, 16, 128>}, {pipeline_mode = #tpu.pipeline_mode<synchronous>, transform_indices = @transform_1, window_bounds = array<i64: 3, 128, 128>}, {pipeline_mode = #tpu.pipeline_mode<synchronous>, transform_indices = @transform_2, window_bounds = array<i64: 1, 128>}, {pipeline_mode = #tpu.pipeline_mode<synchronous>, transform_indices = @transform_3, window_bounds = array<i64: 1, 128>}, {pipeline_mode = #tpu.pipeline_mode<synchronous>, transform_indices = @transform_4, window_bounds = array<i64: 3, 128, 128>}, {pipeline_mode = #tpu.pipeline_mode<synchronous>, transform_indices = @transform_5, window_bounds = array<i64: 1, 128>}, {pipeline_mode = #tpu.pipeline_mode<synchronous>, transform_indices = @transform_6, window_bounds = array<i64: 1, 128>}, {pipeline_mode = #tpu.pipeline_mode<synchronous>, transform_indices = @transform_7, window_bounds = array<i64: 3, 128, 128>}, {pipeline_mode = #tpu.pipeline_mode<synchronous>, transform_indices = @transform_8, window_bounds = array<i64: 1, 128>}, {pipeline_mode = #tpu.pipeline_mode<synchronous>, transform_indices = @transform_9, window_bounds = array<i64: 1, 128>}, {pipeline_mode = #tpu.pipeline_mode<synchronous>, transform_indices = @transform_10, window_bounds = array<i64: 128, 128>}, {pipeline_mode = #tpu.pipeline_mode<synchronous>, transform_indices = @transform_11, window_bounds = array<i64: 1, 128>}, {pipeline_mode = #tpu.pipeline_mode<synchronous>, transform_indices = @transform_12, window_bounds = array<i64: 1, 128>}, {transform_indices = @transform_13, window_bounds = array<i64: 4, 16, 128>}]} {
    %cst = arith.constant 0.000000e+00 : f32
    %0 = vector.broadcast %cst : f32 to vector<4x1x128xf32>
    %c0 = arith.constant 0 : index
    %c0_0 = arith.constant 0 : index
    %c0_1 = arith.constant 0 : index
    %1 = vector.load %arg15[%c0, %c0_0, %c0_1] : memref<4x18x128xf32, #tpu.memory_space<vmem>>, vector<4x1x128xf32>
    tpu.vector_store %arg15[%c0, %c0_0, %c0_1], %0 {strides = array<i32>} : memref<4x18x128xf32, #tpu.memory_space<vmem>>, vector<4x1x128xf32>,
    %c0_2 = arith.constant 0 : index
    %c17 = arith.constant 17 : index
    %c0_3 = arith.constant 0 : index
    %2 = vector.load %arg15[%c0_2, %c17, %c0_3] : memref<4x18x128xf32, #tpu.memory_space<vmem>>, vector<4x1x128xf32>
    tpu.vector_store %arg15[%c0_2, %c17, %c0_3], %0 {strides = array<i32>} : memref<4x18x128xf32, #tpu.memory_space<vmem>>, vector<4x1x128xf32>,
    %c0_4 = arith.constant 0 : index
    %c0_5 = arith.constant 0 : index
    %c0_6 = arith.constant 0 : index
    %3 = vector.load %arg1[%c0_4, %c0_5, %c0_6] : memref<4x16x128xf32, #tpu.memory_space<vmem>>, vector<4x16x128xf32>
    %c0_7 = arith.constant 0 : index
    %c1 = arith.constant 1 : index
    %c0_8 = arith.constant 0 : index
    %4 = vector.load %arg15[%c0_7, %c1, %c0_8] : memref<4x18x128xf32, #tpu.memory_space<vmem>>, vector<4x16x128xf32>
    tpu.vector_store %arg15[%c0_7, %c1, %c0_8], %3 {strides = array<i32>} : memref<4x18x128xf32, #tpu.memory_space<vmem>>, vector<4x16x128xf32>,
    %cst_9 = arith.constant 0.000000e+00 : f32
    %5 = vector.broadcast %cst_9 : f32 to vector<64x128xf32>
    %c0_10 = arith.constant 0 : index
    %c0_11 = arith.constant 0 : index
    %c0_12 = arith.constant 0 : index
    %6 = vector.load %arg15[%c0_10, %c0_11, %c0_12] : memref<4x18x128xf32, #tpu.memory_space<vmem>>, vector<4x16x128xf32>
    %7 = vector.shape_cast %6 : vector<4x16x128xf32> to vector<64x128xf32>
    %c0_13 = arith.constant 0 : index
    %c0_14 = arith.constant 0 : index
    %c0_15 = arith.constant 0 : index
    %8 = vector.load %arg2[%c0_13, %c0_14, %c0_15] : memref<3x128x128xf32, #tpu.memory_space<vmem>>, vector<1x128x128xf32>
    %9 = vector.shape_cast %8 : vector<1x128x128xf32> to vector<128x128xf32>
    %cst_16 = arith.constant dense<0.000000e+00> : vector<64x128xf32>
    %10 = tpu.matmul %7, %9, %cst_16 {dimension_numbers = #tpu.dot_dimension_numbers<[1], [0], [0], [1], [0, 0, 1, 1], [], []>} : vector<64x128xf32>, vector<128x128xf32>, vector<64x128xf32> -> vector<64x128xf32>
    %11 = arith.addf %5, %10 : vector<64x128xf32>
    %c0_17 = arith.constant 0 : index
    %c1_18 = arith.constant 1 : index
    %c0_19 = arith.constant 0 : index
    %12 = vector.load %arg15[%c0_17, %c1_18, %c0_19] : memref<4x18x128xf32, #tpu.memory_space<vmem>>, vector<4x16x128xf32>
    %13 = vector.shape_cast %12 : vector<4x16x128xf32> to vector<64x128xf32>
    %c1_20 = arith.constant 1 : index
    %c0_21 = arith.constant 0 : index
    %c0_22 = arith.constant 0 : index
    %14 = vector.load %arg2[%c1_20, %c0_21, %c0_22] : memref<3x128x128xf32, #tpu.memory_space<vmem>>, vector<1x128x128xf32>
    %15 = vector.shape_cast %14 : vector<1x128x128xf32> to vector<128x128xf32>
    %cst_23 = arith.constant dense<0.000000e+00> : vector<64x128xf32>
    %16 = tpu.matmul %13, %15, %cst_23 {dimension_numbers = #tpu.dot_dimension_numbers<[1], [0], [0], [1], [0, 0, 1, 1], [], []>} : vector<64x128xf32>, vector<128x128xf32>, vector<64x128xf32> -> vector<64x128xf32>
    %17 = arith.addf %11, %16 : vector<64x128xf32>
    %c0_24 = arith.constant 0 : index
    %c2 = arith.constant 2 : index
    %c0_25 = arith.constant 0 : index
    %18 = vector.load %arg15[%c0_24, %c2, %c0_25] : memref<4x18x128xf32, #tpu.memory_space<vmem>>, vector<4x16x128xf32>
    %19 = vector.shape_cast %18 : vector<4x16x128xf32> to vector<64x128xf32>
    %c2_26 = arith.constant 2 : index
    %c0_27 = arith.constant 0 : index
    %c0_28 = arith.constant 0 : index
    %20 = vector.load %arg2[%c2_26, %c0_27, %c0_28] : memref<3x128x128xf32, #tpu.memory_space<vmem>>, vector<1x128x128xf32>
    %21 = vector.shape_cast %20 : vector<1x128x128xf32> to vector<128x128xf32>
    %cst_29 = arith.constant dense<0.000000e+00> : vector<64x128xf32>
    %22 = tpu.matmul %19, %21, %cst_29 {dimension_numbers = #tpu.dot_dimension_numbers<[1], [0], [0], [1], [0, 0, 1, 1], [], []>} : vector<64x128xf32>, vector<128x128xf32>, vector<64x128xf32> -> vector<64x128xf32>
    %23 = arith.addf %17, %22 : vector<64x128xf32>
    %c0_30 = arith.constant 0 : index
    %c0_31 = arith.constant 0 : index
    %24 = vector.load %arg3[%c0_30, %c0_31] : memref<1x128xf32, #tpu.memory_space<vmem>>, vector<1x128xf32>
    %25 = vector.broadcast %24 : vector<1x128xf32> to vector<64x128xf32>
    %26 = arith.mulf %23, %25 : vector<64x128xf32>
    %c0_32 = arith.constant 0 : index
    %c0_33 = arith.constant 0 : index
    %27 = vector.load %arg4[%c0_32, %c0_33] : memref<1x128xf32, #tpu.memory_space<vmem>>, vector<1x128xf32>
    %28 = vector.broadcast %27 : vector<1x128xf32> to vector<64x128xf32>
    %29 = arith.addf %26, %28 : vector<64x128xf32>
    %cst_34 = arith.constant 0.000000e+00 : f32
    %30 = vector.broadcast %cst_34 : f32 to vector<64x128xf32>
    %31 = arith.maximumf %29, %30 : vector<64x128xf32>
    %cst_35 = arith.constant 0.000000e+00 : f32
    %32 = vector.broadcast %cst_35 : f32 to vector<4x1x128xf32>
    %c0_36 = arith.constant 0 : index
    %c0_37 = arith.constant 0 : index
    %c0_38 = arith.constant 0 : index
    %33 = vector.load %arg16[%c0_36, %c0_37, %c0_38] : memref<4x18x128xf32, #tpu.memory_space<vmem>>, vector<4x1x128xf32>
    tpu.vector_store %arg16[%c0_36, %c0_37, %c0_38], %32 {strides = array<i32>} : memref<4x18x128xf32, #tpu.memory_space<vmem>>, vector<4x1x128xf32>,
    %c0_39 = arith.constant 0 : index
    %c17_40 = arith.constant 17 : index
    %c0_41 = arith.constant 0 : index
    %34 = vector.load %arg16[%c0_39, %c17_40, %c0_41] : memref<4x18x128xf32, #tpu.memory_space<vmem>>, vector<4x1x128xf32>
    tpu.vector_store %arg16[%c0_39, %c17_40, %c0_41], %32 {strides = array<i32>} : memref<4x18x128xf32, #tpu.memory_space<vmem>>, vector<4x1x128xf32>,
    %35 = vector.shape_cast %31 : vector<64x128xf32> to vector<4x16x128xf32>
    %c0_42 = arith.constant 0 : index
    %c1_43 = arith.constant 1 : index
    %c0_44 = arith.constant 0 : index
    %36 = vector.load %arg16[%c0_42, %c1_43, %c0_44] : memref<4x18x128xf32, #tpu.memory_space<vmem>>, vector<4x16x128xf32>
    tpu.vector_store %arg16[%c0_42, %c1_43, %c0_44], %35 {strides = array<i32>} : memref<4x18x128xf32, #tpu.memory_space<vmem>>, vector<4x16x128xf32>,
    %cst_45 = arith.constant 0.000000e+00 : f32
    %37 = vector.broadcast %cst_45 : f32 to vector<64x128xf32>
    %c0_46 = arith.constant 0 : index
    %c0_47 = arith.constant 0 : index
    %c0_48 = arith.constant 0 : index
    %38 = vector.load %arg16[%c0_46, %c0_47, %c0_48] : memref<4x18x128xf32, #tpu.memory_space<vmem>>, vector<4x16x128xf32>
    %39 = vector.shape_cast %38 : vector<4x16x128xf32> to vector<64x128xf32>
    %c0_49 = arith.constant 0 : index
    %c0_50 = arith.constant 0 : index
    %c0_51 = arith.constant 0 : index
    %40 = vector.load %arg5[%c0_49, %c0_50, %c0_51] : memref<3x128x128xf32, #tpu.memory_space<vmem>>, vector<1x128x128xf32>
    %41 = vector.shape_cast %40 : vector<1x128x128xf32> to vector<128x128xf32>
    %cst_52 = arith.constant dense<0.000000e+00> : vector<64x128xf32>
    %42 = tpu.matmul %39, %41, %cst_52 {dimension_numbers = #tpu.dot_dimension_numbers<[1], [0], [0], [1], [0, 0, 1, 1], [], []>} : vector<64x128xf32>, vector<128x128xf32>, vector<64x128xf32> -> vector<64x128xf32>
    %43 = arith.addf %37, %42 : vector<64x128xf32>
    %c0_53 = arith.constant 0 : index
    %c1_54 = arith.constant 1 : index
    %c0_55 = arith.constant 0 : index
    %44 = vector.load %arg16[%c0_53, %c1_54, %c0_55] : memref<4x18x128xf32, #tpu.memory_space<vmem>>, vector<4x16x128xf32>
    %45 = vector.shape_cast %44 : vector<4x16x128xf32> to vector<64x128xf32>
    %c1_56 = arith.constant 1 : index
    %c0_57 = arith.constant 0 : index
    %c0_58 = arith.constant 0 : index
    %46 = vector.load %arg5[%c1_56, %c0_57, %c0_58] : memref<3x128x128xf32, #tpu.memory_space<vmem>>, vector<1x128x128xf32>
    %47 = vector.shape_cast %46 : vector<1x128x128xf32> to vector<128x128xf32>
    %cst_59 = arith.constant dense<0.000000e+00> : vector<64x128xf32>
    %48 = tpu.matmul %45, %47, %cst_59 {dimension_numbers = #tpu.dot_dimension_numbers<[1], [0], [0], [1], [0, 0, 1, 1], [], []>} : vector<64x128xf32>, vector<128x128xf32>, vector<64x128xf32> -> vector<64x128xf32>
    %49 = arith.addf %43, %48 : vector<64x128xf32>
    %c0_60 = arith.constant 0 : index
    %c2_61 = arith.constant 2 : index
    %c0_62 = arith.constant 0 : index
    %50 = vector.load %arg16[%c0_60, %c2_61, %c0_62] : memref<4x18x128xf32, #tpu.memory_space<vmem>>, vector<4x16x128xf32>
    %51 = vector.shape_cast %50 : vector<4x16x128xf32> to vector<64x128xf32>
    %c2_63 = arith.constant 2 : index
    %c0_64 = arith.constant 0 : index
    %c0_65 = arith.constant 0 : index
    %52 = vector.load %arg5[%c2_63, %c0_64, %c0_65] : memref<3x128x128xf32, #tpu.memory_space<vmem>>, vector<1x128x128xf32>
    %53 = vector.shape_cast %52 : vector<1x128x128xf32> to vector<128x128xf32>
    %cst_66 = arith.constant dense<0.000000e+00> : vector<64x128xf32>
    %54 = tpu.matmul %51, %53, %cst_66 {dimension_numbers = #tpu.dot_dimension_numbers<[1], [0], [0], [1], [0, 0, 1, 1], [], []>} : vector<64x128xf32>, vector<128x128xf32>, vector<64x128xf32> -> vector<64x128xf32>
    %55 = arith.addf %49, %54 : vector<64x128xf32>
    %c0_67 = arith.constant 0 : index
    %c0_68 = arith.constant 0 : index
    %56 = vector.load %arg6[%c0_67, %c0_68] : memref<1x128xf32, #tpu.memory_space<vmem>>, vector<1x128xf32>
    %57 = vector.broadcast %56 : vector<1x128xf32> to vector<64x128xf32>
    %58 = arith.mulf %55, %57 : vector<64x128xf32>
    %c0_69 = arith.constant 0 : index
    %c0_70 = arith.constant 0 : index
    %59 = vector.load %arg7[%c0_69, %c0_70] : memref<1x128xf32, #tpu.memory_space<vmem>>, vector<1x128xf32>
    %60 = vector.broadcast %59 : vector<1x128xf32> to vector<64x128xf32>
    %61 = arith.addf %58, %60 : vector<64x128xf32>
    %c0_71 = arith.constant 0 : index
    %c0_72 = arith.constant 0 : index
    %c0_73 = arith.constant 0 : index
    %62 = vector.load %arg17[%c0_71, %c0_72, %c0_73] : memref<4x18x128xf32, #tpu.memory_space<vmem>>, vector<4x1x128xf32>
    tpu.vector_store %arg17[%c0_71, %c0_72, %c0_73], %32 {strides = array<i32>} : memref<4x18x128xf32, #tpu.memory_space<vmem>>, vector<4x1x128xf32>,
    %c0_74 = arith.constant 0 : index
    %c17_75 = arith.constant 17 : index
    %c0_76 = arith.constant 0 : index
    %63 = vector.load %arg17[%c0_74, %c17_75, %c0_76] : memref<4x18x128xf32, #tpu.memory_space<vmem>>, vector<4x1x128xf32>
    tpu.vector_store %arg17[%c0_74, %c17_75, %c0_76], %32 {strides = array<i32>} : memref<4x18x128xf32, #tpu.memory_space<vmem>>, vector<4x1x128xf32>,
    %64 = vector.shape_cast %61 : vector<64x128xf32> to vector<4x16x128xf32>
    %c0_77 = arith.constant 0 : index
    %c1_78 = arith.constant 1 : index
    %c0_79 = arith.constant 0 : index
    %65 = vector.load %arg17[%c0_77, %c1_78, %c0_79] : memref<4x18x128xf32, #tpu.memory_space<vmem>>, vector<4x16x128xf32>
    tpu.vector_store %arg17[%c0_77, %c1_78, %c0_79], %64 {strides = array<i32>} : memref<4x18x128xf32, #tpu.memory_space<vmem>>, vector<4x16x128xf32>,
    %cst_80 = arith.constant 0.000000e+00 : f32
    %66 = vector.broadcast %cst_80 : f32 to vector<64x128xf32>
    %c0_81 = arith.constant 0 : index
    %c0_82 = arith.constant 0 : index
    %c0_83 = arith.constant 0 : index
    %67 = vector.load %arg17[%c0_81, %c0_82, %c0_83] : memref<4x18x128xf32, #tpu.memory_space<vmem>>, vector<4x16x128xf32>
    %68 = vector.shape_cast %67 : vector<4x16x128xf32> to vector<64x128xf32>
    %c0_84 = arith.constant 0 : index
    %c0_85 = arith.constant 0 : index
    %c0_86 = arith.constant 0 : index
    %69 = vector.load %arg8[%c0_84, %c0_85, %c0_86] : memref<3x128x128xf32, #tpu.memory_space<vmem>>, vector<1x128x128xf32>
    %70 = vector.shape_cast %69 : vector<1x128x128xf32> to vector<128x128xf32>
    %cst_87 = arith.constant dense<0.000000e+00> : vector<64x128xf32>
    %71 = tpu.matmul %68, %70, %cst_87 {dimension_numbers = #tpu.dot_dimension_numbers<[1], [0], [0], [1], [0, 0, 1, 1], [], []>} : vector<64x128xf32>, vector<128x128xf32>, vector<64x128xf32> -> vector<64x128xf32>
    %72 = arith.addf %66, %71 : vector<64x128xf32>
    %c0_88 = arith.constant 0 : index
    %c1_89 = arith.constant 1 : index
    %c0_90 = arith.constant 0 : index
    %73 = vector.load %arg17[%c0_88, %c1_89, %c0_90] : memref<4x18x128xf32, #tpu.memory_space<vmem>>, vector<4x16x128xf32>
    %74 = vector.shape_cast %73 : vector<4x16x128xf32> to vector<64x128xf32>
    %c1_91 = arith.constant 1 : index
    %c0_92 = arith.constant 0 : index
    %c0_93 = arith.constant 0 : index
    %75 = vector.load %arg8[%c1_91, %c0_92, %c0_93] : memref<3x128x128xf32, #tpu.memory_space<vmem>>, vector<1x128x128xf32>
    %76 = vector.shape_cast %75 : vector<1x128x128xf32> to vector<128x128xf32>
    %cst_94 = arith.constant dense<0.000000e+00> : vector<64x128xf32>
    %77 = tpu.matmul %74, %76, %cst_94 {dimension_numbers = #tpu.dot_dimension_numbers<[1], [0], [0], [1], [0, 0, 1, 1], [], []>} : vector<64x128xf32>, vector<128x128xf32>, vector<64x128xf32> -> vector<64x128xf32>
    %78 = arith.addf %72, %77 : vector<64x128xf32>
    %c0_95 = arith.constant 0 : index
    %c2_96 = arith.constant 2 : index
    %c0_97 = arith.constant 0 : index
    %79 = vector.load %arg17[%c0_95, %c2_96, %c0_97] : memref<4x18x128xf32, #tpu.memory_space<vmem>>, vector<4x16x128xf32>
    %80 = vector.shape_cast %79 : vector<4x16x128xf32> to vector<64x128xf32>
    %c2_98 = arith.constant 2 : index
    %c0_99 = arith.constant 0 : index
    %c0_100 = arith.constant 0 : index
    %81 = vector.load %arg8[%c2_98, %c0_99, %c0_100] : memref<3x128x128xf32, #tpu.memory_space<vmem>>, vector<1x128x128xf32>
    %82 = vector.shape_cast %81 : vector<1x128x128xf32> to vector<128x128xf32>
    %cst_101 = arith.constant dense<0.000000e+00> : vector<64x128xf32>
    %83 = tpu.matmul %80, %82, %cst_101 {dimension_numbers = #tpu.dot_dimension_numbers<[1], [0], [0], [1], [0, 0, 1, 1], [], []>} : vector<64x128xf32>, vector<128x128xf32>, vector<64x128xf32> -> vector<64x128xf32>
    %84 = arith.addf %78, %83 : vector<64x128xf32>
    %c0_102 = arith.constant 0 : index
    %c0_103 = arith.constant 0 : index
    %85 = vector.load %arg9[%c0_102, %c0_103] : memref<1x128xf32, #tpu.memory_space<vmem>>, vector<1x128xf32>
    %86 = vector.broadcast %85 : vector<1x128xf32> to vector<64x128xf32>
    %87 = arith.mulf %84, %86 : vector<64x128xf32>
    %c0_104 = arith.constant 0 : index
    %c0_105 = arith.constant 0 : index
    %88 = vector.load %arg10[%c0_104, %c0_105] : memref<1x128xf32, #tpu.memory_space<vmem>>, vector<1x128xf32>
    %89 = vector.broadcast %88 : vector<1x128xf32> to vector<64x128xf32>
    %90 = arith.addf %87, %89 : vector<64x128xf32>
    %c0_106 = arith.constant 0 : index
    %c0_107 = arith.constant 0 : index
    %91 = vector.load %arg11[%c0_106, %c0_107] : memref<128x128xf32, #tpu.memory_space<vmem>>, vector<128x128xf32>
    %cst_108 = arith.constant dense<0.000000e+00> : vector<64x128xf32>
    %92 = tpu.matmul %13, %91, %cst_108 {dimension_numbers = #tpu.dot_dimension_numbers<[1], [0], [0], [1], [0, 0, 1, 1], [], []>} : vector<64x128xf32>, vector<128x128xf32>, vector<64x128xf32> -> vector<64x128xf32>
    %c0_109 = arith.constant 0 : index
    %c0_110 = arith.constant 0 : index
    %93 = vector.load %arg12[%c0_109, %c0_110] : memref<1x128xf32, #tpu.memory_space<vmem>>, vector<1x128xf32>
    %94 = vector.broadcast %93 : vector<1x128xf32> to vector<64x128xf32>
    %95 = arith.mulf %92, %94 : vector<64x128xf32>
    %c0_111 = arith.constant 0 : index
    %c0_112 = arith.constant 0 : index
    %96 = vector.load %arg13[%c0_111, %c0_112] : memref<1x128xf32, #tpu.memory_space<vmem>>, vector<1x128xf32>
    %97 = vector.broadcast %96 : vector<1x128xf32> to vector<64x128xf32>
    %98 = arith.addf %95, %97 : vector<64x128xf32>
    %99 = arith.addf %90, %98 : vector<64x128xf32>
    %cst_113 = arith.constant 0.000000e+00 : f32
    %100 = vector.broadcast %cst_113 : f32 to vector<64x128xf32>
    %101 = arith.maximumf %99, %100 : vector<64x128xf32>
    %102 = vector.shape_cast %101 : vector<64x128xf32> to vector<4x16x128xf32>
    %c0_114 = arith.constant 0 : index
    %c0_115 = arith.constant 0 : index
    %c0_116 = arith.constant 0 : index
    %103 = vector.load %arg14[%c0_114, %c0_115, %c0_116] : memref<4x16x128xf32, #tpu.memory_space<vmem>>, vector<4x16x128xf32>
    tpu.vector_store %arg14[%c0_114, %c0_115, %c0_116], %102 {strides = array<i32>} : memref<4x16x128xf32, #tpu.memory_space<vmem>>, vector<4x16x128xf32>,
    return
  }
  func.func @transform_0(%arg0: i32) -> (i32, i32, i32) {
    %c0_i32 = arith.constant 0 : i32
    %c0_i32_0 = arith.constant 0 : i32
    %c0_i32_1 = arith.constant 0 : i32
    return %arg0, %c0_i32, %c0_i32_0 : i32, i32, i32
  }
  func.func @transform_1(%arg0: i32) -> (i32, i32, i32) {
    %c0_i32 = arith.constant 0 : i32
    %c0_i32_0 = arith.constant 0 : i32
    %c0_i32_1 = arith.constant 0 : i32
    %c0_i32_2 = arith.constant 0 : i32
    return %c0_i32, %c0_i32_0, %c0_i32_1 : i32, i32, i32
  }
  func.func @transform_2(%arg0: i32) -> (i32, i32) {
    %c0_i32 = arith.constant 0 : i32
    %c0_i32_0 = arith.constant 0 : i32
    %c0_i32_1 = arith.constant 0 : i32
    return %c0_i32, %c0_i32_0 : i32, i32
  }
  func.func @transform_3(%arg0: i32) -> (i32, i32) {
    %c0_i32 = arith.constant 0 : i32
    %c0_i32_0 = arith.constant 0 : i32
    %c0_i32_1 = arith.constant 0 : i32
    return %c0_i32, %c0_i32_0 : i32, i32
  }
  func.func @transform_4(%arg0: i32) -> (i32, i32, i32) {
    %c0_i32 = arith.constant 0 : i32
    %c0_i32_0 = arith.constant 0 : i32
    %c0_i32_1 = arith.constant 0 : i32
    %c0_i32_2 = arith.constant 0 : i32
    return %c0_i32, %c0_i32_0, %c0_i32_1 : i32, i32, i32
  }
  func.func @transform_5(%arg0: i32) -> (i32, i32) {
    %c0_i32 = arith.constant 0 : i32
    %c0_i32_0 = arith.constant 0 : i32
    %c0_i32_1 = arith.constant 0 : i32
    return %c0_i32, %c0_i32_0 : i32, i32
  }
  func.func @transform_6(%arg0: i32) -> (i32, i32) {
    %c0_i32 = arith.constant 0 : i32
    %c0_i32_0 = arith.constant 0 : i32
    %c0_i32_1 = arith.constant 0 : i32
    return %c0_i32, %c0_i32_0 : i32, i32
  }
  func.func @transform_7(%arg0: i32) -> (i32, i32, i32) {
    %c0_i32 = arith.constant 0 : i32
    %c0_i32_0 = arith.constant 0 : i32
    %c0_i32_1 = arith.constant 0 : i32
    %c0_i32_2 = arith.constant 0 : i32
    return %c0_i32, %c0_i32_0, %c0_i32_1 : i32, i32, i32
  }
  func.func @transform_8(%arg0: i32) -> (i32, i32) {
    %c0_i32 = arith.constant 0 : i32
    %c0_i32_0 = arith.constant 0 : i32
    %c0_i32_1 = arith.constant 0 : i32
    return %c0_i32, %c0_i32_0 : i32, i32
  }
  func.func @transform_9(%arg0: i32) -> (i32, i32) {
    %c0_i32 = arith.constant 0 : i32
    %c0_i32_0 = arith.constant 0 : i32
    %c0_i32_1 = arith.constant 0 : i32
    return %c0_i32, %c0_i32_0 : i32, i32
  }
  func.func @transform_10(%arg0: i32) -> (i32, i32) {
    %c0_i32 = arith.constant 0 : i32
    %c0_i32_0 = arith.constant 0 : i32
    %c0_i32_1 = arith.constant 0 : i32
    return %c0_i32, %c0_i32_0 : i32, i32
  }
  func.func @transform_11(%arg0: i32) -> (i32, i32) {
    %c0_i32 = arith.constant 0 : i32
    %c0_i32_0 = arith.constant 0 : i32
    %c0_i32_1 = arith.constant 0 : i32
    return %c0_i32, %c0_i32_0 : i32, i32
  }
  func.func @transform_12(%arg0: i32) -> (i32, i32) {
    %c0_i32 = arith.constant 0 : i32
    %c0_i32_0 = arith.constant 0 : i32
    %c0_i32_1 = arith.constant 0 : i32
    return %c0_i32, %c0_i32_0 : i32, i32
  }
  func.func @transform_13(%arg0: i32) -> (i32, i32, i32) {
    %c0_i32 = arith.constant 0 : i32
    %c0_i32_0 = arith.constant 0 : i32
    %c0_i32_1 = arith.constant 0 : i32
    return %arg0, %c0_i32, %c0_i32_0 : i32, i32, i32
  }
}

</mosaic_0001>

<bundles_post_ra>
// kernel: tpu_custom_call.1
= control target key start
LH: loop header
LB: loop body
LE: loop exit
PB: predicated region body
PF: predicated region fallthrough
CT: control target
= control target key end

     0   :  { %s4030_s0 = inlined_call_operand.hbm [shape: f32[8,16,128], index: 0, kind: input, shape index: {}]   ;;  %s4031_s1 = inlined_call_operand.hbm [shape: f32[3,128,128], index: 1, kind: input, shape index: {}]   ;;  %s4032_s2 = inlined_call_operand.vmem [shape: f32[1,128], index: 2, kind: input, shape index: {}]   ;;  %s4033_s3 = inlined_call_operand.vmem [shape: f32[1,128], index: 3, kind: input, shape index: {}]   ;;  %s4034_s4 = inlined_call_operand.hbm [shape: f32[3,128,128], index: 4, kind: input, shape index: {}]   ;;  %s4035_s5 = inlined_call_operand.vmem [shape: f32[1,128], index: 5, kind: input, shape index: {}]   ;;  %s4036_s6 = inlined_call_operand.vmem [shape: f32[1,128], index: 6, kind: input, shape index: {}]   ;;  %s4037_s7 = inlined_call_operand.hbm [shape: f32[3,128,128], index: 7, kind: input, shape index: {}]   ;;  %s4038_s8 = inlined_call_operand.vmem [shape: f32[1,128], index: 8, kind: input, shape index: {}]   ;;  %s4039_s9 = inlined_call_operand.vmem [shape: f32[1,128], index: 9, kind: input, shape index: {}]   ;;  %s4040_s10 = inlined_call_operand.hbm [shape: f32[128,128], index: 10, kind: input, shape index: {}]   ;;  %s4041_s11 = inlined_call_operand.vmem [shape: f32[1,128], index: 11, kind: input, shape index: {}]   ;;  %s4042_s12 = inlined_call_operand.vmem [shape: f32[1,128], index: 12, kind: input, shape index: {}]   ;;  %s4043_s13 = inlined_call_operand.hbm [shape: f32[8,16,128], index: 13, kind: output, shape index: {}]  }
   0x1   :  { %4050 = sst [smem:[#allocation21_spill]] %s4038_s8 }
   0x2   :  { %4051 = sst [smem:[#allocation22_spill]] %s4039_s9 }
   0x3   :  { %4052 = sst [smem:[#allocation23_spill]] %s4041_s11 }
   0x4   :  { %4053 = sst [smem:[#allocation24_spill]] %s4042_s12 }
   0x5   :  { %4054 = sst [smem:[#allocation25_spill]] %s4043_s13 }
   0x6   :  { %18 = vsyncpa [#allocation6], 0 }
   0x7   :  { %20 = vsyncpa [#allocation6 + $0x1], 0 }
   0x8   :  { %21 = vsyncpa [#allocation9], 0 }
   0x9   :  { %22 = vsyncpa [#allocation12], 0 }
   0xa   :  { %23 = vsyncpa [#allocation7], 0 }
   0xb   :  { %25 = vsyncpa [#allocation7 + $0x1], 0  ;;  %s3641_s25 = smov 0   ;;  %s3643_s26 = smov 0  }
   0xc   :  { %s3645_s27 = smov 0   ;;  %s3647_s28 = smov 0  }
   0xd LB: > { %4055 = sst [smem:[#allocation19_spill]] %s3546_s25  ;;  %s3662_s29 = sadd.s32 4294967295, %s3558_s28   ;;  %s3558_s28 = sphi %s3647_s28, %s4083_s28   ;;  %s3554_s27 = sphi %s3645_s27, %s4082_s27   ;;  %s3550_s26 = sphi %s3643_s26, %s4081_s26   ;;  %s3546_s25 = sphi %s3641_s25, %s4080_s25  }
   0xe   : > { %s2166_s30 = sadd.s32 4294967294, %s3558_s28   ;;  %p51_p0 = scmp.ne.s32.totalorder %s3550_s26, %s3546_s25 }
   0xf   : > { %p4047_p1 = scmp.eq.s32.totalorder %s3662_s29, 0  ;;  %p333_p3 = scmp.eq.s32.totalorder %s2166_s30, 1 }
  0x10   : > { %p2167_p5 = scmp.ge.s32.totalorder %s3558_s28, 1  ;;  %p340_p7 = scmp.lt.s32.totalorder %s3558_s28, 3 }
  0x11   : > { %p3671_p4 = por %p4047_p1, %p51_p0  ;;  %p3676_p6 = por %p333_p3, %p51_p0 }
  0x12   : > { %p3681_p8 = pnand %p2167_p5, %p340_p7  ;;  %s3560_s17 = smov [#allocation8]  }
  0x13   : > { %s4056_s14 = scalar_select %p3671_p4, 1, 0 }
  0x14   : > { %s4057_s15 = scalar_select %p3676_p6, 1, 0 }
  0x15   : > { %s4059_s16 = scalar_select %p3681_p8, 1, 0 }
  0x16   : > { %4058 = sst [smem:[#allocation20_spill]] %s4057_s15  ;;  %s352_s18 = sshll.u32 %s3560_s17, 4  ;;  %s3685_s18 = int_to_ptr.vmem [resolvable:$true] %s352_s18 }
  0x17   : > { %p3270_p9 = pneg %p3681_p8  ;;  %s3561_s20 = smov [#allocation11]  }
  0x18   : > { %s390_s21 = sshll.u32 %s3561_s20, 4  ;;  %s3562_s22 = smov [#allocation10]   ;;  %s3696_s21 = int_to_ptr.vmem [resolvable:$true] %s390_s21 }
  0x19   : > { %p3692_p11 = pnand %p3270_p9, %p4047_p1  ;;  %s3698_s23 = sshll.u32 %s3562_s22, 4  ;;  %s372_s23 = int_to_ptr.vmem [resolvable:$true] %s3698_s23 }
  0x1a   : > { %s3342_s17 = scalar_lea.hbm %s4031_s1, 6144 }
  0x1b   : > { %p3343_p12 = scmp.ne.s32.totalorder %s4031_s1, %s3342_s17  ;;  %p3708_p13 = pneg %p3692_p11 }
  0x1c   : > { %p3349_p5 = scmp.lt.u32.totalorder %s3342_s17, %s4031_s1 }
  0x1d   : > { %p3345_p0 = pnand %p3708_p13, %p3343_p12 }
  0x1f   : > { %p3346_p3 = pneg %p3345_p0 }
  0x21   : > { %p3351_p7 = pnand %p3349_p5, %p3346_p3 }
  0x23   : > { %3354 = shalt.err (!%p3351_p7)
}
  0x24   : > { %s3355_s25 = scalar_lea.vmem %s3685_s18, 6144  ;;  %p3363_p2 = scmp.lt.s32.totalorder %s3685_s18, %s3685_s18 }
  0x25   : > { %p3356_p9 = scmp.ne.s32.totalorder %s3685_s18, %s3355_s25  ;;  %p3364_p6 = scmp.lt.s32.totalorder %s3355_s25, %s3355_s25 }
  0x27   : > { %p3358_p10 = pnand %p3356_p9, %p3708_p13  ;;  %p3365_p12 = por %p3364_p6, %p3363_p2 }
  0x29   : > { %p3359_p1 = pneg %p3358_p10 }
  0x2b   : > { %p3366_p0 = pnand %p3365_p12, %p3359_p1 }
  0x2d   : > { %3369 = shalt.err (!%p3366_p0)
}
  0x2e   : > { %s3563_s15 = smov 128   ;;  %s3564_s24 = smov 8  }
  0x2f   : > { %3273 = dma.hbm_to_vmem [thread:$0]  (!%p3692_p11), %s4031_s1, 6144, %s3685_s18, [#allocation9], %s3563_s15, %s3563_s15, %s3564_s24  }
  0x30   : > { %s3370_s25 = scalar_lea.hbm %s4037_s7, 6144 }
  0x31   : > { %p3371_p1 = scmp.ne.s32.totalorder %s4037_s7, %s3370_s25  ;;  %p3377_p10 = scmp.lt.u32.totalorder %s3370_s25, %s4037_s7 }
  0x33   : > { %p3373_p2 = pnand %p3371_p1, %p3708_p13 }
  0x35   : > { %p3374_p6 = pneg %p3373_p2 }
  0x37   : > { %p3379_p3 = pnand %p3377_p10, %p3374_p6 }
  0x39   : > { %3382 = shalt.err (!%p3379_p3)
}
  0x3a   : > { %s3383_s18 = scalar_lea.vmem %s3696_s21, 6144  ;;  %p3391_p12 = scmp.lt.s32.totalorder %s3696_s21, %s3696_s21 }
  0x3b   : > { %p3384_p5 = scmp.ne.s32.totalorder %s3696_s21, %s3383_s18  ;;  %p3392_p0 = scmp.lt.s32.totalorder %s3383_s18, %s3383_s18 }
  0x3d   : > { %p3386_p7 = pnand %p3384_p5, %p3708_p13  ;;  %p3393_p1 = por %p3392_p0, %p3391_p12 }
  0x3f   : > { %p3387_p9 = pneg %p3386_p7 }
  0x41   : > { %p3394_p2 = pnand %p3393_p1, %p3387_p9 }
  0x43   : > { %3397 = shalt.err (!%p3394_p2)
}
  0x44   : > { %3279 = dma.hbm_to_vmem [thread:$0]  (!%p3692_p11), %s4037_s7, 6144, %s3696_s21, [#allocation12], %s3563_s15, %s3563_s15, %s3564_s24  }
  0x45   : > { %s3398_s30 = scalar_lea.hbm %s4034_s4, 6144 }
  0x46   : > { %p3399_p6 = scmp.ne.s32.totalorder %s4034_s4, %s3398_s30  ;;  %p3405_p5 = scmp.lt.u32.totalorder %s3398_s30, %s4034_s4 }
  0x48   : > { %p3401_p10 = pnand %p3399_p6, %p3708_p13 }
  0x4a   : > { %p3402_p3 = pneg %p3401_p10 }
  0x4c   : > { %p3407_p7 = pnand %p3405_p5, %p3402_p3 }
  0x4e   : > { %3410 = shalt.err (!%p3407_p7)
}
  0x4f   : > { %s3411_s18 = scalar_lea.vmem %s372_s23, 6144  ;;  %p3419_p1 = scmp.lt.s32.totalorder %s372_s23, %s372_s23 }
  0x50   : > { %p3412_p9 = scmp.ne.s32.totalorder %s372_s23, %s3411_s18  ;;  %p3420_p2 = scmp.lt.s32.totalorder %s3411_s18, %s3411_s18 }
  0x52   : > { %p3414_p12 = pnand %p3412_p9, %p3708_p13  ;;  %p3421_p4 = por %p3420_p2, %p3419_p1 }
  0x54   : > { %p3415_p0 = pneg %p3414_p12 }
  0x56   : > { %p3422_p8 = pnand %p3421_p4, %p3415_p0 }
  0x58   : > { %3425 = shalt.err (!%p3422_p8)
}
  0x59   : > { %3276 = dma.hbm_to_vmem [thread:$0]  (!%p3692_p11), %s4034_s4, 6144, %s372_s23, [#allocation9], %s3563_s15, %s3563_s15, %s3564_s24  }
  0x5a   : > { %s3565_s9 = smov [#allocation13]   ;;  %s3426_s17 = scalar_lea.hbm %s4040_s10, 2048 }
  0x5b   : > { %s409_s11 = sshll.u32 %s3565_s9, 4  ;;  %p3427_p4 = scmp.ne.s32.totalorder %s4040_s10, %s3426_s17  ;;  %s410_s11 = int_to_ptr.vmem [resolvable:$true] %s409_s11 }
  0x5c   : > { %p3433_p10 = scmp.lt.u32.totalorder %s3426_s17, %s4040_s10 }
  0x5d   : > { %p3429_p8 = pnand %p3427_p4, %p3708_p13 }
  0x5f   : > { %p3430_p6 = pneg %p3429_p8 }
  0x61   : > { %p3435_p3 = pnand %p3433_p10, %p3430_p6 }
  0x63   : > { %3438 = shalt.err (!%p3435_p3)
}
  0x64   : > { %s3439_s23 = scalar_lea.vmem %s410_s11, 2048  ;;  %p3447_p12 = scmp.lt.s32.totalorder %s410_s11, %s410_s11 }
  0x65   : > { %p3440_p5 = scmp.ne.s32.totalorder %s410_s11, %s3439_s23  ;;  %p3448_p0 = scmp.lt.s32.totalorder %s3439_s23, %s3439_s23 }
  0x67   : > { %p3442_p7 = pnand %p3440_p5, %p3708_p13  ;;  %p3449_p1 = por %p3448_p0, %p3447_p12 }
  0x69   : > { %p3443_p9 = pneg %p3442_p7 }
  0x6b   : > { %p3450_p2 = pnand %p3449_p1, %p3443_p9 }
  0x6d   : > { %3453 = shalt.err (!%p3450_p2)
}
  0x6e   : > { %3282 = dma.hbm_to_vmem [thread:$0]  (!%p3692_p11), %s4040_s10, 2048, %s410_s11, [#allocation12], %s3563_s15, %s3563_s15, %s3564_s24  }
  0x6f   : > { %s3802_s13 = sadd.s32 1, %s3558_s28   ;;  %s38_s19 = sadd.s32 1, %s3554_s27 }
  0x70   : > { %s35_s9 = ssub.s32 %s3558_s28, %s3802_s13  ;;  %p45_p13 = scmp.ne.s32.totalorder %s3554_s27, %s3550_s26 }
  0x71   : > { %p36_p4 = scmp.eq.s32.totalorder %s35_s9, 0  ;;  %p46_p8 = scmp.eq.s32.totalorder %s3558_s28, 0 }
  0x72   : > { %p4062_p6 = scmp.eq.s32.totalorder %s3662_s29, 1  ;;  %p3295_p3 = scmp.lt.s32.totalorder %s3558_s28, 2 }
  0x73   : > { %s3818_s30 = scalar_select %p36_p4, %s3554_s27, %s38_s19  }
  0x74   : > { %p3812_p10 = por %p4062_p6, %p45_p13  ;;  %p47_p5 = por %p46_p8, %p45_p13 }
  0x75   : > { %s429_s17 = sand.u32 1, %s3554_s27   ;;  %s2199_s11 = sshll.u32 %s3558_s28, 10 }
  0x76   : > { %s2173_s20 = sshll.u32 %s429_s17, 6  ;;  %s3825_s18 = scalar_lea.hbm %s4030_s0, %s2199_s11 }
  0x77   : > { %s433_s23 = scalar_lea.vmem [#allocation5], %s2173_s20  ;;  %p3829_p11 = pnand %p3295_p3, %p47_p5 }
  0x78   : > { %s441_s21 = sshll.u32 %s433_s23, 4  ;;  %s3833_s19 = scalar_lea.sflag [#allocation6], %s429_s17  ;;  %s3827_s21 = int_to_ptr.vmem [resolvable:$true] %s441_s21 }
  0x79   : > { %s3454_s9 = scalar_lea.hbm %s3825_s18, 1024  ;;  %p3456_p9 = pneg %p3829_p11 }
  0x7a   : > { %p3455_p7 = scmp.ne.s32.totalorder %s3825_s18, %s3454_s9  ;;  %s3459_s22 = scalar_lea.hbm %s4030_s0, 2048 }
  0x7b   : > { %p3460_p1 = scmp.lt.u32.totalorder %s3825_s18, %s4030_s0  ;;  %p3461_p2 = scmp.lt.u32.totalorder %s3459_s22, %s3454_s9 }
  0x7c   : > { %p3457_p12 = pnand %p3456_p9, %p3455_p7  ;;  %p3463_p4 = scmp.lt.u32.totalorder %s3454_s9, %s3825_s18 }
  0x7d   : > { %p3462_p13 = por %p3461_p2, %p3460_p1 }
  0x7e   : > { %p3458_p0 = pneg %p3457_p12 }
  0x7f   : > { %p3464_p8 = por %p3463_p4, %p3462_p13 }
  0x81   : > { %p3465_p6 = pnand %p3464_p8, %p3458_p0 }
  0x83   : > { %3468 = shalt.err (!%p3465_p6)
}
  0x84   : > { %s3469_s17 = scalar_lea.vmem %s3827_s21, 1024  ;;  %s3566_s20 = smov [#allocation5]  }
  0x85   : > { %p3470_p3 = scmp.ne.s32.totalorder %s3827_s21, %s3469_s17  ;;  %s3474_s11 = sshll.u32 %s3566_s20, 4  ;;  %s3475_s11 = int_to_ptr.vmem [resolvable:$false] %s3474_s11 }
  0x86   : > { %s3476_s25 = scalar_lea.vmem %s3475_s11, 2048  ;;  %p3477_p12 = scmp.lt.s32.totalorder %s3827_s21, %s3475_s11 }
  0x87   : > { %p3472_p5 = pnand %p3470_p3, %p3456_p9  ;;  %p3478_p1 = scmp.lt.s32.totalorder %s3476_s25, %s3469_s17 }
  0x89   : > { %p3473_p7 = pneg %p3472_p5  ;;  %p3479_p2 = por %p3478_p1, %p3477_p12 }
  0x8b   : > { %p3480_p13 = pnand %p3479_p2, %p3473_p7 }
  0x8d   : > { %3483 = shalt.err (!%p3480_p13)
}
  0x8e   : > { %3286 = dma.hbm_to_vmem [thread:$0]  (!%p3829_p11), %s3825_s18, 1024, %s3827_s21, %s3833_s19, %s3563_s15, %s3563_s15, %s3564_s24  }
  0x8f   : > { %p4065_p9 = scmp.ne.s32.totalorder %s4059_s16, 0 }
  0x90   : > { %s3867_s9 = sand.u32 (!%p4065_p9), 1, %s3550_s26   ;;  %p4066_p0 = scmp.ne.s32.totalorder (!%p4065_p9), %s4056_s14, 0 }
  0x91   : > { %453 = sbr.rel (%p4065_p9) target bundleno = 1043 (0x413), region = 72  ;;  %s2178_s22 = sshll.u32 (!%p4065_p9), %s3867_s9, 6 }
  0x92   : > { %s456_s23 = scalar_lea.sflag (!%p4065_p9), [#allocation6], %s3867_s9  ;;  %s3873_s8 = scalar_lea.vmem (!%p4065_p9), [#allocation5], %s2178_s22 }
  0x98   : > { %3529 = dma.done.wait (%p4066_p0), %s456_s23, 1024  }
  0x99   : > { %3531 = vsyncadd (%p4066_p0), %s456_s23, 4294966272  ;;  %p4067_p11 = scmp.eq.s32.totalorder %s3662_s29, 0 }
  0x9b   : > { %3533 = dma.done.wait (%p4067_p11), [#allocation9], 12288   ;;  %p4068_p4 = pmov %p4067_p11 }
  0x9d   : > { %3535 = vsyncadd (%p4068_p4), [#allocation9], 4294955008  ;;  %p4069_p8 = pmov %p4068_p4 }
  0x9e   : > { %p4070_p6 = pmov %p4068_p4 }
  0x9f   : > { %3537 = dma.done.wait (%p4069_p8), [#allocation12], 8192  }
  0xa0   : > { %3539 = vsyncadd (%p4070_p6), [#allocation12], 4294959104  ;;  %v3567_v0 = vmov 0.0   ;;  %v552_v1 = vld [vmem:[#allocation8] sm:$0xff]  ;;  %v553_v2 = vld [vmem:[#allocation8 + $0x8] sm:$0xff]  ;;  %s4071_s25 = sld [smem:[#allocation23_spill]] }
  0xa1   : > { %520 = vst [vmem:[#allocation2] sm:$0x1] %v3567_v0  ;;  %521 = vst [vmem:[#allocation2 + $0x18] sm:$0x1] %v3567_v0  ;;  %v554_v3 = vld [vmem:[#allocation8 + $0x10] sm:$0xff]  ;;  %v2914_v4 = vpack.c.bf16 %v553_v2, %v552_v1  ;;  %v555_v5 = vld [vmem:[#allocation8 + $0x18] sm:$0xff] }
  0xa2   : > { %522 = vst [vmem:[#allocation2 + $0x30] sm:$0x1] %v3567_v0  ;;  %523 = vst [vmem:[#allocation2 + $0x48] sm:$0x1] %v3567_v0  ;;  %v2918_v6 = vpack.c.bf16 %v555_v5, %v554_v3  ;;  %v556_v7 = vld [vmem:[#allocation8 + $0x20] sm:$0xff]  ;;  %v557_v8 = vld [vmem:[#allocation8 + $0x28] sm:$0xff] }
  0xa3   : > { %524 = vst [vmem:[#allocation2 + $0x11] sm:$0x1] %v3567_v0  ;;  %525 = vst [vmem:[#allocation2 + $0x29] sm:$0x1] %v3567_v0  ;;  %2915 = vmatprep.subr.bf16.mxu0 %v2914_v4  ;;  %v2922_v9 = vpack.c.bf16 %v557_v8, %v556_v7  ;;  %v577_v10 = vld [vmem:[#allocation8 + $0x80] sm:$0xff]  ;;  %v578_v11 = vld [vmem:[#allocation8 + $0x88] sm:$0xff] }
  0xa4   : > { %526 = vst [vmem:[#allocation2 + $0x41] sm:$0x1] %v3567_v0  ;;  %527 = vst [vmem:[#allocation2 + $0x59] sm:$0x1] %v3567_v0  ;;  %2917 = vmatpush3.bf16.msra.mxu0 %v2914_v4  ;;  %v558_v12 = vld [vmem:[#allocation8 + $0x30] sm:$0xff]  ;;  %v559_v13 = vld [vmem:[#allocation8 + $0x38] sm:$0xff]  ;;  %v2882_v14 = vpack.c.bf16 %v578_v11, %v577_v10 }
  0xa5   : > { %979 = vst [vmem:[#allocation3] sm:$0x1] %v3567_v0  ;;  %980 = vst [vmem:[#allocation3 + $0x18] sm:$0x1] %v3567_v0  ;;  %2919 = vmatprep.subr.bf16.mxu0 %v2918_v6  ;;  %v3888_v15 = vld [vmem:[%s3873_s8] sm:$0xff]  ;;  %v3892_v16 = vld [vmem:[%s3873_s8 + $0x8] sm:$0xff]  ;;  %v2926_v21 = vpack.c.bf16 %v559_v13, %v558_v12 }
  0xa6   : > { %981 = vst [vmem:[#allocation3 + $0x30] sm:$0x1] %v3567_v0  ;;  %982 = vst [vmem:[#allocation3 + $0x48] sm:$0x1] %v3567_v0  ;;  %v579_v17 = vld [vmem:[#allocation8 + $0x90] sm:$0xff]  ;;  %v580_v18 = vld [vmem:[#allocation8 + $0x98] sm:$0xff]  ;;  %2474 = vmatprep.mubr.f32.mxu1 %v3888_v15  ;;  %2883 = vmatprep.subr.bf16.mxu1 %v2882_v14 }
  0xa7   : > { %983 = vst [vmem:[#allocation3 + $0x11] sm:$0x1] %v3567_v0  ;;  %984 = vst [vmem:[#allocation3 + $0x29] sm:$0x1] %v3567_v0  ;;  %v2886_v19 = vpack.c.bf16 %v580_v18, %v579_v17  ;;  %v581_v20 = vld [vmem:[#allocation8 + $0xa0] sm:$0xff]  ;;  %2885 = vmatpush3.bf16.msra.mxu1 %v2882_v14  ;;  %v582_v22 = vld [vmem:[#allocation8 + $0xa8] sm:$0xff] }
  0xa8   : > { %985 = vst [vmem:[#allocation3 + $0x41] sm:$0x1] %v3567_v0  ;;  %986 = vst [vmem:[#allocation3 + $0x59] sm:$0x1] %v3567_v0  ;;  %2921 = vmatpush3.bf16.msra.mxu0 %v2918_v6  ;;  %v560_v23 = vld [vmem:[#allocation8 + $0x40] sm:$0xff]  ;;  %v561_v24 = vld [vmem:[#allocation8 + $0x48] sm:$0xff]  ;;  %v2890_v25 = vpack.c.bf16 %v582_v22, %v581_v20 }
  0xa9   : > { %1422 = vst [vmem:[#allocation4] sm:$0x1] %v3567_v0  ;;  %1423 = vst [vmem:[#allocation4 + $0x18] sm:$0x1] %v3567_v0  ;;  %2923 = vmatprep.subr.bf16.mxu0 %v2922_v9  ;;  %2887 = vmatprep.subr.bf16.mxu1 %v2886_v19  ;;  %v583_v26 = vld [vmem:[#allocation8 + $0xb0] sm:$0xff]  ;;  %v584_v27 = vld [vmem:[#allocation8 + $0xb8] sm:$0xff]  ;;  %v2930_v28 = vpack.c.bf16 %v561_v24, %v560_v23 }
  0xaa   : > { %1424 = vst [vmem:[#allocation4 + $0x30] sm:$0x1] %v3567_v0  ;;  %1425 = vst [vmem:[#allocation4 + $0x48] sm:$0x1] %v3567_v0  ;;  %v3897_v29 = vld [vmem:[%s3873_s8 + $0x10] sm:$0xff]  ;;  %v3900_v30 = vld [vmem:[%s3873_s8 + $0x18] sm:$0xff]  ;;  %v2894_v34 = vpack.c.bf16 %v584_v27, %v583_v26 }
  0xab   : > { %1426 = vst [vmem:[#allocation4 + $0x11] sm:$0x1] %v3567_v0  ;;  %1427 = vst [vmem:[#allocation4 + $0x29] sm:$0x1] %v3567_v0  ;;  %2889 = vmatpush3.bf16.msra.mxu1 %v2886_v19  ;;  %v562_v31 = vld [vmem:[#allocation8 + $0x50] sm:$0xff]  ;;  %v563_v32 = vld [vmem:[#allocation8 + $0x58] sm:$0xff] }
  0xac   : > { %1428 = vst [vmem:[#allocation4 + $0x41] sm:$0x1] %v3567_v0  ;;  %1429 = vst [vmem:[#allocation4 + $0x59] sm:$0x1] %v3567_v0  ;;  %2925 = vmatpush3.bf16.msra.mxu0 %v2922_v9  ;;  %2891 = vmatprep.subr.bf16.mxu1 %v2890_v25  ;;  %v585_v35 = vld [vmem:[#allocation8 + $0xc0] sm:$0xff]  ;;  %v586_v36 = vld [vmem:[#allocation8 + $0xc8] sm:$0xff]  ;;  %v2934_v39 = vpack.c.bf16 %v563_v32, %v562_v31 }
  0xad   : > { %536 = vst [vmem:[#allocation2 + $0x1] sm:$0xff] %v3888_v15  ;;  %537 = vst [vmem:[#allocation2 + $0x9] sm:$0xff] %v3892_v16  ;;  %2927 = vmatprep.subr.bf16.mxu0 %v2926_v21  ;;  %v3905_v37 = vld [vmem:[%s3873_s8 + $0x20] sm:$0xff]  ;;  %v3908_v38 = vld [vmem:[%s3873_s8 + $0x28] sm:$0xff]  ;;  %v2898_v42 = vpack.c.bf16 %v586_v36, %v585_v35  ;;  %s4072_s14 = sld [smem:[#allocation24_spill]]  ;;  %s4073_s24 = sld [smem:[#allocation21_spill]] }
  0xae   : > { %538 = vst [vmem:[#allocation2 + $0x19] sm:$0xff] %v3897_v29  ;;  %539 = vst [vmem:[#allocation2 + $0x21] sm:$0xff] %v3900_v30  ;;  %v564_v40 = vld [vmem:[#allocation8 + $0x60] sm:$0xff]  ;;  %v565_v41 = vld [vmem:[#allocation8 + $0x68] sm:$0xff]  ;;  %s4074_s19 = sld [smem:[#allocation22_spill]]  ;;  %s3969_s17 = scalar_lea.vmem [#allocation14], %s2178_s22 }
  0xaf   : > { %2893 = vmatpush3.bf16.msra.mxu1 %v2890_v25  ;;  %540 = vst [vmem:[#allocation2 + $0x31] sm:$0xff] %v3905_v37  ;;  %541 = vst [vmem:[#allocation2 + $0x39] sm:$0xff] %v3908_v38  ;;  %v3913_v43 = vld [vmem:[%s3873_s8 + $0x30] sm:$0xff]  ;;  %v3916_v44 = vld [vmem:[%s3873_s8 + $0x38] sm:$0xff]  ;;  %v2938_v47 = vpack.c.bf16 %v565_v41, %v564_v40  ;;  %s2201_s22 = sshll.u32 %s3662_s29, 10  ;;  %s2055_s20 = sshll.u32 %s3969_s17, 4  ;;  %s3984_s20 = int_to_ptr.vmem [resolvable:$true] %s2055_s20 }
  0xb0   : > { %2929 = vmatpush3.bf16.msra.mxu0 %v2926_v21  ;;  %2895 = vmatprep.subr.bf16.mxu1 %v2894_v34  ;;  %v587_v45 = vld [vmem:[#allocation8 + $0xd0] sm:$0xff]  ;;  %v588_v46 = vld [vmem:[#allocation8 + $0xd8] sm:$0xff]  ;;  %542 = vst [vmem:[#allocation2 + $0x49] sm:$0xff] %v3913_v43  ;;  %543 = vst [vmem:[#allocation2 + $0x51] sm:$0xff] %v3916_v44  ;;  %s4075_s23 = sld [smem:[#allocation25_spill]]  ;;  %s2041_s29 = scalar_lea.sflag [#allocation7], %s3867_s9 }
  0xb1   : > { %2931 = vmatprep.subr.bf16.mxu0 %v2930_v28  ;;  %v566_v48 = vld [vmem:[#allocation8 + $0x70] sm:$0xff]  ;;  %v567_v49 = vld [vmem:[#allocation8 + $0x78] sm:$0xff]  ;;  %v2902_v50 = vpack.c.bf16 %v588_v46, %v587_v45  ;;  %v589_v51 = vld [vmem:[#allocation8 + $0xe0] sm:$0xff]  ;;  %s3568_s16 = smov [#allocation14]  }
  0xb2   : > { %v590_v52 = vld [vmem:[#allocation8 + $0xe8] sm:$0xff]  ;;  %v2942_v53 = vpack.c.bf16 %v567_v49, %v566_v48  ;;  %v812_v54 = vld [vmem:[#allocation8 + $0x100] sm:$0xff]  ;;  %v591_v57 = vld [vmem:[#allocation8 + $0xf0] sm:$0xff]  ;;  %s3488_s15 = sshll.u32 %s3568_s16, 4  ;;  %s3489_s15 = int_to_ptr.vmem [resolvable:$false] %s3488_s15 }
  0xb3   : > { %2897 = vmatpush3.bf16.msra.mxu1 %v2894_v34  ;;  %v813_v55 = vld [vmem:[#allocation8 + $0x108] sm:$0xff]  ;;  %v2906_v56 = vpack.c.bf16 %v590_v52, %v589_v51  ;;  %v592_v58 = vld [vmem:[#allocation8 + $0xf8] sm:$0xff]  ;;  %v814_v60 = vld [vmem:[#allocation8 + $0x110] sm:$0xff]  ;;  %p3491_p12 = scmp.lt.s32.totalorder %s3984_s20, %s3489_s15 }
  0xb4   : > { %v544_v33 = vld [vmem:[#allocation2] sm:$0xff]  ;;  %2933 = vmatpush3.bf16.msra.mxu0 %v2930_v28  ;;  %2899 = vmatprep.subr.bf16.mxu1 %v2898_v42  ;;  %v2946_v59 = vpack.c.bf16 %v813_v55, %v812_v54  ;;  %v815_v61 = vld [vmem:[#allocation8 + $0x118] sm:$0xff]  ;;  %v2910_v62 = vpack.c.bf16 %v592_v58, %v591_v57  ;;  %v1029_v0 = vld [vmem:[#allocation10 + $0x88] sm:$0xff] }
  0xb5   : > { %2518 = vmatprep.mubr.f32.mxu0 %v544_v33  ;;  %2935 = vmatprep.subr.bf16.mxu0 %v2934_v39  ;;  %v1028_v63 = vld [vmem:[#allocation10 + $0x80] sm:$0xff]  ;;  %v545_v1 = vld [vmem:[#allocation2 + $0x8] sm:$0xff]  ;;  %v2950_v2 = vpack.c.bf16 %v815_v61, %v814_v60  ;;  %v546_v3 = vld [vmem:[#allocation2 + $0x18] sm:$0xff] }
  0xb6   : > { %v816_v4 = vld [vmem:[#allocation8 + $0x120] sm:$0xff]  ;;  %v817_v5 = vld [vmem:[#allocation8 + $0x128] sm:$0xff]  ;;  %v2978_v6 = vpack.c.bf16 %v1029_v0, %v1028_v63  ;;  %v1030_v8 = vld [vmem:[#allocation10 + $0x90] sm:$0xff]  ;;  %s3982_s8 = scalar_lea.hbm %s4075_s23, %s2201_s22 }
  0xb7   : > { %2901 = vmatpush3.bf16.msra.mxu1 %v2898_v42  ;;  %v547_v7 = vld [vmem:[#allocation2 + $0x20] sm:$0xff]  ;;  %v1031_v9 = vld [vmem:[#allocation10 + $0x98] sm:$0xff]  ;;  %v2954_v10 = vpack.c.bf16 %v817_v5, %v816_v4  ;;  %v548_v11 = vld [vmem:[#allocation2 + $0x30] sm:$0xff] }
  0xb8   : > { %2937 = vmatpush3.bf16.msra.mxu0 %v2934_v39  ;;  %2903 = vmatprep.subr.bf16.mxu1 %v2902_v50  ;;  %v818_v12 = vld [vmem:[#allocation8 + $0x130] sm:$0xff]  ;;  %v819_v13 = vld [vmem:[#allocation8 + $0x138] sm:$0xff]  ;;  %v2982_v14 = vpack.c.bf16 %v1031_v9, %v1030_v8  ;;  %v1032_v18 = vld [vmem:[#allocation10 + $0xa0] sm:$0xff] }
  0xb9   : > { %2939 = vmatprep.subr.bf16.mxu0 %v2938_v47  ;;  %v549_v17 = vld [vmem:[#allocation2 + $0x38] sm:$0xff]  ;;  %v1033_v19 = vld [vmem:[#allocation10 + $0xa8] sm:$0xff]  ;;  %v2958_v20 = vpack.c.bf16 %v819_v13, %v818_v12  ;;  %v820_v22 = vld [vmem:[#allocation8 + $0x140] sm:$0xff] }
  0xba   : > { %v550_v21 = vld [vmem:[#allocation2 + $0x48] sm:$0xff]  ;;  %v2986_v24 = vpack.c.bf16 %v1033_v19, %v1032_v18  ;;  %v551_v25 = vld [vmem:[#allocation2 + $0x50] sm:$0xff]  ;;  %v1035_v27 = vld [vmem:[#allocation10 + $0xb8] sm:$0xff] }
  0xbb   : > { %2905 = vmatpush3.bf16.msra.mxu1 %v2902_v50  ;;  %v821_v23 = vld [vmem:[#allocation8 + $0x148] sm:$0xff]  ;;  %v1034_v26 = vld [vmem:[#allocation10 + $0xb0] sm:$0xff]  ;;  %v823_v33 = vld [vmem:[#allocation8 + $0x158] sm:$0xff] }
  0xbc   : > { %2941 = vmatpush3.bf16.msra.mxu0 %v2938_v47  ;;  %2907 = vmatprep.subr.bf16.mxu1 %v2906_v56  ;;  %v2962_v28 = vpack.c.bf16 %v821_v23, %v820_v22  ;;  %v803_v31 = vld [vmem:[#allocation2 + $0x2] sm:$0xff]  ;;  %v822_v32 = vld [vmem:[#allocation8 + $0x150] sm:$0xff]  ;;  %v2990_v34 = vpack.c.bf16 %v1035_v27, %v1034_v26  ;;  %v827_v42 = vld [vmem:[#allocation8 + $0x178] sm:$0xff] }
  0xbd   : > { %2943 = vmatprep.subr.bf16.mxu0 %v2942_v53  ;;  %v2966_v35 = vpack.c.bf16 %v823_v33, %v822_v32  ;;  %v824_v36 = vld [vmem:[#allocation8 + $0x160] sm:$0xff]  ;;  %v825_v39 = vld [vmem:[#allocation8 + $0x168] sm:$0xff]  ;;  %v826_v41 = vld [vmem:[#allocation8 + $0x170] sm:$0xff] }
  0xbe   : > { %v2970_v40 = vpack.c.bf16 %v825_v39, %v824_v36  ;;  %v2974_v45 = vpack.c.bf16 %v827_v42, %v826_v41  ;;  %v804_v46 = vld [vmem:[#allocation2 + $0xa] sm:$0xff]  ;;  %v805_v47 = vld [vmem:[#allocation2 + $0x1a] sm:$0xff]  ;;  %v806_v48 = vld [vmem:[#allocation2 + $0x22] sm:$0xff] }
  0xbf   : > { %2909 = vmatpush3.bf16.msra.mxu1 %v2906_v56  ;;  %v807_v49 = vld [vmem:[#allocation2 + $0x32] sm:$0xff]  ;;  %v808_v50 = vld [vmem:[#allocation2 + $0x3a] sm:$0xff]  ;;  %v809_v51 = vld [vmem:[#allocation2 + $0x4a] sm:$0xff] }
  0xc0   : > { %2945 = vmatpush3.bf16.msra.mxu0 %v2942_v53  ;;  %2911 = vmatprep.subr.bf16.mxu1 %v2910_v62  ;;  %v810_v52 = vld [vmem:[#allocation2 + $0x52] sm:$0xff]  ;;  %v1036_v53 = vld [vmem:[#allocation10 + $0xc0] sm:$0xff]  ;;  %v1037_v54 = vld [vmem:[#allocation10 + $0xc8] sm:$0xff] }
  0xc1   : > { %2947 = vmatprep.subr.bf16.mxu0 %v2946_v59  ;;  %v2994_v55 = vpack.c.bf16 %v1037_v54, %v1036_v53  ;;  %v1038_v56 = vld [vmem:[#allocation10 + $0xd0] sm:$0xff]  ;;  %v1039_v57 = vld [vmem:[#allocation10 + $0xd8] sm:$0xff]  ;;  %v1041_v60 = vld [vmem:[#allocation10 + $0xe8] sm:$0xff] }
  0xc2   : > { %v2998_v58 = vpack.c.bf16 %v1039_v57, %v1038_v56  ;;  %v1043_v63 = vld [vmem:[#allocation10 + $0xf8] sm:$0xff]  ;;  %v1471_v4 = vld [vmem:[#allocation11 + $0x80] sm:$0xff]  ;;  %v1472_v5 = vld [vmem:[#allocation11 + $0x88] sm:$0xff] }
  0xc3   : > { %2519 = vmatmul.mubr.f32.vlgmr.msra.gmra.mrb[0].mxu0 %v545_v1  ;;  %2913 = vmatpush3.bf16.msra.mxu1 %v2910_v62  ;;  %v1042_v62 = vld [vmem:[#allocation10 + $0xf0] sm:$0xff]  ;;  %v1003_v1 = vld [vmem:[#allocation10] sm:$0xff]  ;;  %v1474_v8 = vld [vmem:[#allocation11 + $0x98] sm:$0xff] }
  0xc4   : > { %2949 = vmatpush3.bf16.msra.mxu0 %v2946_v59  ;;  %2521 = vmatprep.mubr.f32.mxu0 %v546_v3  ;;  %v1040_v59 = vld [vmem:[#allocation10 + $0xe0] sm:$0xff]  ;;  %v3006_v0 = vpack.c.bf16 %v1043_v63, %v1042_v62  ;;  %v1477_v13 = vld [vmem:[#allocation11 + $0xb0] sm:$0xff]  ;;  %v1480_v19 = vld [vmem:[#allocation11 + $0xc8] sm:$0xff] }
  0xc5   : > { %2951 = vmatprep.subr.bf16.mxu0 %v2950_v2  ;;  %2979 = vmatprep.subr.bf16.mxu1 %v2978_v6  ;;  %v3002_v61 = vpack.c.bf16 %v1041_v60, %v1040_v59  ;;  %v1479_v18 = vld [vmem:[#allocation11 + $0xc0] sm:$0xff]  ;;  %v1008_v63 = vld [vmem:[#allocation10 + $0x28] sm:$0xff] }
  0xc6   : > { %2475 = vmatmul.mubr.f32.vlgmr.msra.gmra.mrb[0].mxu1 %v3892_v16  ;;  %v2184_v32 = vld [vmem:[%s4032_s2] ss:$0 sm:$0xff] }
  0xc7   : > { %2522 = vmatmul.mubr.f32.gmra.mrb[2].mxu0 %v547_v7  ;;  %2477 = vmatprep.mubr.f32.mxu1 %v3897_v29  ;;  %v3074_v7 = vpack.c.bf16 %v1472_v5, %v1471_v4  ;;  %v1007_v62 = vld [vmem:[#allocation10 + $0x20] sm:$0xff] }
  0xc8   : > { %2953 = vmatpush3.bf16.msra.mxu0 %v2950_v2  ;;  %2524 = vmatprep.mubr.f32.mxu0 %v548_v11  ;;  %v1004_v2 = vld [vmem:[#allocation10 + $0x8] sm:$0xff] }
  0xc9   : > { %2955 = vmatprep.subr.bf16.mxu0 %v2954_v10  ;;  %2981 = vmatpush3.bf16.msra.mxu1 %v2978_v6  ;;  %v3927_v3 = vpack.c.bf16 %v1004_v2, %v1003_v1  ;;  %v1473_v6 = vld [vmem:[#allocation11 + $0x90] sm:$0xff]  ;;  %v1476_v11 = vld [vmem:[#allocation11 + $0xa8] sm:$0xff] }
  0xca   : > { %2983 = vmatprep.subr.bf16.mxu1 %v2982_v14  ;;  %2478 = vmatmul.mubr.f32.gmra.mrb[2].mxu1 %v3900_v30  ;;  %v3078_v9 = vpack.c.bf16 %v1474_v8, %v1473_v6 }
  0xcb   : > { %2525 = vmatmul.mubr.f32.gmra.mrb[4].mxu0 %v549_v17  ;;  %2480 = vmatprep.mubr.f32.mxu1 %v3905_v37 }
  0xcc   : > { %2957 = vmatpush3.bf16.msra.mxu0 %v2954_v10  ;;  %2527 = vmatprep.mubr.f32.mxu0 %v550_v21  ;;  %v1475_v10 = vld [vmem:[#allocation11 + $0xa0] sm:$0xff] }
  0xcd   : > { %2959 = vmatprep.subr.bf16.mxu0 %v2958_v20  ;;  %2985 = vmatpush3.bf16.msra.mxu1 %v2982_v14  ;;  %v3082_v12 = vpack.c.bf16 %v1476_v11, %v1475_v10  ;;  %v1478_v14 = vld [vmem:[#allocation11 + $0xb8] sm:$0xff] }
  0xce   : > { %2987 = vmatprep.subr.bf16.mxu1 %v2986_v24  ;;  %2481 = vmatmul.mubr.f32.gmra.mrb[4].mxu1 %v3908_v38  ;;  %v3086_v17 = vpack.c.bf16 %v1478_v14, %v1477_v13  ;;  %v1010_v13 = vld [vmem:[#allocation10 + $0x38] sm:$0xff] }
  0xcf   : > { %2528 = vmatmul.mubr.f32.gmra.mrb[6].mxu0 %v551_v25  ;;  %2483 = vmatprep.mubr.f32.mxu1 %v3913_v43 }
  0xd0   : > { %2961 = vmatpush3.bf16.msra.mxu0 %v2958_v20  ;;  %2562 = vmatprep.mubr.f32.mxu0 %v803_v31  ;;  %v3090_v20 = vpack.c.bf16 %v1480_v19, %v1479_v18 }
  0xd1   : > { %2963 = vmatprep.subr.bf16.mxu0 %v2962_v28  ;;  %2989 = vmatpush3.bf16.msra.mxu1 %v2986_v24 }
  0xd2   : > { %2991 = vmatprep.subr.bf16.mxu1 %v2990_v34  ;;  %2484 = vmatmul.mubr.f32.gmra.mrb[6].mxu1 %v3916_v44 }
  0xd4   : > { %2965 = vmatpush3.bf16.msra.mxu0 %v2962_v28 }
  0xd5   : > { %2967 = vmatprep.subr.bf16.mxu0 %v2966_v35  ;;  %2993 = vmatpush3.bf16.msra.mxu1 %v2990_v34 }
  0xd6   : > { %2995 = vmatprep.subr.bf16.mxu1 %v2994_v55 }
  0xd8   : > { %2969 = vmatpush3.bf16.msra.mxu0 %v2966_v35  ;;  %v2185_v35 = vld [vmem:[%s4033_s3] ss:$0 sm:$0xff] }
  0xd9   : > { %2971 = vmatprep.subr.bf16.mxu0 %v2970_v40  ;;  %2997 = vmatpush3.bf16.msra.mxu1 %v2994_v55 }
  0xda   : > { %2999 = vmatprep.subr.bf16.mxu1 %v2998_v58 }
  0xdc   : > { %2973 = vmatpush3.bf16.msra.mxu0 %v2970_v40 }
  0xdd   : > { %2975 = vmatprep.subr.bf16.mxu0 %v2974_v45  ;;  %3001 = vmatpush3.bf16.msra.mxu1 %v2998_v58 }
  0xde   : > { %3003 = vmatprep.subr.bf16.mxu1 %v3002_v61 }
  0xe0   : > { %2977 = vmatpush3.bf16.msra.mxu0 %v2974_v45 }
  0xe1   : > { %3005 = vmatpush3.bf16.msra.mxu1 %v3002_v61  ;;  %3075 = vmatprep.subr.bf16.mxu0 %v3074_v7 }
  0xe2   : > { %3007 = vmatprep.subr.bf16.mxu1 %v3006_v0 }
  0xe3   : > { %2563 = vmatmul.mubr.f32.vlgmr.msra.gmra.mrb[0].mxu0 %v804_v46 }
  0xe4   : > { %2565 = vmatprep.mubr.f32.mxu0 %v805_v47  ;;  %3077 = vmatpush3.bf16.msra.mxu0 %v3074_v7 }
  0xe5   : > { %3009 = vmatpush3.bf16.msra.mxu1 %v3006_v0  ;;  %3079 = vmatprep.subr.bf16.mxu0 %v3078_v9 }
  0xe6   : > { %3011 = vmatprep.subr.bf16.mxu1 %v3927_v3 }
  0xe7   : > { %2566 = vmatmul.mubr.f32.gmra.mrb[2].mxu0 %v806_v48 }
  0xe8   : > { %2568 = vmatprep.mubr.f32.mxu0 %v807_v49  ;;  %3081 = vmatpush3.bf16.msra.mxu0 %v3078_v9  ;;  %v1005_v49 = vld [vmem:[#allocation10 + $0x10] sm:$0xff]  ;;  %v3018_v9 = vpack.c.bf16 %v1008_v63, %v1007_v62 }
  0xe9   : > { %3083 = vmatprep.subr.bf16.mxu0 %v3082_v12 }
  0xeb   : > { %2569 = vmatmul.mubr.f32.gmra.mrb[4].mxu0 %v808_v50  ;;  %v1006_v50 = vld [vmem:[#allocation10 + $0x18] sm:$0xff] }
  0xec   : > { %2571 = vmatprep.mubr.f32.mxu0 %v809_v51  ;;  %3085 = vmatpush3.bf16.msra.mxu0 %v3082_v12  ;;  %v3014_v59 = vpack.c.bf16 %v1006_v50, %v1005_v49  ;;  %v1009_v12 = vld [vmem:[#allocation10 + $0x30] sm:$0xff]  ;;  %v1267_v50 = vld [vmem:[#allocation10 + $0x120] sm:$0xff] }
  0xed   : > { %3087 = vmatprep.subr.bf16.mxu0 %v3086_v17 }
  0xef   : > { %2572 = vmatmul.mubr.f32.gmra.mrb[6].mxu0 %v810_v52 }
  0xf0   : > { %3089 = vmatpush3.bf16.msra.mxu0 %v3086_v17 }
  0xf1   : > { %3091 = vmatprep.subr.bf16.mxu0 %v3090_v20 }
  0xf4   : > { %3093 = vmatpush3.bf16.msra.mxu0 %v3090_v20  ;;  %v3022_v20 = vpack.c.bf16 %v1010_v13, %v1009_v12 }
 0x199   : > { %v2476_v21 = vpop.f32.mrb[0].mxu1 }
 0x19a   : > { %v659_v22 = vpop.f32.mrb[1].mxu1 }
 0x19d   : > { %v2479_v23 = vpop.f32.mrb[2].mxu1 }
 0x19e   : > { %v669_v24 = vpop.f32.mrb[3].mxu1 }
 0x1a1   : > { %v2482_v25 = vpop.f32.mrb[4].mxu1 }
 0x1a2   : > { %v679_v26 = vpop.f32.mrb[5].mxu1 }
 0x1a5   : > { %v2485_v27 = vpop.f32.mrb[6].mxu1 }
 0x1a6   : > { %v689_v28 = vpop.f32.mrb[7].mxu1 }
 0x1b6   : > { %v2564_v31 = vpop.f32.mrb[0].mxu0 }
 0x1b7   : > { %v3202_v33 = vadd.f32 %v2564_v31, %v2476_v21  ;;  %v894_v34 = vpop.f32.mrb[1].mxu0 }
 0x1b8   : > { %v3203_v36 = vadd.f32 %v894_v34, %v659_v22  ;;  %v1011_v22 = vld [vmem:[#allocation10 + $0x40] sm:$0xff]  ;;  %v1016_v34 = vld [vmem:[#allocation10 + $0x68] sm:$0xff] }
 0x1b9   : > { %v949_v39 = vmul.f32 %v3202_v33, %v2184_v32  ;;  %v1015_v33 = vld [vmem:[#allocation10 + $0x60] sm:$0xff] }
 0x1ba   : > { %v948_v40 = vmul.f32 %v3203_v36, %v2184_v32  ;;  %v2567_v41 = vpop.f32.mrb[2].mxu0  ;;  %v1017_v36 = vld [vmem:[#allocation10 + $0x70] sm:$0xff] }
 0x1bb   : > { %v964_v42 = vadd.f32 %v2185_v35, %v949_v39  ;;  %v3204_v45 = vadd.f32 %v2567_v41, %v2479_v23  ;;  %v904_v46 = vpop.f32.mrb[3].mxu0  ;;  %v1012_v23 = vld [vmem:[#allocation10 + $0x48] sm:$0xff]  ;;  %v1018_v39 = vld [vmem:[#allocation10 + $0x78] sm:$0xff]  ;;  %v1263_v41 = vld [vmem:[#allocation10 + $0x100] sm:$0xff] }
 0x1bc   : > { %v963_v47 = vadd.f32 %v2185_v35, %v948_v40  ;;  %v3205_v48 = vadd.f32 %v904_v46, %v669_v24  ;;  %v3038_v40 = vpack.c.bf16 %v1018_v39, %v1017_v36  ;;  %v1265_v46 = vld [vmem:[#allocation10 + $0x110] sm:$0xff]  ;;  %v1868_v39 = vld [vmem:[#allocation13 + $0x18] sm:$0xff] }
 0x1bd   : > { %v972_v51 = vmax.f32 %v964_v42, 0.0  ;;  %v951_v52 = vmul.f32 %v3204_v45, %v2184_v32  ;;  %v1264_v42 = vld [vmem:[#allocation10 + $0x108] sm:$0xff]  ;;  %v1867_v36 = vld [vmem:[#allocation13 + $0x10] sm:$0xff] }
 0x1be   : > { %v971_v53 = vmax.f32 %v963_v47, 0.0  ;;  %v950_v54 = vmul.f32 %v3205_v48, %v2184_v32  ;;  %v2570_v55 = vpop.f32.mrb[4].mxu0  ;;  %v3042_v45 = vpack.c.bf16 %v1264_v42, %v1263_v41  ;;  %v1266_v47 = vld [vmem:[#allocation10 + $0x118] sm:$0xff]  ;;  %v1869_v41 = vld [vmem:[#allocation13 + $0x20] sm:$0xff]  ;;  %v1870_v42 = vld [vmem:[#allocation13 + $0x28] sm:$0xff] }
 0x1bf   : > { %988 = vst [vmem:[#allocation3 + $0x9] sm:$0xff] %v972_v51  ;;  %v966_v56 = vadd.f32 %v2185_v35, %v951_v52  ;;  %v3206_v57 = vadd.f32 %v2570_v55, %v2482_v25  ;;  %v914_v58 = vpop.f32.mrb[5].mxu0  ;;  %v3046_v48 = vpack.c.bf16 %v1266_v47, %v1265_v46  ;;  %v1269_v55 = vld [vmem:[#allocation10 + $0x130] sm:$0xff]  ;;  %v1872_v47 = vld [vmem:[#allocation13 + $0x38] sm:$0xff] }
 0x1c0   : > { %987 = vst [vmem:[#allocation3 + $0x1] sm:$0xff] %v971_v53  ;;  %v965_v60 = vadd.f32 %v2185_v35, %v950_v54  ;;  %v3207_v61 = vadd.f32 %v914_v58, %v679_v26  ;;  %2606 = vmatprep.mubr.f32.mxu1 %v971_v53  ;;  %v3026_v26 = vpack.c.bf16 %v1012_v23, %v1011_v22  ;;  %v1483_v23 = vld [vmem:[#allocation11 + $0xe0] sm:$0xff]  ;;  %v1871_v46 = vld [vmem:[#allocation13 + $0x30] sm:$0xff] }
 0x1c1   : > { %v974_v0 = vmax.f32 %v966_v56, 0.0  ;;  %v953_v1 = vmul.f32 %v3206_v57, %v2184_v32  ;;  %2607 = vmatmul.mubr.f32.vlgmr.msra.gmra.mrb[8].mxu1 %v972_v51  ;;  %v1268_v51 = vld [vmem:[#allocation10 + $0x128] sm:$0xff]  ;;  %v1270_v56 = vld [vmem:[#allocation10 + $0x138] sm:$0xff] }
 0x1c2   : > { %v973_v2 = vmax.f32 %v965_v60, 0.0  ;;  %v952_v4 = vmul.f32 %v3207_v61, %v2184_v32  ;;  %v2573_v5 = vpop.f32.mrb[6].mxu0  ;;  %3013 = vmatpush3.bf16.msra.mxu1 %v3927_v3  ;;  %v3050_v53 = vpack.c.bf16 %v1268_v51, %v1267_v50  ;;  %v3054_v58 = vpack.c.bf16 %v1270_v56, %v1269_v55  ;;  %v1271_v60 = vld [vmem:[#allocation10 + $0x140] sm:$0xff]  ;;  %v1272_v61 = vld [vmem:[#allocation10 + $0x148] sm:$0xff] }
 0x1c3   : > { %990 = vst [vmem:[#allocation3 + $0x21] sm:$0xff] %v974_v0  ;;  %v968_v6 = vadd.f32 %v2185_v35, %v953_v1  ;;  %v3208_v7 = vadd.f32 %v2573_v5, %v2485_v27  ;;  %v924_v8 = vpop.f32.mrb[7].mxu0  ;;  %3015 = vmatprep.subr.bf16.mxu1 %v3014_v59  ;;  %v1013_v27 = vld [vmem:[#allocation10 + $0x50] sm:$0xff]  ;;  %v3058_v63 = vpack.c.bf16 %v1272_v61, %v1271_v60  ;;  %v1874_v50 = vld [vmem:[#allocation13 + $0x48] sm:$0xff]  ;;  %v1877_v55 = vld [vmem:[#allocation13 + $0x60] sm:$0xff] }
 0x1c4   : > { %989 = vst [vmem:[#allocation3 + $0x19] sm:$0xff] %v973_v2  ;;  %v967_v10 = vadd.f32 %v2185_v35, %v952_v4  ;;  %v3209_v11 = vadd.f32 %v924_v8, %v689_v28  ;;  %2609 = vmatprep.mubr.f32.mxu1 %v973_v2  ;;  %v1014_v28 = vld [vmem:[#allocation10 + $0x58] sm:$0xff]  ;;  %v1273_v1 = vld [vmem:[#allocation10 + $0x150] sm:$0xff]  ;;  %v1878_v56 = vld [vmem:[#allocation13 + $0x68] sm:$0xff] }
 0x1c5   : > { %v976_v14 = vmax.f32 %v968_v6, 0.0  ;;  %v955_v17 = vmul.f32 %v3208_v7, %v2184_v32  ;;  %2610 = vmatmul.mubr.f32.gmra.mrb[10].mxu1 %v974_v0  ;;  %v1274_v2 = vld [vmem:[#allocation10 + $0x158] sm:$0xff]  ;;  %v1275_v6 = vld [vmem:[#allocation10 + $0x160] sm:$0xff]  ;;  %v1276_v7 = vld [vmem:[#allocation10 + $0x168] sm:$0xff] }
 0x1c6   : > { %v975_v18 = vmax.f32 %v967_v10, 0.0  ;;  %v954_v19 = vmul.f32 %v3209_v11, %v2184_v32  ;;  %3017 = vmatpush3.bf16.msra.mxu1 %v3014_v59  ;;  %v3030_v32 = vpack.c.bf16 %v1014_v28, %v1013_v27  ;;  %v3062_v5 = vpack.c.bf16 %v1274_v2, %v1273_v1  ;;  %v1278_v10 = vld [vmem:[#allocation10 + $0x178] sm:$0xff]  ;;  %v1255_v12 = vld [vmem:[#allocation3 + $0xa] sm:$0xff]  ;;  %v2186_v61 = vld [vmem:[%s4035_s5] ss:$0 sm:$0xff] }
 0x1c7   : > { %992 = vst [vmem:[#allocation3 + $0x39] sm:$0xff] %v976_v14  ;;  %v970_v3 = vadd.f32 %v2185_v35, %v955_v17  ;;  %3019 = vmatprep.subr.bf16.mxu1 %v3018_v9  ;;  %v995_v31 = vld [vmem:[#allocation3] sm:$0xff]  ;;  %v996_v49 = vld [vmem:[#allocation3 + $0x8] sm:$0xff]  ;;  %v3066_v8 = vpack.c.bf16 %v1276_v7, %v1275_v6  ;;  %v1486_v27 = vld [vmem:[#allocation11 + $0xf8] sm:$0xff] }
 0x1c8   : > { %991 = vst [vmem:[#allocation3 + $0x31] sm:$0xff] %v975_v18  ;;  %v969_v21 = vadd.f32 %v2185_v35, %v954_v19  ;;  %2612 = vmatprep.mubr.f32.mxu1 %v975_v18  ;;  %v3034_v35 = vpack.c.bf16 %v1016_v34, %v1015_v33  ;;  %v1254_v4 = vld [vmem:[#allocation3 + $0x2] sm:$0xff] }
 0x1c9   : > { %v978_v24 = vmax.f32 %v970_v3, 0.0  ;;  %2613 = vmatmul.mubr.f32.gmra.mrb[12].mxu1 %v976_v14  ;;  %v1866_v34 = vld [vmem:[#allocation13 + $0x8] sm:$0xff]  ;;  %v1450_v6 = vld [vmem:[#allocation11 + $0x20] sm:$0xff] }
 0x1ca   : > { %v977_v25 = vmax.f32 %v969_v21, 0.0  ;;  %3021 = vmatpush3.bf16.msra.mxu1 %v3018_v9  ;;  %v1277_v9 = vld [vmem:[#allocation10 + $0x170] sm:$0xff]  ;;  %v1257_v14 = vld [vmem:[#allocation3 + $0x22] sm:$0xff]  ;;  %v1482_v21 = vld [vmem:[#allocation11 + $0xd8] sm:$0xff] }
 0x1cb   : > { %994 = vst [vmem:[#allocation3 + $0x51] sm:$0xff] %v978_v24  ;;  %3023 = vmatprep.subr.bf16.mxu1 %v3022_v20  ;;  %v997_v52 = vld [vmem:[#allocation3 + $0x18] sm:$0xff]  ;;  %v998_v54 = vld [vmem:[#allocation3 + $0x20] sm:$0xff]  ;;  %v3070_v11 = vpack.c.bf16 %v1278_v10, %v1277_v9  ;;  %v1451_v7 = vld [vmem:[#allocation11 + $0x28] sm:$0xff] }
 0x1cc   : > { %993 = vst [vmem:[#allocation3 + $0x49] sm:$0xff] %v977_v25  ;;  %2615 = vmatprep.mubr.f32.mxu1 %v977_v25  ;;  %v1256_v13 = vld [vmem:[#allocation3 + $0x1a] sm:$0xff] }
 0x1cd   : > { %2616 = vmatmul.mubr.f32.gmra.mrb[14].mxu1 %v978_v24  ;;  %v1484_v24 = vld [vmem:[#allocation11 + $0xe8] sm:$0xff] }
 0x1ce   : > { %3025 = vmatpush3.bf16.msra.mxu1 %v3022_v20  ;;  %2650 = vmatprep.mubr.f32.mxu1 %v995_v31  ;;  %v1259_v18 = vld [vmem:[#allocation3 + $0x3a] sm:$0xff]  ;;  %v1481_v20 = vld [vmem:[#allocation11 + $0xd0] sm:$0xff]  ;;  %v3098_v25 = vpack.c.bf16 %v1484_v24, %v1483_v23 }
 0x1cf   : > { %3027 = vmatprep.subr.bf16.mxu1 %v3026_v26  ;;  %v999_v57 = vld [vmem:[#allocation3 + $0x30] sm:$0xff]  ;;  %v1000_v59 = vld [vmem:[#allocation3 + $0x38] sm:$0xff]  ;;  %v3094_v22 = vpack.c.bf16 %v1482_v21, %v1481_v20  ;;  %v1446_v31 = vld [vmem:[#allocation11] sm:$0xff] }
 0x1d0   : > { %v1258_v17 = vld [vmem:[#allocation3 + $0x32] sm:$0xff] }
 0x1d1   : > { %3095 = vmatprep.subr.bf16.mxu0 %v3094_v22 }
 0x1d2   : > { %3029 = vmatpush3.bf16.msra.mxu1 %v3026_v26  ;;  %v1261_v3 = vld [vmem:[#allocation3 + $0x52] sm:$0xff]  ;;  %3097 = vmatpush3.bf16.msra.mxu0 %v3094_v22 }
 0x1d3   : > { %3031 = vmatprep.subr.bf16.mxu1 %v3030_v32  ;;  %v1001_v62 = vld [vmem:[#allocation3 + $0x48] sm:$0xff]  ;;  %v1002_v0 = vld [vmem:[#allocation3 + $0x50] sm:$0xff]  ;;  %3099 = vmatprep.subr.bf16.mxu0 %v3098_v25 }
 0x1d4   : > { %v1260_v19 = vld [vmem:[#allocation3 + $0x4a] sm:$0xff] }
 0x1d5   : > { %v1485_v26 = vld [vmem:[#allocation11 + $0xf0] sm:$0xff] }
 0x1d6   : > { %3033 = vmatpush3.bf16.msra.mxu1 %v3030_v32  ;;  %3101 = vmatpush3.bf16.msra.mxu0 %v3098_v25  ;;  %v3102_v28 = vpack.c.bf16 %v1486_v27, %v1485_v26  ;;  %v1447_v32 = vld [vmem:[#allocation11 + $0x8] sm:$0xff]  ;;  %v1454_v25 = vld [vmem:[#allocation11 + $0x40] sm:$0xff] }
 0x1d7   : > { %3035 = vmatprep.subr.bf16.mxu1 %v3034_v35  ;;  %v3938_v33 = vpack.c.bf16 %v1447_v32, %v1446_v31  ;;  %v1455_v26 = vld [vmem:[#allocation11 + $0x48] sm:$0xff]  ;;  %v1456_v32 = vld [vmem:[#allocation11 + $0x50] sm:$0xff] }
 0x1d8   : > { %3103 = vmatprep.subr.bf16.mxu0 %v3102_v28  ;;  %v3122_v31 = vpack.c.bf16 %v1455_v26, %v1454_v25  ;;  %v2191_v25 = vld [vmem:[%s4072_s14] ss:$0 sm:$0xff]  ;;  %s3484_s14 = scalar_lea.vmem %s3984_s20, 1024 }
 0x1d9   : > { %v2188_v26 = vld [vmem:[%s4073_s24] ss:$0 sm:$0xff]  ;;  %p3485_p3 = scmp.ne.s32.totalorder %s3984_s20, %s3484_s14  ;;  %s3490_s24 = scalar_lea.vmem %s3489_s15, 2048 }
 0x1da   : > { %3037 = vmatpush3.bf16.msra.mxu1 %v3034_v35  ;;  %3105 = vmatpush3.bf16.msra.mxu0 %v3102_v28  ;;  %p3492_p1 = scmp.lt.s32.totalorder %s3490_s24, %s3484_s14 }
 0x1db   : > { %3039 = vmatprep.subr.bf16.mxu1 %v3038_v40  ;;  %3107 = vmatprep.subr.bf16.mxu0 %v3938_v33  ;;  %p3486_p5 = pnand %p3485_p3, %p3812_p10 }
 0x1dc   : > { %p3493_p2 = por %p3492_p1, %p3491_p12 }
 0x1dd   : > { %p3487_p7 = pneg %p3486_p5 }
 0x1de   : > { %3041 = vmatpush3.bf16.msra.mxu1 %v3038_v40  ;;  %v3174_v40 = vpack.c.bf16 %v1868_v39, %v1867_v36  ;;  %v1459_v36 = vld [vmem:[#allocation11 + $0x68] sm:$0xff] }
 0x1df   : > { %3043 = vmatprep.subr.bf16.mxu1 %v3042_v45  ;;  %p3494_p13 = pnand %p3493_p2, %p3487_p7 }
 0x1e1   : > { %2651 = vmatmul.mubr.f32.vlgmr.msra.gmra.mrb[8].mxu1 %v996_v49  ;;  %v1873_v49 = vld [vmem:[#allocation13 + $0x40] sm:$0xff] }
 0x1e2   : > { %2653 = vmatprep.mubr.f32.mxu1 %v997_v52  ;;  %3045 = vmatpush3.bf16.msra.mxu1 %v3042_v45  ;;  %v3178_v45 = vpack.c.bf16 %v1870_v42, %v1869_v41  ;;  %v3186_v51 = vpack.c.bf16 %v1874_v50, %v1873_v49  ;;  %v1875_v52 = vld [vmem:[#allocation13 + $0x50] sm:$0xff]  ;;  %v1461_v41 = vld [vmem:[#allocation11 + $0x78] sm:$0xff] }
 0x1e3   : > { %3047 = vmatprep.subr.bf16.mxu1 %v3046_v48  ;;  %v1709_v49 = vld [vmem:[#allocation11 + $0x118] sm:$0xff] }
 0x1e5   : > { %2654 = vmatmul.mubr.f32.gmra.mrb[10].mxu1 %v998_v54 }
 0x1e6   : > { %2656 = vmatprep.mubr.f32.mxu1 %v999_v57  ;;  %3049 = vmatpush3.bf16.msra.mxu1 %v3046_v48  ;;  %v3182_v48 = vpack.c.bf16 %v1872_v47, %v1871_v46  ;;  %v3194_v57 = vpack.c.bf16 %v1878_v56, %v1877_v55  ;;  %v1707_v46 = vld [vmem:[#allocation11 + $0x108] sm:$0xff] }
 0x1e7   : > { %3051 = vmatprep.subr.bf16.mxu1 %v3050_v53 }
 0x1e9   : > { %2657 = vmatmul.mubr.f32.gmra.mrb[12].mxu1 %v1000_v59  ;;  %v1880_v59 = vld [vmem:[#allocation13 + $0x78] sm:$0xff] }
 0x1ea   : > { %2659 = vmatprep.mubr.f32.mxu1 %v1001_v62  ;;  %3053 = vmatpush3.bf16.msra.mxu1 %v3050_v53  ;;  %v1876_v53 = vld [vmem:[#allocation13 + $0x58] sm:$0xff] }
 0x1eb   : > { %3055 = vmatprep.subr.bf16.mxu1 %v3054_v58  ;;  %v3190_v54 = vpack.c.bf16 %v1876_v53, %v1875_v52  ;;  %v1710_v52 = vld [vmem:[#allocation11 + $0x120] sm:$0xff]  ;;  %v1711_v53 = vld [vmem:[#allocation11 + $0x128] sm:$0xff] }
 0x1ec   : > { %v3146_v55 = vpack.c.bf16 %v1711_v53, %v1710_v52 }
 0x1ed   : > { %2660 = vmatmul.mubr.f32.gmra.mrb[14].mxu1 %v1002_v0  ;;  %v1448_v0 = vld [vmem:[#allocation11 + $0x10] sm:$0xff] }
 0x1ee   : > { %3057 = vmatpush3.bf16.msra.mxu1 %v3054_v58  ;;  %2694 = vmatprep.mubr.f32.mxu1 %v1254_v4  ;;  %v1879_v58 = vld [vmem:[#allocation13 + $0x70] sm:$0xff] }
 0x1ef   : > { %3059 = vmatprep.subr.bf16.mxu1 %v3058_v63  ;;  %v3198_v60 = vpack.c.bf16 %v1880_v59, %v1879_v58  ;;  %v1713_v58 = vld [vmem:[#allocation11 + $0x138] sm:$0xff] }
 0x1f2   : > { %3061 = vmatpush3.bf16.msra.mxu1 %v3058_v63 }
 0x1f3   : > { %3063 = vmatprep.subr.bf16.mxu1 %v3062_v5 }
 0x1f6   : > { %3065 = vmatpush3.bf16.msra.mxu1 %v3062_v5 }
 0x1f7   : > { %3067 = vmatprep.subr.bf16.mxu1 %v3066_v8 }
 0x1fa   : > { %3069 = vmatpush3.bf16.msra.mxu1 %v3066_v8 }
 0x1fb   : > { %3071 = vmatprep.subr.bf16.mxu1 %v3070_v11 }
 0x1fe   : > { %3073 = vmatpush3.bf16.msra.mxu1 %v3070_v11 }
 0x201   : > { %2695 = vmatmul.mubr.f32.vlgmr.msra.gmra.mrb[8].mxu1 %v1255_v12 }
 0x202   : > { %2697 = vmatprep.mubr.f32.mxu1 %v1256_v13  ;;  %v3114_v13 = vpack.c.bf16 %v1451_v7, %v1450_v6 }
 0x205   : > { %2698 = vmatmul.mubr.f32.gmra.mrb[10].mxu1 %v1257_v14 }
 0x206   : > { %2700 = vmatprep.mubr.f32.mxu1 %v1258_v17  ;;  %v1452_v17 = vld [vmem:[#allocation11 + $0x30] sm:$0xff] }
 0x209   : > { %2701 = vmatmul.mubr.f32.gmra.mrb[12].mxu1 %v1259_v18  ;;  %v1453_v18 = vld [vmem:[#allocation11 + $0x38] sm:$0xff] }
 0x20a   : > { %2703 = vmatprep.mubr.f32.mxu1 %v1260_v19  ;;  %v3118_v23 = vpack.c.bf16 %v1453_v18, %v1452_v17 }
 0x20d   : > { %2704 = vmatmul.mubr.f32.gmra.mrb[14].mxu1 %v1261_v3 }
 0x20e   : > { %2870 = vmatprep.mubr.f32.mxu1 %v3888_v15  ;;  %v1865_v15 = vld [vmem:[#allocation13] sm:$0xff] }
 0x20f   : > { %v3170_v35 = vpack.c.bf16 %v1866_v34, %v1865_v15 }
 0x211   : > { %3171 = vmatprep.subr.bf16.mxu1 %v3170_v35 }
 0x212   : > { %3173 = vmatpush3.bf16.msra.mxu1 %v3170_v35  ;;  %v1458_v35 = vld [vmem:[#allocation11 + $0x60] sm:$0xff] }
 0x213   : > { %3175 = vmatprep.subr.bf16.mxu1 %v3174_v40  ;;  %v3130_v39 = vpack.c.bf16 %v1459_v36, %v1458_v35 }
 0x216   : > { %3177 = vmatpush3.bf16.msra.mxu1 %v3174_v40  ;;  %v1460_v40 = vld [vmem:[#allocation11 + $0x70] sm:$0xff] }
 0x217   : > { %3179 = vmatprep.subr.bf16.mxu1 %v3178_v45  ;;  %v3134_v42 = vpack.c.bf16 %v1461_v41, %v1460_v40 }
 0x21a   : > { %3181 = vmatpush3.bf16.msra.mxu1 %v3178_v45  ;;  %v1706_v45 = vld [vmem:[#allocation11 + $0x100] sm:$0xff] }
 0x21b   : > { %3183 = vmatprep.subr.bf16.mxu1 %v3182_v48  ;;  %v3138_v47 = vpack.c.bf16 %v1707_v46, %v1706_v45 }
 0x21e   : > { %3185 = vmatpush3.bf16.msra.mxu1 %v3182_v48  ;;  %v1708_v48 = vld [vmem:[#allocation11 + $0x110] sm:$0xff] }
 0x21f   : > { %3187 = vmatprep.subr.bf16.mxu1 %v3186_v51  ;;  %v3142_v50 = vpack.c.bf16 %v1709_v49, %v1708_v48 }
 0x222   : > { %3189 = vmatpush3.bf16.msra.mxu1 %v3186_v51 }
 0x223   : > { %3191 = vmatprep.subr.bf16.mxu1 %v3190_v54 }
 0x226   : > { %3193 = vmatpush3.bf16.msra.mxu1 %v3190_v54 }
 0x227   : > { %3195 = vmatprep.subr.bf16.mxu1 %v3194_v57 }
 0x22a   : > { %3197 = vmatpush3.bf16.msra.mxu1 %v3194_v57  ;;  %v1712_v57 = vld [vmem:[#allocation11 + $0x130] sm:$0xff] }
 0x22b   : > { %3199 = vmatprep.subr.bf16.mxu1 %v3198_v60 }
 0x22e   : > { %3201 = vmatpush3.bf16.msra.mxu1 %v3198_v60  ;;  %v3150_v60 = vpack.c.bf16 %v1713_v58, %v1712_v57 }
 0x231   : > { %2871 = vmatmul.mubr.f32.vlgmr.msra.gmra.mrb[16].mxu1 %v3892_v16  ;;  %v2187_v16 = vld [vmem:[%s4036_s6] ss:$0 sm:$0xff] }
 0x232   : > { %2873 = vmatprep.mubr.f32.mxu1 %v3897_v29 }
 0x235   : > { %2874 = vmatmul.mubr.f32.gmra.mrb[18].mxu1 %v3900_v30 }
 0x236   : > { %2876 = vmatprep.mubr.f32.mxu1 %v3905_v37  ;;  %v1449_v37 = vld [vmem:[#allocation11 + $0x18] sm:$0xff] }
 0x237   : > { %v3110_v4 = vpack.c.bf16 %v1449_v37, %v1448_v0  ;;  %v1716_v0 = vld [vmem:[#allocation11 + $0x150] sm:$0xff]  ;;  %v1717_v37 = vld [vmem:[#allocation11 + $0x158] sm:$0xff] }
 0x239   : > { %2877 = vmatmul.mubr.f32.gmra.mrb[20].mxu1 %v3908_v38 }
 0x23a   : > { %2879 = vmatprep.mubr.f32.mxu1 %v3913_v43 }
 0x23d   : > { %2880 = vmatmul.mubr.f32.gmra.mrb[22].mxu1 %v3916_v44 }
 0x2d4   : > { %v2696_v62 = vpop.f32.mrb[8].mxu1 }
 0x2d5   : > { %v1400_v29 = vmul.f32 %v2696_v62, %v2186_v61  ;;  %v1345_v63 = vpop.f32.mrb[9].mxu1  ;;  %v1714_v62 = vld [vmem:[#allocation11 + $0x140] sm:$0xff] }
 0x2d6   : > { %v1399_v30 = vmul.f32 %v2186_v61, %v1345_v63 }
 0x2d7   : > { %v1415_v1 = vadd.f32 %v2187_v16, %v1400_v29 }
 0x2d8   : > { %v1414_v38 = vadd.f32 %v2187_v16, %v1399_v30  ;;  %v2699_v2 = vpop.f32.mrb[10].mxu1 }
 0x2d9   : > { %1431 = vst [vmem:[#allocation4 + $0x9] sm:$0xff] %v1415_v1  ;;  %v1402_v43 = vmul.f32 %v2699_v2, %v2186_v61  ;;  %v1355_v44 = vpop.f32.mrb[11].mxu1  ;;  %v1718_v2 = vld [vmem:[#allocation11 + $0x160] sm:$0xff] }
 0x2da   : > { %1430 = vst [vmem:[#allocation4 + $0x1] sm:$0xff] %v1414_v38  ;;  %v1401_v5 = vmul.f32 %v2186_v61, %v1355_v44  ;;  %2738 = vmatprep.mubr.f32.mxu0 %v1414_v38  ;;  %v3158_v38 = vpack.c.bf16 %v1717_v37, %v1716_v0 }
 0x2db   : > { %v1417_v8 = vadd.f32 %v2187_v16, %v1402_v43  ;;  %2739 = vmatmul.mubr.f32.vlgmr.msra.gmra.mrb[8].mxu0 %v1415_v1  ;;  %v1719_v43 = vld [vmem:[#allocation11 + $0x168] sm:$0xff] }
 0x2dc   : > { %v1416_v9 = vadd.f32 %v2187_v16, %v1401_v5  ;;  %v2702_v10 = vpop.f32.mrb[12].mxu1  ;;  %3109 = vmatpush3.bf16.msra.mxu0 %v3938_v33  ;;  %v1457_v33 = vld [vmem:[#allocation11 + $0x58] sm:$0xff]  ;;  %v3162_v44 = vpack.c.bf16 %v1719_v43, %v1718_v2 }
 0x2dd   : > { %1433 = vst [vmem:[#allocation4 + $0x21] sm:$0xff] %v1417_v8  ;;  %v1404_v11 = vmul.f32 %v2702_v10, %v2186_v61  ;;  %v1365_v12 = vpop.f32.mrb[13].mxu1  ;;  %3111 = vmatprep.subr.bf16.mxu0 %v3110_v4  ;;  %v3126_v34 = vpack.c.bf16 %v1457_v33, %v1456_v32  ;;  %v1721_v5 = vld [vmem:[#allocation11 + $0x178] sm:$0xff] }
 0x2de   : > { %1432 = vst [vmem:[#allocation4 + $0x19] sm:$0xff] %v1416_v9  ;;  %v1403_v14 = vmul.f32 %v2186_v61, %v1365_v12  ;;  %2741 = vmatprep.mubr.f32.mxu0 %v1416_v9 }
 0x2df   : > { %v1419_v19 = vadd.f32 %v2187_v16, %v1404_v11  ;;  %2742 = vmatmul.mubr.f32.gmra.mrb[10].mxu0 %v1417_v8 }
 0x2e0   : > { %v1418_v3 = vadd.f32 %v2187_v16, %v1403_v14  ;;  %v2705_v20 = vpop.f32.mrb[14].mxu1  ;;  %3113 = vmatpush3.bf16.msra.mxu0 %v3110_v4  ;;  %v1720_v4 = vld [vmem:[#allocation11 + $0x170] sm:$0xff] }
 0x2e1   : > { %1435 = vst [vmem:[#allocation4 + $0x39] sm:$0xff] %v1419_v19  ;;  %v1406_v21 = vmul.f32 %v2705_v20, %v2186_v61  ;;  %v1375_v22 = vpop.f32.mrb[15].mxu1  ;;  %3115 = vmatprep.subr.bf16.mxu0 %v3114_v13  ;;  %v1438_v15 = vld [vmem:[#allocation4] sm:$0xff]  ;;  %v1439_v51 = vld [vmem:[#allocation4 + $0x8] sm:$0xff]  ;;  %v3166_v6 = vpack.c.bf16 %v1721_v5, %v1720_v4 }
 0x2e2   : > { %1434 = vst [vmem:[#allocation4 + $0x31] sm:$0xff] %v1418_v3  ;;  %v1405_v24 = vmul.f32 %v2186_v61, %v1375_v22  ;;  %2744 = vmatprep.mubr.f32.mxu0 %v1418_v3  ;;  %v1697_v1 = vld [vmem:[#allocation4 + $0x2] sm:$0xff]  ;;  %v1698_v7 = vld [vmem:[#allocation4 + $0xa] sm:$0xff] }
 0x2e3   : > { %v1421_v27 = vadd.f32 %v2187_v16, %v1406_v21  ;;  %2745 = vmatmul.mubr.f32.gmra.mrb[12].mxu0 %v1419_v19 }
 0x2e4   : > { %v1420_v28 = vadd.f32 %v2187_v16, %v1405_v24  ;;  %3117 = vmatpush3.bf16.msra.mxu0 %v3114_v13  ;;  %v1715_v16 = vld [vmem:[#allocation11 + $0x148] sm:$0xff] }
 0x2e5   : > { %1437 = vst [vmem:[#allocation4 + $0x51] sm:$0xff] %v1421_v27  ;;  %3119 = vmatprep.subr.bf16.mxu0 %v3118_v23  ;;  %v1440_v54 = vld [vmem:[#allocation4 + $0x18] sm:$0xff]  ;;  %v1441_v56 = vld [vmem:[#allocation4 + $0x20] sm:$0xff]  ;;  %v3154_v63 = vpack.c.bf16 %v1715_v16, %v1714_v62 }
 0x2e6   : > { %1436 = vst [vmem:[#allocation4 + $0x49] sm:$0xff] %v1420_v28  ;;  %2747 = vmatprep.mubr.f32.mxu0 %v1420_v28  ;;  %v1699_v8 = vld [vmem:[#allocation4 + $0x1a] sm:$0xff]  ;;  %v1700_v9 = vld [vmem:[#allocation4 + $0x22] sm:$0xff] }
 0x2e7   : > { %2748 = vmatmul.mubr.f32.gmra.mrb[14].mxu0 %v1421_v27 }
 0x2e8   : > { %3121 = vmatpush3.bf16.msra.mxu0 %v3118_v23  ;;  %2782 = vmatprep.mubr.f32.mxu0 %v1438_v15  ;;  %v1702_v11 = vld [vmem:[#allocation4 + $0x3a] sm:$0xff] }
 0x2e9   : > { %3123 = vmatprep.subr.bf16.mxu0 %v3122_v31  ;;  %v1442_v59 = vld [vmem:[#allocation4 + $0x30] sm:$0xff]  ;;  %v1443_v61 = vld [vmem:[#allocation4 + $0x38] sm:$0xff]  ;;  %v2190_v23 = vld [vmem:[%s4071_s25] ss:$0 sm:$0xff] }
 0x2ea   : > { %v1701_v10 = vld [vmem:[#allocation4 + $0x32] sm:$0xff] }
 0x2ec   : > { %3125 = vmatpush3.bf16.msra.mxu0 %v3122_v31  ;;  %v1704_v13 = vld [vmem:[#allocation4 + $0x52] sm:$0xff]  ;;  %v2189_v31 = vld [vmem:[%s4074_s19] ss:$0 sm:$0xff] }
 0x2ed   : > { %3127 = vmatprep.subr.bf16.mxu0 %v3126_v34  ;;  %v1444_v29 = vld [vmem:[#allocation4 + $0x48] sm:$0xff]  ;;  %v1445_v30 = vld [vmem:[#allocation4 + $0x50] sm:$0xff] }
 0x2ee   : > { %v1703_v12 = vld [vmem:[#allocation4 + $0x4a] sm:$0xff] }
 0x2f0   : > { %3129 = vmatpush3.bf16.msra.mxu0 %v3126_v34 }
 0x2f1   : > { %3131 = vmatprep.subr.bf16.mxu0 %v3130_v39 }
 0x2f4   : > { %3133 = vmatpush3.bf16.msra.mxu0 %v3130_v39 }
 0x2f5   : > { %3135 = vmatprep.subr.bf16.mxu0 %v3134_v42 }
 0x2f8   : > { %3137 = vmatpush3.bf16.msra.mxu0 %v3134_v42 }
 0x2f9   : > { %3139 = vmatprep.subr.bf16.mxu0 %v3138_v47 }
 0x2fb   : > { %2783 = vmatmul.mubr.f32.vlgmr.msra.gmra.mrb[8].mxu0 %v1439_v51 }
 0x2fc   : > { %2785 = vmatprep.mubr.f32.mxu0 %v1440_v54  ;;  %3141 = vmatpush3.bf16.msra.mxu0 %v3138_v47 }
 0x2fd   : > { %3143 = vmatprep.subr.bf16.mxu0 %v3142_v50 }
 0x2ff   : > { %2786 = vmatmul.mubr.f32.gmra.mrb[10].mxu0 %v1441_v56 }
 0x300   : > { %2788 = vmatprep.mubr.f32.mxu0 %v1442_v59  ;;  %3145 = vmatpush3.bf16.msra.mxu0 %v3142_v50 }
 0x301   : > { %3147 = vmatprep.subr.bf16.mxu0 %v3146_v55 }
 0x303   : > { %2789 = vmatmul.mubr.f32.gmra.mrb[12].mxu0 %v1443_v61 }
 0x304   : > { %2791 = vmatprep.mubr.f32.mxu0 %v1444_v29  ;;  %3149 = vmatpush3.bf16.msra.mxu0 %v3146_v55  ;;  %v2872_v14 = vpop.f32.mrb[16].mxu1 }
 0x305   : > { %3151 = vmatprep.subr.bf16.mxu0 %v3150_v60  ;;  %v1947_v17 = vpop.f32.mrb[17].mxu1  ;;  %v1994_v24 = vmul.f32 %v2872_v14, %v2190_v23 }
 0x306   : > { %v1993_v27 = vmul.f32 %v2190_v23, %v1947_v17 }
 0x307   : > { %2792 = vmatmul.mubr.f32.gmra.mrb[14].mxu0 %v1445_v30  ;;  %v2009_v32 = vadd.f32 %v2191_v25, %v1994_v24 }
 0x308   : > { %3153 = vmatpush3.bf16.msra.mxu0 %v3150_v60  ;;  %2826 = vmatprep.mubr.f32.mxu0 %v1697_v1  ;;  %v2875_v18 = vpop.f32.mrb[18].mxu1  ;;  %v2008_v35 = vadd.f32 %v2191_v25, %v1993_v27 }
 0x309   : > { %3155 = vmatprep.subr.bf16.mxu0 %v3154_v63  ;;  %v1957_v19 = vpop.f32.mrb[19].mxu1  ;;  %v1996_v34 = vmul.f32 %v2875_v18, %v2190_v23 }
 0x30a   : > { %v1995_v39 = vmul.f32 %v2190_v23, %v1957_v19 }
 0x30b   : > { %v2011_v46 = vadd.f32 %v2191_v25, %v1996_v34 }
 0x30c   : > { %3157 = vmatpush3.bf16.msra.mxu0 %v3154_v63  ;;  %v2878_v3 = vpop.f32.mrb[20].mxu1  ;;  %v2010_v51 = vadd.f32 %v2191_v25, %v1995_v39 }
 0x30d   : > { %3159 = vmatprep.subr.bf16.mxu0 %v3158_v38  ;;  %v1967_v20 = vpop.f32.mrb[21].mxu1  ;;  %v1998_v49 = vmul.f32 %v2878_v3, %v2190_v23 }
 0x30e   : > { %v1997_v53 = vmul.f32 %v2190_v23, %v1967_v20 }
 0x30f   : > { %v2013_v60 = vadd.f32 %v2191_v25, %v1998_v49 }
 0x310   : > { %3161 = vmatpush3.bf16.msra.mxu0 %v3158_v38  ;;  %v2881_v21 = vpop.f32.mrb[22].mxu1  ;;  %v2012_v63 = vadd.f32 %v2191_v25, %v1997_v53 }
 0x311   : > { %3163 = vmatprep.subr.bf16.mxu0 %v3162_v44  ;;  %v1977_v22 = vpop.f32.mrb[23].mxu1  ;;  %v2000_v16 = vmul.f32 %v2881_v21, %v2190_v23 }
 0x312   : > { %v1999_v0 = vmul.f32 %v2190_v23, %v1977_v22 }
 0x313   : > { %v2015_v4 = vadd.f32 %v2191_v25, %v2000_v16 }
 0x314   : > { %3165 = vmatpush3.bf16.msra.mxu0 %v3162_v44 }
 0x315   : > { %3167 = vmatprep.subr.bf16.mxu0 %v3166_v6 }
 0x318   : > { %3169 = vmatpush3.bf16.msra.mxu0 %v3166_v6 }
 0x31b   : > { %2827 = vmatmul.mubr.f32.vlgmr.msra.gmra.mrb[8].mxu0 %v1698_v7 }
 0x31c   : > { %2829 = vmatprep.mubr.f32.mxu0 %v1699_v8  ;;  %v2014_v8 = vadd.f32 %v2191_v25, %v1999_v0 }
 0x31f   : > { %2830 = vmatmul.mubr.f32.gmra.mrb[10].mxu0 %v1700_v9 }
 0x320   : > { %2832 = vmatprep.mubr.f32.mxu0 %v1701_v10 }
 0x323   : > { %2833 = vmatmul.mubr.f32.gmra.mrb[12].mxu0 %v1702_v11 }
 0x324   : > { %2835 = vmatprep.mubr.f32.mxu0 %v1703_v12 }
 0x327   : > { %2836 = vmatmul.mubr.f32.gmra.mrb[14].mxu0 %v1704_v13 }
 0x3ee   : > { %v2828_v28 = vpop.f32.mrb[8].mxu0 }
 0x3ef   : > { %v1843_v33 = vmul.f32 %v2828_v28, %v2188_v26  ;;  %v1788_v15 = vpop.f32.mrb[9].mxu0 }
 0x3f0   : > { %v1842_v36 = vmul.f32 %v2188_v26, %v1788_v15 }
 0x3f1   : > { %v1858_v40 = vadd.f32 %v2189_v31, %v1843_v33 }
 0x3f2   : > { %v1857_v41 = vadd.f32 %v2189_v31, %v1842_v36  ;;  %v2831_v42 = vpop.f32.mrb[10].mxu0 }
 0x3f3   : > { %v2017_v45 = vadd.f32 %v2009_v32, %v1858_v40  ;;  %v1845_v47 = vmul.f32 %v2831_v42, %v2188_v26  ;;  %v1798_v48 = vpop.f32.mrb[11].mxu0 }
 0x3f4   : > { %v2016_v50 = vadd.f32 %v2008_v35, %v1857_v41  ;;  %v1844_v52 = vmul.f32 %v2188_v26, %v1798_v48 }
 0x3f5   : > { %v2025_v54 = vmax.f32 %v2017_v45, 0.0  ;;  %v1860_v55 = vadd.f32 %v2189_v31, %v1845_v47 }
 0x3f6   : > { %v2024_v56 = vmax.f32 %v2016_v50, 0.0  ;;  %v1859_v57 = vadd.f32 %v2189_v31, %v1844_v52  ;;  %v2834_v58 = vpop.f32.mrb[12].mxu0 }
 0x3f7   : > { %2033 = vst [vmem:[%s3969_s17 + $0x8] sm:$0xff] %v2025_v54  ;;  %v2019_v59 = vadd.f32 %v2011_v46, %v1860_v55  ;;  %v1847_v61 = vmul.f32 %v2834_v58, %v2188_v26  ;;  %v1808_v62 = vpop.f32.mrb[13].mxu0 }
 0x3f8   : > { %2032 = vst [vmem:[%s3969_s17] sm:$0xff] %v2024_v56  ;;  %v2018_v29 = vadd.f32 %v2010_v51, %v1859_v57  ;;  %v1846_v30 = vmul.f32 %v2188_v26, %v1808_v62 }
 0x3f9   : > { %v2027_v37 = vmax.f32 %v2019_v59, 0.0  ;;  %v1862_v1 = vadd.f32 %v2189_v31, %v1847_v61 }
 0x3fa   : > { %v2026_v38 = vmax.f32 %v2018_v29, 0.0  ;;  %v1861_v2 = vadd.f32 %v2189_v31, %v1846_v30  ;;  %v2837_v43 = vpop.f32.mrb[14].mxu0 }
 0x3fb   : > { %2035 = vst [vmem:[%s3969_s17 + $0x18] sm:$0xff] %v2027_v37  ;;  %v2021_v44 = vadd.f32 %v2013_v60, %v1862_v1  ;;  %v1849_v5 = vmul.f32 %v2837_v43, %v2188_v26  ;;  %v1818_v6 = vpop.f32.mrb[15].mxu0 }
 0x3fc   : > { %2034 = vst [vmem:[%s3969_s17 + $0x10] sm:$0xff] %v2026_v38  ;;  %v2020_v7 = vadd.f32 %v2012_v63, %v1861_v2  ;;  %v1848_v9 = vmul.f32 %v2188_v26, %v1818_v6 }
 0x3fd   : > { %v2029_v10 = vmax.f32 %v2021_v44, 0.0  ;;  %v1864_v11 = vadd.f32 %v2189_v31, %v1849_v5 }
 0x3fe   : > { %v2028_v12 = vmax.f32 %v2020_v7, 0.0  ;;  %v1863_v13 = vadd.f32 %v2189_v31, %v1848_v9 }
 0x3ff   : > { %2037 = vst [vmem:[%s3969_s17 + $0x28] sm:$0xff] %v2029_v10  ;;  %v2023_v14 = vadd.f32 %v2015_v4, %v1864_v11 }
 0x400   : > { %2036 = vst [vmem:[%s3969_s17 + $0x20] sm:$0xff] %v2028_v12  ;;  %v2022_v17 = vadd.f32 %v2014_v8, %v1863_v13 }
 0x401   : > { %v2031_v18 = vmax.f32 %v2023_v14, 0.0 }
 0x402   : > { %v2030_v19 = vmax.f32 %v2022_v17, 0.0 }
 0x403   : > { %2039 = vst [vmem:[%s3969_s17 + $0x38] sm:$0xff] %v2031_v18 }
 0x404   : > { %2038 = vst [vmem:[%s3969_s17 + $0x30] sm:$0xff] %v2030_v19 }
 0x405   : > { %3497 = shalt.err (!%p3494_p13)
}
 0x406   : > { %s3498_s18 = scalar_lea.hbm %s3982_s8, 1024  ;;  %s3502_s17 = scalar_lea.hbm %s4075_s23, 2048 }
 0x407   : > { %p3499_p9 = scmp.ne.s32.totalorder %s3982_s8, %s3498_s18  ;;  %p3503_p4 = scmp.lt.u32.totalorder %s3982_s8, %s4075_s23 }
 0x408   : > { %p3504_p8 = scmp.lt.u32.totalorder %s3502_s17, %s3498_s18  ;;  %p3506_p3 = scmp.lt.u32.totalorder %s3498_s18, %s3982_s8 }
 0x409   : > { %p3500_p0 = pnand %p3499_p9, %p3812_p10 }
 0x40a   : > { %p3505_p6 = por %p3504_p8, %p3503_p4 }
 0x40b   : > { %p3501_p11 = pneg %p3500_p0 }
 0x40c   : > { %p3507_p5 = por %p3506_p3, %p3505_p6 }
 0x40e   : > { %p3508_p7 = pnand %p3507_p5, %p3501_p11 }
 0x410   : > { %3511 = shalt.err (!%p3508_p7)
}
 0x411   : > { %s3569_s25 = smov 128   ;;  %s3570_s14 = smov 8  }
 0x412   : > { %3268 = dma.vmem_to_hbm [thread:$0]  (%p3812_p10), %s3984_s20, 1024, %s3982_s8, %s2041_s29, %s3569_s25, %s3569_s25, %s3570_s14  }
 0x413 PF: > { %s4076_s16 = sld [smem:[#allocation19_spill]]  ;;  %s4077_s15 = sld [smem:[#allocation20_spill]] }
 0x414   : > { %p4079_p1 = scmp.ge.s32.totalorder %s3558_s28, 2 }
 0x419   : > { %s2070_s24 = sand.u32 1, %s4076_s16   ;;  %p4078_p12 = scmp.ne.s32.totalorder %s4077_s15, 0 }
 0x41a   : > { %s2071_s18 = scalar_lea.sflag [#allocation7], %s2070_s24 }
 0x41b   : > { %p3288_p2 = pnand %p4079_p1, %p4078_p12 }
 0x41d   : > { %3541 = dma.done.wait (!%p3288_p2), %s2071_s18, 1024  }
 0x41e   : > { %3543 = vsyncadd (!%p3288_p2), %s2071_s18, 4294966272  ;;  %p28_p13 = scmp.ge.s32.totalorder %s3802_s13, 4   ;;  %s4080_s25 = smov %s3550_s26 }
 0x41f   : > { %s4081_s26 = smov %s3554_s27  ;;  %s4082_s27 = smov %s3818_s30 }
 0x420   : > { %s4083_s28 = smov %s3802_s13  ;;  %30 = sbr.rel (!%p28_p13) target bundleno = 13 (0xd), region = 139 }
 0x427   :  { %2076 = vsyncpa [#allocation6], 1 }
 0x428   :  { %2078 = vsyncpa [#allocation6 + $0x1], 1 }
 0x429   :  { %2079 = vsyncpa [#allocation9], 1 }
 0x42a   :  { %2080 = vsyncpa [#allocation12], 1 }
 0x42b   :  { %2081 = vsyncpa [#allocation7], 1 }
 0x42c   :  { %2083 = vsyncpa [#allocation7 + $0x1], 1 }

// kernel: tpu_custom_call.1
= control target key start
LH: loop header
LB: loop body
LE: loop exit
PB: predicated region body
PF: predicated region fallthrough
CT: control target
= control target key end

     0   :  { %s4030_s0 = inlined_call_operand.hbm [shape: f32[8,16,128], index: 0, kind: input, shape index: {}]   ;;  %s4031_s1 = inlined_call_operand.hbm [shape: f32[3,128,128], index: 1, kind: input, shape index: {}]   ;;  %s4032_s2 = inlined_call_operand.vmem [shape: f32[1,128], index: 2, kind: input, shape index: {}]   ;;  %s4033_s3 = inlined_call_operand.vmem [shape: f32[1,128], index: 3, kind: input, shape index: {}]   ;;  %s4034_s4 = inlined_call_operand.hbm [shape: f32[3,128,128], index: 4, kind: input, shape index: {}]   ;;  %s4035_s5 = inlined_call_operand.vmem [shape: f32[1,128], index: 5, kind: input, shape index: {}]   ;;  %s4036_s6 = inlined_call_operand.vmem [shape: f32[1,128], index: 6, kind: input, shape index: {}]   ;;  %s4037_s7 = inlined_call_operand.hbm [shape: f32[3,128,128], index: 7, kind: input, shape index: {}]   ;;  %s4038_s8 = inlined_call_operand.vmem [shape: f32[1,128], index: 8, kind: input, shape index: {}]   ;;  %s4039_s9 = inlined_call_operand.vmem [shape: f32[1,128], index: 9, kind: input, shape index: {}]   ;;  %s4040_s10 = inlined_call_operand.hbm [shape: f32[128,128], index: 10, kind: input, shape index: {}]   ;;  %s4041_s11 = inlined_call_operand.vmem [shape: f32[1,128], index: 11, kind: input, shape index: {}]   ;;  %s4042_s12 = inlined_call_operand.vmem [shape: f32[1,128], index: 12, kind: input, shape index: {}]   ;;  %s4043_s13 = inlined_call_operand.hbm [shape: f32[8,16,128], index: 13, kind: output, shape index: {}]  }
   0x1   :  { %4050 = sst [smem:[#allocation21_spill]] %s4038_s8 }
   0x2   :  { %4051 = sst [smem:[#allocation22_spill]] %s4039_s9 }
   0x3   :  { %4052 = sst [smem:[#allocation23_spill]] %s4041_s11 }
   0x4   :  { %4053 = sst [smem:[#allocation24_spill]] %s4042_s12 }
   0x5   :  { %4054 = sst [smem:[#allocation25_spill]] %s4043_s13 }
   0x6   :  { %18 = vsyncpa [#allocation6], 0 }
   0x7   :  { %20 = vsyncpa [#allocation6 + $0x1], 0 }
   0x8   :  { %21 = vsyncpa [#allocation9], 0 }
   0x9   :  { %22 = vsyncpa [#allocation12], 0 }
   0xa   :  { %23 = vsyncpa [#allocation7], 0 }
   0xb   :  { %25 = vsyncpa [#allocation7 + $0x1], 0  ;;  %s3641_s25 = smov 0   ;;  %s3643_s26 = smov 0  }
   0xc   :  { %s3645_s27 = smov 0   ;;  %s3647_s28 = smov 0  }
   0xd LB: > { %4055 = sst [smem:[#allocation19_spill]] %s3546_s25  ;;  %s3662_s29 = sadd.s32 4294967295, %s3558_s28   ;;  %s3558_s28 = sphi %s3647_s28, %s4083_s28   ;;  %s3554_s27 = sphi %s3645_s27, %s4082_s27   ;;  %s3550_s26 = sphi %s3643_s26, %s4081_s26   ;;  %s3546_s25 = sphi %s3641_s25, %s4080_s25  }
   0xe   : > { %s2166_s30 = sadd.s32 4294967294, %s3558_s28   ;;  %p51_p0 = scmp.ne.s32.totalorder %s3550_s26, %s3546_s25 }
   0xf   : > { %p4047_p1 = scmp.eq.s32.totalorder %s3662_s29, 0  ;;  %p333_p3 = scmp.eq.s32.totalorder %s2166_s30, 1 }
  0x10   : > { %p2167_p5 = scmp.ge.s32.totalorder %s3558_s28, 1  ;;  %p340_p7 = scmp.lt.s32.totalorder %s3558_s28, 3 }
  0x11   : > { %p3671_p4 = por %p4047_p1, %p51_p0  ;;  %p3676_p6 = por %p333_p3, %p51_p0 }
  0x12   : > { %p3681_p8 = pnand %p2167_p5, %p340_p7  ;;  %s3560_s17 = smov [#allocation8]  }
  0x13   : > { %s4056_s14 = scalar_select %p3671_p4, 1, 0 }
  0x14   : > { %s4057_s15 = scalar_select %p3676_p6, 1, 0 }
  0x15   : > { %s4059_s16 = scalar_select %p3681_p8, 1, 0 }
  0x16   : > { %4058 = sst [smem:[#allocation20_spill]] %s4057_s15  ;;  %s352_s18 = sshll.u32 %s3560_s17, 4  ;;  %s3685_s18 = int_to_ptr.vmem [resolvable:$true] %s352_s18 }
  0x17   : > { %p3270_p9 = pneg %p3681_p8  ;;  %s3561_s20 = smov [#allocation11]  }
  0x18   : > { %s390_s21 = sshll.u32 %s3561_s20, 4  ;;  %s3562_s22 = smov [#allocation10]   ;;  %s3696_s21 = int_to_ptr.vmem [resolvable:$true] %s390_s21 }
  0x19   : > { %p3692_p11 = pnand %p3270_p9, %p4047_p1  ;;  %s3698_s23 = sshll.u32 %s3562_s22, 4  ;;  %s372_s23 = int_to_ptr.vmem [resolvable:$true] %s3698_s23 }
  0x1a   : > { %s3342_s17 = scalar_lea.hbm %s4031_s1, 6144 }
  0x1b   : > { %p3343_p12 = scmp.ne.s32.totalorder %s4031_s1, %s3342_s17  ;;  %p3708_p13 = pneg %p3692_p11 }
  0x1c   : > { %p3349_p5 = scmp.lt.u32.totalorder %s3342_s17, %s4031_s1 }
  0x1d   : > { %p3345_p0 = pnand %p3708_p13, %p3343_p12 }
  0x1f   : > { %p3346_p3 = pneg %p3345_p0 }
  0x21   : > { %p3351_p7 = pnand %p3349_p5, %p3346_p3 }
  0x23   : > { %3354 = shalt.err (!%p3351_p7)
}
  0x24   : > { %s3355_s25 = scalar_lea.vmem %s3685_s18, 6144  ;;  %p3363_p2 = scmp.lt.s32.totalorder %s3685_s18, %s3685_s18 }
  0x25   : > { %p3356_p9 = scmp.ne.s32.totalorder %s3685_s18, %s3355_s25  ;;  %p3364_p6 = scmp.lt.s32.totalorder %s3355_s25, %s3355_s25 }
  0x27   : > { %p3358_p10 = pnand %p3356_p9, %p3708_p13  ;;  %p3365_p12 = por %p3364_p6, %p3363_p2 }
  0x29   : > { %p3359_p1 = pneg %p3358_p10 }
  0x2b   : > { %p3366_p0 = pnand %p3365_p12, %p3359_p1 }
  0x2d   : > { %3369 = shalt.err (!%p3366_p0)
}
  0x2e   : > { %s3563_s15 = smov 128   ;;  %s3564_s24 = smov 8  }
  0x2f   : > { %3273 = dma.hbm_to_vmem [thread:$0]  (!%p3692_p11), %s4031_s1, 6144, %s3685_s18, [#allocation9], %s3563_s15, %s3563_s15, %s3564_s24  }
  0x30   : > { %s3370_s25 = scalar_lea.hbm %s4037_s7, 6144 }
  0x31   : > { %p3371_p1 = scmp.ne.s32.totalorder %s4037_s7, %s3370_s25  ;;  %p3377_p10 = scmp.lt.u32.totalorder %s3370_s25, %s4037_s7 }
  0x33   : > { %p3373_p2 = pnand %p3371_p1, %p3708_p13 }
  0x35   : > { %p3374_p6 = pneg %p3373_p2 }
  0x37   : > { %p3379_p3 = pnand %p3377_p10, %p3374_p6 }
  0x39   : > { %3382 = shalt.err (!%p3379_p3)
}
  0x3a   : > { %s3383_s18 = scalar_lea.vmem %s3696_s21, 6144  ;;  %p3391_p12 = scmp.lt.s32.totalorder %s3696_s21, %s3696_s21 }
  0x3b   : > { %p3384_p5 = scmp.ne.s32.totalorder %s3696_s21, %s3383_s18  ;;  %p3392_p0 = scmp.lt.s32.totalorder %s3383_s18, %s3383_s18 }
  0x3d   : > { %p3386_p7 = pnand %p3384_p5, %p3708_p13  ;;  %p3393_p1 = por %p3392_p0, %p3391_p12 }
  0x3f   : > { %p3387_p9 = pneg %p3386_p7 }
  0x41   : > { %p3394_p2 = pnand %p3393_p1, %p3387_p9 }
  0x43   : > { %3397 = shalt.err (!%p3394_p2)
}
  0x44   : > { %3279 = dma.hbm_to_vmem [thread:$0]  (!%p3692_p11), %s4037_s7, 6144, %s3696_s21, [#allocation12], %s3563_s15, %s3563_s15, %s3564_s24  }
  0x45   : > { %s3398_s30 = scalar_lea.hbm %s4034_s4, 6144 }
  0x46   : > { %p3399_p6 = scmp.ne.s32.totalorder %s4034_s4, %s3398_s30  ;;  %p3405_p5 = scmp.lt.u32.totalorder %s3398_s30, %s4034_s4 }
  0x48   : > { %p3401_p10 = pnand %p3399_p6, %p3708_p13 }
  0x4a   : > { %p3402_p3 = pneg %p3401_p10 }
  0x4c   : > { %p3407_p7 = pnand %p3405_p5, %p3402_p3 }
  0x4e   : > { %3410 = shalt.err (!%p3407_p7)
}
  0x4f   : > { %s3411_s18 = scalar_lea.vmem %s372_s23, 6144  ;;  %p3419_p1 = scmp.lt.s32.totalorder %s372_s23, %s372_s23 }
  0x50   : > { %p3412_p9 = scmp.ne.s32.totalorder %s372_s23, %s3411_s18  ;;  %p3420_p2 = scmp.lt.s32.totalorder %s3411_s18, %s3411_s18 }
  0x52   : > { %p3414_p12 = pnand %p3412_p9, %p3708_p13  ;;  %p3421_p4 = por %p3420_p2, %p3419_p1 }
  0x54   : > { %p3415_p0 = pneg %p3414_p12 }
  0x56   : > { %p3422_p8 = pnand %p3421_p4, %p3415_p0 }
  0x58   : > { %3425 = shalt.err (!%p3422_p8)
}
  0x59   : > { %3276 = dma.hbm_to_vmem [thread:$0]  (!%p3692_p11), %s4034_s4, 6144, %s372_s23, [#allocation9], %s3563_s15, %s3563_s15, %s3564_s24  }
  0x5a   : > { %s3565_s9 = smov [#allocation13]   ;;  %s3426_s17 = scalar_lea.hbm %s4040_s10, 2048 }
  0x5b   : > { %s409_s11 = sshll.u32 %s3565_s9, 4  ;;  %p3427_p4 = scmp.ne.s32.totalorder %s4040_s10, %s3426_s17  ;;  %s410_s11 = int_to_ptr.vmem [resolvable:$true] %s409_s11 }
  0x5c   : > { %p3433_p10 = scmp.lt.u32.totalorder %s3426_s17, %s4040_s10 }
  0x5d   : > { %p3429_p8 = pnand %p3427_p4, %p3708_p13 }
  0x5f   : > { %p3430_p6 = pneg %p3429_p8 }
  0x61   : > { %p3435_p3 = pnand %p3433_p10, %p3430_p6 }
  0x63   : > { %3438 = shalt.err (!%p3435_p3)
}
  0x64   : > { %s3439_s23 = scalar_lea.vmem %s410_s11, 2048  ;;  %p3447_p12 = scmp.lt.s32.totalorder %s410_s11, %s410_s11 }
  0x65   : > { %p3440_p5 = scmp.ne.s32.totalorder %s410_s11, %s3439_s23  ;;  %p3448_p0 = scmp.lt.s32.totalorder %s3439_s23, %s3439_s23 }
  0x67   : > { %p3442_p7 = pnand %p3440_p5, %p3708_p13  ;;  %p3449_p1 = por %p3448_p0, %p3447_p12 }
  0x69   : > { %p3443_p9 = pneg %p3442_p7 }
  0x6b   : > { %p3450_p2 = pnand %p3449_p1, %p3443_p9 }
  0x6d   : > { %3453 = shalt.err (!%p3450_p2)
}
  0x6e   : > { %3282 = dma.hbm_to_vmem [thread:$0]  (!%p3692_p11), %s4040_s10, 2048, %s410_s11, [#allocation12], %s3563_s15, %s3563_s15, %s3564_s24  }
  0x6f   : > { %s3802_s13 = sadd.s32 1, %s3558_s28   ;;  %s38_s19 = sadd.s32 1, %s3554_s27 }
  0x70   : > { %s35_s9 = ssub.s32 %s3558_s28, %s3802_s13  ;;  %p45_p13 = scmp.ne.s32.totalorder %s3554_s27, %s3550_s26 }
  0x71   : > { %p36_p4 = scmp.eq.s32.totalorder %s35_s9, 0  ;;  %p46_p8 = scmp.eq.s32.totalorder %s3558_s28, 0 }
  0x72   : > { %p4062_p6 = scmp.eq.s32.totalorder %s3662_s29, 1  ;;  %p3295_p3 = scmp.lt.s32.totalorder %s3558_s28, 2 }
  0x73   : > { %s3818_s30 = scalar_select %p36_p4, %s3554_s27, %s38_s19  }
  0x74   : > { %p3812_p10 = por %p4062_p6, %p45_p13  ;;  %p47_p5 = por %p46_p8, %p45_p13 }
  0x75   : > { %s429_s17 = sand.u32 1, %s3554_s27   ;;  %s2199_s11 = sshll.u32 %s3558_s28, 10 }
  0x76   : > { %s2173_s20 = sshll.u32 %s429_s17, 6  ;;  %s3825_s18 = scalar_lea.hbm %s4030_s0, %s2199_s11 }
  0x77   : > { %s433_s23 = scalar_lea.vmem [#allocation5], %s2173_s20  ;;  %p3829_p11 = pnand %p3295_p3, %p47_p5 }
  0x78   : > { %s441_s21 = sshll.u32 %s433_s23, 4  ;;  %s3833_s19 = scalar_lea.sflag [#allocation6], %s429_s17  ;;  %s3827_s21 = int_to_ptr.vmem [resolvable:$true] %s441_s21 }
  0x79   : > { %s3454_s9 = scalar_lea.hbm %s3825_s18, 1024  ;;  %p3456_p9 = pneg %p3829_p11 }
  0x7a   : > { %p3455_p7 = scmp.ne.s32.totalorder %s3825_s18, %s3454_s9  ;;  %s3459_s22 = scalar_lea.hbm %s4030_s0, 2048 }
  0x7b   : > { %p3460_p1 = scmp.lt.u32.totalorder %s3825_s18, %s4030_s0  ;;  %p3461_p2 = scmp.lt.u32.totalorder %s3459_s22, %s3454_s9 }
  0x7c   : > { %p3457_p12 = pnand %p3456_p9, %p3455_p7  ;;  %p3463_p4 = scmp.lt.u32.totalorder %s3454_s9, %s3825_s18 }
  0x7d   : > { %p3462_p13 = por %p3461_p2, %p3460_p1 }
  0x7e   : > { %p3458_p0 = pneg %p3457_p12 }
  0x7f   : > { %p3464_p8 = por %p3463_p4, %p3462_p13 }
  0x81   : > { %p3465_p6 = pnand %p3464_p8, %p3458_p0 }
  0x83   : > { %3468 = shalt.err (!%p3465_p6)
}
  0x84   : > { %s3469_s17 = scalar_lea.vmem %s3827_s21, 1024  ;;  %s3566_s20 = smov [#allocation5]  }
  0x85   : > { %p3470_p3 = scmp.ne.s32.totalorder %s3827_s21, %s3469_s17  ;;  %s3474_s11 = sshll.u32 %s3566_s20, 4  ;;  %s3475_s11 = int_to_ptr.vmem [resolvable:$false] %s3474_s11 }
  0x86   : > { %s3476_s25 = scalar_lea.vmem %s3475_s11, 2048  ;;  %p3477_p12 = scmp.lt.s32.totalorder %s3827_s21, %s3475_s11 }
  0x87   : > { %p3472_p5 = pnand %p3470_p3, %p3456_p9  ;;  %p3478_p1 = scmp.lt.s32.totalorder %s3476_s25, %s3469_s17 }
  0x89   : > { %p3473_p7 = pneg %p3472_p5  ;;  %p3479_p2 = por %p3478_p1, %p3477_p12 }
  0x8b   : > { %p3480_p13 = pnand %p3479_p2, %p3473_p7 }
  0x8d   : > { %3483 = shalt.err (!%p3480_p13)
}
  0x8e   : > { %3286 = dma.hbm_to_vmem [thread:$0]  (!%p3829_p11), %s3825_s18, 1024, %s3827_s21, %s3833_s19, %s3563_s15, %s3563_s15, %s3564_s24  }
  0x8f   : > { %p4065_p9 = scmp.ne.s32.totalorder %s4059_s16, 0 }
  0x90   : > { %s3867_s9 = sand.u32 (!%p4065_p9), 1, %s3550_s26   ;;  %p4066_p0 = scmp.ne.s32.totalorder (!%p4065_p9), %s4056_s14, 0 }
  0x91   : > { %453 = sbr.rel (%p4065_p9) target bundleno = 1043 (0x413), region = 72  ;;  %s2178_s22 = sshll.u32 (!%p4065_p9), %s3867_s9, 6 }
  0x92   : > { %s456_s23 = scalar_lea.sflag (!%p4065_p9), [#allocation6], %s3867_s9  ;;  %s3873_s8 = scalar_lea.vmem (!%p4065_p9), [#allocation5], %s2178_s22 }
  0x98   : > { %3529 = dma.done.wait (%p4066_p0), %s456_s23, 1024  }
  0x99   : > { %3531 = vsyncadd (%p4066_p0), %s456_s23, 4294966272  ;;  %p4067_p11 = scmp.eq.s32.totalorder %s3662_s29, 0 }
  0x9b   : > { %3533 = dma.done.wait (%p4067_p11), [#allocation9], 12288   ;;  %p4068_p4 = pmov %p4067_p11 }
  0x9d   : > { %3535 = vsyncadd (%p4068_p4), [#allocation9], 4294955008  ;;  %p4069_p8 = pmov %p4068_p4 }
  0x9e   : > { %p4070_p6 = pmov %p4068_p4 }
  0x9f   : > { %3537 = dma.done.wait (%p4069_p8), [#allocation12], 8192  }
  0xa0   : > { %3539 = vsyncadd (%p4070_p6), [#allocation12], 4294959104  ;;  %v3567_v0 = vmov 0.0   ;;  %v552_v1 = vld [vmem:[#allocation8] sm:$0xff]  ;;  %v553_v2 = vld [vmem:[#allocation8 + $0x8] sm:$0xff]  ;;  %s4071_s25 = sld [smem:[#allocation23_spill]] }
  0xa1   : > { %520 = vst [vmem:[#allocation2] sm:$0x1] %v3567_v0  ;;  %521 = vst [vmem:[#allocation2 + $0x18] sm:$0x1] %v3567_v0  ;;  %v554_v3 = vld [vmem:[#allocation8 + $0x10] sm:$0xff]  ;;  %v2914_v4 = vpack.c.bf16 %v553_v2, %v552_v1  ;;  %v555_v5 = vld [vmem:[#allocation8 + $0x18] sm:$0xff] }
  0xa2   : > { %522 = vst [vmem:[#allocation2 + $0x30] sm:$0x1] %v3567_v0  ;;  %523 = vst [vmem:[#allocation2 + $0x48] sm:$0x1] %v3567_v0  ;;  %v2918_v6 = vpack.c.bf16 %v555_v5, %v554_v3  ;;  %v556_v7 = vld [vmem:[#allocation8 + $0x20] sm:$0xff]  ;;  %v557_v8 = vld [vmem:[#allocation8 + $0x28] sm:$0xff] }
  0xa3   : > { %524 = vst [vmem:[#allocation2 + $0x11] sm:$0x1] %v3567_v0  ;;  %525 = vst [vmem:[#allocation2 + $0x29] sm:$0x1] %v3567_v0  ;;  %2915 = vmatprep.subr.bf16.mxu0 %v2914_v4  ;;  %v2922_v9 = vpack.c.bf16 %v557_v8, %v556_v7  ;;  %v577_v10 = vld [vmem:[#allocation8 + $0x80] sm:$0xff]  ;;  %v578_v11 = vld [vmem:[#allocation8 + $0x88] sm:$0xff] }
  0xa4   : > { %526 = vst [vmem:[#allocation2 + $0x41] sm:$0x1] %v3567_v0  ;;  %527 = vst [vmem:[#allocation2 + $0x59] sm:$0x1] %v3567_v0  ;;  %2917 = vmatpush3.bf16.msra.mxu0 %v2914_v4  ;;  %v558_v12 = vld [vmem:[#allocation8 + $0x30] sm:$0xff]  ;;  %v559_v13 = vld [vmem:[#allocation8 + $0x38] sm:$0xff]  ;;  %v2882_v14 = vpack.c.bf16 %v578_v11, %v577_v10 }
  0xa5   : > { %979 = vst [vmem:[#allocation3] sm:$0x1] %v3567_v0  ;;  %980 = vst [vmem:[#allocation3 + $0x18] sm:$0x1] %v3567_v0  ;;  %2919 = vmatprep.subr.bf16.mxu0 %v2918_v6  ;;  %v3888_v15 = vld [vmem:[%s3873_s8] sm:$0xff]  ;;  %v3892_v16 = vld [vmem:[%s3873_s8 + $0x8] sm:$0xff]  ;;  %v2926_v21 = vpack.c.bf16 %v559_v13, %v558_v12 }
  0xa6   : > { %981 = vst [vmem:[#allocation3 + $0x30] sm:$0x1] %v3567_v0  ;;  %982 = vst [vmem:[#allocation3 + $0x48] sm:$0x1] %v3567_v0  ;;  %v579_v17 = vld [vmem:[#allocation8 + $0x90] sm:$0xff]  ;;  %v580_v18 = vld [vmem:[#allocation8 + $0x98] sm:$0xff]  ;;  %2474 = vmatprep.mubr.f32.mxu1 %v3888_v15  ;;  %2883 = vmatprep.subr.bf16.mxu1 %v2882_v14 }
  0xa7   : > { %983 = vst [vmem:[#allocation3 + $0x11] sm:$0x1] %v3567_v0  ;;  %984 = vst [vmem:[#allocation3 + $0x29] sm:$0x1] %v3567_v0  ;;  %v2886_v19 = vpack.c.bf16 %v580_v18, %v579_v17  ;;  %v581_v20 = vld [vmem:[#allocation8 + $0xa0] sm:$0xff]  ;;  %2885 = vmatpush3.bf16.msra.mxu1 %v2882_v14  ;;  %v582_v22 = vld [vmem:[#allocation8 + $0xa8] sm:$0xff] }
  0xa8   : > { %985 = vst [vmem:[#allocation3 + $0x41] sm:$0x1] %v3567_v0  ;;  %986 = vst [vmem:[#allocation3 + $0x59] sm:$0x1] %v3567_v0  ;;  %2921 = vmatpush3.bf16.msra.mxu0 %v2918_v6  ;;  %v560_v23 = vld [vmem:[#allocation8 + $0x40] sm:$0xff]  ;;  %v561_v24 = vld [vmem:[#allocation8 + $0x48] sm:$0xff]  ;;  %v2890_v25 = vpack.c.bf16 %v582_v22, %v581_v20 }
  0xa9   : > { %1422 = vst [vmem:[#allocation4] sm:$0x1] %v3567_v0  ;;  %1423 = vst [vmem:[#allocation4 + $0x18] sm:$0x1] %v3567_v0  ;;  %2923 = vmatprep.subr.bf16.mxu0 %v2922_v9  ;;  %2887 = vmatprep.subr.bf16.mxu1 %v2886_v19  ;;  %v583_v26 = vld [vmem:[#allocation8 + $0xb0] sm:$0xff]  ;;  %v584_v27 = vld [vmem:[#allocation8 + $0xb8] sm:$0xff]  ;;  %v2930_v28 = vpack.c.bf16 %v561_v24, %v560_v23 }
  0xaa   : > { %1424 = vst [vmem:[#allocation4 + $0x30] sm:$0x1] %v3567_v0  ;;  %1425 = vst [vmem:[#allocation4 + $0x48] sm:$0x1] %v3567_v0  ;;  %v3897_v29 = vld [vmem:[%s3873_s8 + $0x10] sm:$0xff]  ;;  %v3900_v30 = vld [vmem:[%s3873_s8 + $0x18] sm:$0xff]  ;;  %v2894_v34 = vpack.c.bf16 %v584_v27, %v583_v26 }
  0xab   : > { %1426 = vst [vmem:[#allocation4 + $0x11] sm:$0x1] %v3567_v0  ;;  %1427 = vst [vmem:[#allocation4 + $0x29] sm:$0x1] %v3567_v0  ;;  %2889 = vmatpush3.bf16.msra.mxu1 %v2886_v19  ;;  %v562_v31 = vld [vmem:[#allocation8 + $0x50] sm:$0xff]  ;;  %v563_v32 = vld [vmem:[#allocation8 + $0x58] sm:$0xff] }
  0xac   : > { %1428 = vst [vmem:[#allocation4 + $0x41] sm:$0x1] %v3567_v0  ;;  %1429 = vst [vmem:[#allocation4 + $0x59] sm:$0x1] %v3567_v0  ;;  %2925 = vmatpush3.bf16.msra.mxu0 %v2922_v9  ;;  %2891 = vmatprep.subr.bf16.mxu1 %v2890_v25  ;;  %v585_v35 = vld [vmem:[#allocation8 + $0xc0] sm:$0xff]  ;;  %v586_v36 = vld [vmem:[#allocation8 + $0xc8] sm:$0xff]  ;;  %v2934_v39 = vpack.c.bf16 %v563_v32, %v562_v31 }
  0xad   : > { %536 = vst [vmem:[#allocation2 + $0x1] sm:$0xff] %v3888_v15  ;;  %537 = vst [vmem:[#allocation2 + $0x9] sm:$0xff] %v3892_v16  ;;  %2927 = vmatprep.subr.bf16.mxu0 %v2926_v21  ;;  %v3905_v37 = vld [vmem:[%s3873_s8 + $0x20] sm:$0xff]  ;;  %v3908_v38 = vld [vmem:[%s3873_s8 + $0x28] sm:$0xff]  ;;  %v2898_v42 = vpack.c.bf16 %v586_v36, %v585_v35  ;;  %s4072_s14 = sld [smem:[#allocation24_spill]]  ;;  %s4073_s24 = sld [smem:[#allocation21_spill]] }
  0xae   : > { %538 = vst [vmem:[#allocation2 + $0x19] sm:$0xff] %v3897_v29  ;;  %539 = vst [vmem:[#allocation2 + $0x21] sm:$0xff] %v3900_v30  ;;  %v564_v40 = vld [vmem:[#allocation8 + $0x60] sm:$0xff]  ;;  %v565_v41 = vld [vmem:[#allocation8 + $0x68] sm:$0xff]  ;;  %s4074_s19 = sld [smem:[#allocation22_spill]]  ;;  %s3969_s17 = scalar_lea.vmem [#allocation14], %s2178_s22 }
  0xaf   : > { %2893 = vmatpush3.bf16.msra.mxu1 %v2890_v25  ;;  %540 = vst [vmem:[#allocation2 + $0x31] sm:$0xff] %v3905_v37  ;;  %541 = vst [vmem:[#allocation2 + $0x39] sm:$0xff] %v3908_v38  ;;  %v3913_v43 = vld [vmem:[%s3873_s8 + $0x30] sm:$0xff]  ;;  %v3916_v44 = vld [vmem:[%s3873_s8 + $0x38] sm:$0xff]  ;;  %v2938_v47 = vpack.c.bf16 %v565_v41, %v564_v40  ;;  %s2201_s22 = sshll.u32 %s3662_s29, 10  ;;  %s2055_s20 = sshll.u32 %s3969_s17, 4  ;;  %s3984_s20 = int_to_ptr.vmem [resolvable:$true] %s2055_s20 }
  0xb0   : > { %2929 = vmatpush3.bf16.msra.mxu0 %v2926_v21  ;;  %2895 = vmatprep.subr.bf16.mxu1 %v2894_v34  ;;  %v587_v45 = vld [vmem:[#allocation8 + $0xd0] sm:$0xff]  ;;  %v588_v46 = vld [vmem:[#allocation8 + $0xd8] sm:$0xff]  ;;  %542 = vst [vmem:[#allocation2 + $0x49] sm:$0xff] %v3913_v43  ;;  %543 = vst [vmem:[#allocation2 + $0x51] sm:$0xff] %v3916_v44  ;;  %s4075_s23 = sld [smem:[#allocation25_spill]]  ;;  %s2041_s29 = scalar_lea.sflag [#allocation7], %s3867_s9 }
  0xb1   : > { %2931 = vmatprep.subr.bf16.mxu0 %v2930_v28  ;;  %v566_v48 = vld [vmem:[#allocation8 + $0x70] sm:$0xff]  ;;  %v567_v49 = vld [vmem:[#allocation8 + $0x78] sm:$0xff]  ;;  %v2902_v50 = vpack.c.bf16 %v588_v46, %v587_v45  ;;  %v589_v51 = vld [vmem:[#allocation8 + $0xe0] sm:$0xff]  ;;  %s3568_s16 = smov [#allocation14]  }
  0xb2   : > { %v590_v52 = vld [vmem:[#allocation8 + $0xe8] sm:$0xff]  ;;  %v2942_v53 = vpack.c.bf16 %v567_v49, %v566_v48  ;;  %v812_v54 = vld [vmem:[#allocation8 + $0x100] sm:$0xff]  ;;  %v591_v57 = vld [vmem:[#allocation8 + $0xf0] sm:$0xff]  ;;  %s3488_s15 = sshll.u32 %s3568_s16, 4  ;;  %s3489_s15 = int_to_ptr.vmem [resolvable:$false] %s3488_s15 }
  0xb3   : > { %2897 = vmatpush3.bf16.msra.mxu1 %v2894_v34  ;;  %v813_v55 = vld [vmem:[#allocation8 + $0x108] sm:$0xff]  ;;  %v2906_v56 = vpack.c.bf16 %v590_v52, %v589_v51  ;;  %v592_v58 = vld [vmem:[#allocation8 + $0xf8] sm:$0xff]  ;;  %v814_v60 = vld [vmem:[#allocation8 + $0x110] sm:$0xff]  ;;  %p3491_p12 = scmp.lt.s32.totalorder %s3984_s20, %s3489_s15 }
  0xb4   : > { %v544_v33 = vld [vmem:[#allocation2] sm:$0xff]  ;;  %2933 = vmatpush3.bf16.msra.mxu0 %v2930_v28  ;;  %2899 = vmatprep.subr.bf16.mxu1 %v2898_v42  ;;  %v2946_v59 = vpack.c.bf16 %v813_v55, %v812_v54  ;;  %v815_v61 = vld [vmem:[#allocation8 + $0x118] sm:$0xff]  ;;  %v2910_v62 = vpack.c.bf16 %v592_v58, %v591_v57  ;;  %v1029_v0 = vld [vmem:[#allocation10 + $0x88] sm:$0xff] }
  0xb5   : > { %2518 = vmatprep.mubr.f32.mxu0 %v544_v33  ;;  %2935 = vmatprep.subr.bf16.mxu0 %v2934_v39  ;;  %v1028_v63 = vld [vmem:[#allocation10 + $0x80] sm:$0xff]  ;;  %v545_v1 = vld [vmem:[#allocation2 + $0x8] sm:$0xff]  ;;  %v2950_v2 = vpack.c.bf16 %v815_v61, %v814_v60  ;;  %v546_v3 = vld [vmem:[#allocation2 + $0x18] sm:$0xff] }
  0xb6   : > { %v816_v4 = vld [vmem:[#allocation8 + $0x120] sm:$0xff]  ;;  %v817_v5 = vld [vmem:[#allocation8 + $0x128] sm:$0xff]  ;;  %v2978_v6 = vpack.c.bf16 %v1029_v0, %v1028_v63  ;;  %v1030_v8 = vld [vmem:[#allocation10 + $0x90] sm:$0xff]  ;;  %s3982_s8 = scalar_lea.hbm %s4075_s23, %s2201_s22 }
  0xb7   : > { %2901 = vmatpush3.bf16.msra.mxu1 %v2898_v42  ;;  %v547_v7 = vld [vmem:[#allocation2 + $0x20] sm:$0xff]  ;;  %v1031_v9 = vld [vmem:[#allocation10 + $0x98] sm:$0xff]  ;;  %v2954_v10 = vpack.c.bf16 %v817_v5, %v816_v4  ;;  %v548_v11 = vld [vmem:[#allocation2 + $0x30] sm:$0xff] }
  0xb8   : > { %2937 = vmatpush3.bf16.msra.mxu0 %v2934_v39  ;;  %2903 = vmatprep.subr.bf16.mxu1 %v2902_v50  ;;  %v818_v12 = vld [vmem:[#allocation8 + $0x130] sm:$0xff]  ;;  %v819_v13 = vld [vmem:[#allocation8 + $0x138] sm:$0xff]  ;;  %v2982_v14 = vpack.c.bf16 %v1031_v9, %v1030_v8  ;;  %v1032_v18 = vld [vmem:[#allocation10 + $0xa0] sm:$0xff] }
  0xb9   : > { %2939 = vmatprep.subr.bf16.mxu0 %v2938_v47  ;;  %v549_v17 = vld [vmem:[#allocation2 + $0x38] sm:$0xff]  ;;  %v1033_v19 = vld [vmem:[#allocation10 + $0xa8] sm:$0xff]  ;;  %v2958_v20 = vpack.c.bf16 %v819_v13, %v818_v12  ;;  %v820_v22 = vld [vmem:[#allocation8 + $0x140] sm:$0xff] }
  0xba   : > { %v550_v21 = vld [vmem:[#allocation2 + $0x48] sm:$0xff]  ;;  %v2986_v24 = vpack.c.bf16 %v1033_v19, %v1032_v18  ;;  %v551_v25 = vld [vmem:[#allocation2 + $0x50] sm:$0xff]  ;;  %v1035_v27 = vld [vmem:[#allocation10 + $0xb8] sm:$0xff] }
  0xbb   : > { %2905 = vmatpush3.bf16.msra.mxu1 %v2902_v50  ;;  %v821_v23 = vld [vmem:[#allocation8 + $0x148] sm:$0xff]  ;;  %v1034_v26 = vld [vmem:[#allocation10 + $0xb0] sm:$0xff]  ;;  %v823_v33 = vld [vmem:[#allocation8 + $0x158] sm:$0xff] }
  0xbc   : > { %2941 = vmatpush3.bf16.msra.mxu0 %v2938_v47  ;;  %2907 = vmatprep.subr.bf16.mxu1 %v2906_v56  ;;  %v2962_v28 = vpack.c.bf16 %v821_v23, %v820_v22  ;;  %v803_v31 = vld [vmem:[#allocation2 + $0x2] sm:$0xff]  ;;  %v822_v32 = vld [vmem:[#allocation8 + $0x150] sm:$0xff]  ;;  %v2990_v34 = vpack.c.bf16 %v1035_v27, %v1034_v26  ;;  %v827_v42 = vld [vmem:[#allocation8 + $0x178] sm:$0xff] }
  0xbd   : > { %2943 = vmatprep.subr.bf16.mxu0 %v2942_v53  ;;  %v2966_v35 = vpack.c.bf16 %v823_v33, %v822_v32  ;;  %v824_v36 = vld [vmem:[#allocation8 + $0x160] sm:$0xff]  ;;  %v825_v39 = vld [vmem:[#allocation8 + $0x168] sm:$0xff]  ;;  %v826_v41 = vld [vmem:[#allocation8 + $0x170] sm:$0xff] }
  0xbe   : > { %v2970_v40 = vpack.c.bf16 %v825_v39, %v824_v36  ;;  %v2974_v45 = vpack.c.bf16 %v827_v42, %v826_v41  ;;  %v804_v46 = vld [vmem:[#allocation2 + $0xa] sm:$0xff]  ;;  %v805_v47 = vld [vmem:[#allocation2 + $0x1a] sm:$0xff]  ;;  %v806_v48 = vld [vmem:[#allocation2 + $0x22] sm:$0xff] }
  0xbf   : > { %2909 = vmatpush3.bf16.msra.mxu1 %v2906_v56  ;;  %v807_v49 = vld [vmem:[#allocation2 + $0x32] sm:$0xff]  ;;  %v808_v50 = vld [vmem:[#allocation2 + $0x3a] sm:$0xff]  ;;  %v809_v51 = vld [vmem:[#allocation2 + $0x4a] sm:$0xff] }
  0xc0   : > { %2945 = vmatpush3.bf16.msra.mxu0 %v2942_v53  ;;  %2911 = vmatprep.subr.bf16.mxu1 %v2910_v62  ;;  %v810_v52 = vld [vmem:[#allocation2 + $0x52] sm:$0xff]  ;;  %v1036_v53 = vld [vmem:[#allocation10 + $0xc0] sm:$0xff]  ;;  %v1037_v54 = vld [vmem:[#allocation10 + $0xc8] sm:$0xff] }
  0xc1   : > { %2947 = vmatprep.subr.bf16.mxu0 %v2946_v59  ;;  %v2994_v55 = vpack.c.bf16 %v1037_v54, %v1036_v53  ;;  %v1038_v56 = vld [vmem:[#allocation10 + $0xd0] sm:$0xff]  ;;  %v1039_v57 = vld [vmem:[#allocation10 + $0xd8] sm:$0xff]  ;;  %v1041_v60 = vld [vmem:[#allocation10 + $0xe8] sm:$0xff] }
  0xc2   : > { %v2998_v58 = vpack.c.bf16 %v1039_v57, %v1038_v56  ;;  %v1043_v63 = vld [vmem:[#allocation10 + $0xf8] sm:$0xff]  ;;  %v1471_v4 = vld [vmem:[#allocation11 + $0x80] sm:$0xff]  ;;  %v1472_v5 = vld [vmem:[#allocation11 + $0x88] sm:$0xff] }
  0xc3   : > { %2519 = vmatmul.mubr.f32.vlgmr.msra.gmra.mrb[0].mxu0 %v545_v1  ;;  %2913 = vmatpush3.bf16.msra.mxu1 %v2910_v62  ;;  %v1042_v62 = vld [vmem:[#allocation10 + $0xf0] sm:$0xff]  ;;  %v1003_v1 = vld [vmem:[#allocation10] sm:$0xff]  ;;  %v1474_v8 = vld [vmem:[#allocation11 + $0x98] sm:$0xff] }
  0xc4   : > { %2949 = vmatpush3.bf16.msra.mxu0 %v2946_v59  ;;  %2521 = vmatprep.mubr.f32.mxu0 %v546_v3  ;;  %v1040_v59 = vld [vmem:[#allocation10 + $0xe0] sm:$0xff]  ;;  %v3006_v0 = vpack.c.bf16 %v1043_v63, %v1042_v62  ;;  %v1477_v13 = vld [vmem:[#allocation11 + $0xb0] sm:$0xff]  ;;  %v1480_v19 = vld [vmem:[#allocation11 + $0xc8] sm:$0xff] }
  0xc5   : > { %2951 = vmatprep.subr.bf16.mxu0 %v2950_v2  ;;  %2979 = vmatprep.subr.bf16.mxu1 %v2978_v6  ;;  %v3002_v61 = vpack.c.bf16 %v1041_v60, %v1040_v59  ;;  %v1479_v18 = vld [vmem:[#allocation11 + $0xc0] sm:$0xff]  ;;  %v1008_v63 = vld [vmem:[#allocation10 + $0x28] sm:$0xff] }
  0xc6   : > { %2475 = vmatmul.mubr.f32.vlgmr.msra.gmra.mrb[0].mxu1 %v3892_v16  ;;  %v2184_v32 = vld [vmem:[%s4032_s2] ss:$0 sm:$0xff] }
  0xc7   : > { %2522 = vmatmul.mubr.f32.gmra.mrb[2].mxu0 %v547_v7  ;;  %2477 = vmatprep.mubr.f32.mxu1 %v3897_v29  ;;  %v3074_v7 = vpack.c.bf16 %v1472_v5, %v1471_v4  ;;  %v1007_v62 = vld [vmem:[#allocation10 + $0x20] sm:$0xff] }
  0xc8   : > { %2953 = vmatpush3.bf16.msra.mxu0 %v2950_v2  ;;  %2524 = vmatprep.mubr.f32.mxu0 %v548_v11  ;;  %v1004_v2 = vld [vmem:[#allocation10 + $0x8] sm:$0xff] }
  0xc9   : > { %2955 = vmatprep.subr.bf16.mxu0 %v2954_v10  ;;  %2981 = vmatpush3.bf16.msra.mxu1 %v2978_v6  ;;  %v3927_v3 = vpack.c.bf16 %v1004_v2, %v1003_v1  ;;  %v1473_v6 = vld [vmem:[#allocation11 + $0x90] sm:$0xff]  ;;  %v1476_v11 = vld [vmem:[#allocation11 + $0xa8] sm:$0xff] }
  0xca   : > { %2983 = vmatprep.subr.bf16.mxu1 %v2982_v14  ;;  %2478 = vmatmul.mubr.f32.gmra.mrb[2].mxu1 %v3900_v30  ;;  %v3078_v9 = vpack.c.bf16 %v1474_v8, %v1473_v6 }
  0xcb   : > { %2525 = vmatmul.mubr.f32.gmra.mrb[4].mxu0 %v549_v17  ;;  %2480 = vmatprep.mubr.f32.mxu1 %v3905_v37 }
  0xcc   : > { %2957 = vmatpush3.bf16.msra.mxu0 %v2954_v10  ;;  %2527 = vmatprep.mubr.f32.mxu0 %v550_v21  ;;  %v1475_v10 = vld [vmem:[#allocation11 + $0xa0] sm:$0xff] }
  0xcd   : > { %2959 = vmatprep.subr.bf16.mxu0 %v2958_v20  ;;  %2985 = vmatpush3.bf16.msra.mxu1 %v2982_v14  ;;  %v3082_v12 = vpack.c.bf16 %v1476_v11, %v1475_v10  ;;  %v1478_v14 = vld [vmem:[#allocation11 + $0xb8] sm:$0xff] }
  0xce   : > { %2987 = vmatprep.subr.bf16.mxu1 %v2986_v24  ;;  %2481 = vmatmul.mubr.f32.gmra.mrb[4].mxu1 %v3908_v38  ;;  %v3086_v17 = vpack.c.bf16 %v1478_v14, %v1477_v13  ;;  %v1010_v13 = vld [vmem:[#allocation10 + $0x38] sm:$0xff] }
  0xcf   : > { %2528 = vmatmul.mubr.f32.gmra.mrb[6].mxu0 %v551_v25  ;;  %2483 = vmatprep.mubr.f32.mxu1 %v3913_v43 }
  0xd0   : > { %2961 = vmatpush3.bf16.msra.mxu0 %v2958_v20  ;;  %2562 = vmatprep.mubr.f32.mxu0 %v803_v31  ;;  %v3090_v20 = vpack.c.bf16 %v1480_v19, %v1479_v18 }
  0xd1   : > { %2963 = vmatprep.subr.bf16.mxu0 %v2962_v28  ;;  %2989 = vmatpush3.bf16.msra.mxu1 %v2986_v24 }
  0xd2   : > { %2991 = vmatprep.subr.bf16.mxu1 %v2990_v34  ;;  %2484 = vmatmul.mubr.f32.gmra.mrb[6].mxu1 %v3916_v44 }
  0xd4   : > { %2965 = vmatpush3.bf16.msra.mxu0 %v2962_v28 }
  0xd5   : > { %2967 = vmatprep.subr.bf16.mxu0 %v2966_v35  ;;  %2993 = vmatpush3.bf16.msra.mxu1 %v2990_v34 }
  0xd6   : > { %2995 = vmatprep.subr.bf16.mxu1 %v2994_v55 }
  0xd8   : > { %2969 = vmatpush3.bf16.msra.mxu0 %v2966_v35  ;;  %v2185_v35 = vld [vmem:[%s4033_s3] ss:$0 sm:$0xff] }
  0xd9   : > { %2971 = vmatprep.subr.bf16.mxu0 %v2970_v40  ;;  %2997 = vmatpush3.bf16.msra.mxu1 %v2994_v55 }
  0xda   : > { %2999 = vmatprep.subr.bf16.mxu1 %v2998_v58 }
  0xdc   : > { %2973 = vmatpush3.bf16.msra.mxu0 %v2970_v40 }
  0xdd   : > { %2975 = vmatprep.subr.bf16.mxu0 %v2974_v45  ;;  %3001 = vmatpush3.bf16.msra.mxu1 %v2998_v58 }
  0xde   : > { %3003 = vmatprep.subr.bf16.mxu1 %v3002_v61 }
  0xe0   : > { %2977 = vmatpush3.bf16.msra.mxu0 %v2974_v45 }
  0xe1   : > { %3005 = vmatpush3.bf16.msra.mxu1 %v3002_v61  ;;  %3075 = vmatprep.subr.bf16.mxu0 %v3074_v7 }
  0xe2   : > { %3007 = vmatprep.subr.bf16.mxu1 %v3006_v0 }
  0xe3   : > { %2563 = vmatmul.mubr.f32.vlgmr.msra.gmra.mrb[0].mxu0 %v804_v46 }
  0xe4   : > { %2565 = vmatprep.mubr.f32.mxu0 %v805_v47  ;;  %3077 = vmatpush3.bf16.msra.mxu0 %v3074_v7 }
  0xe5   : > { %3009 = vmatpush3.bf16.msra.mxu1 %v3006_v0  ;;  %3079 = vmatprep.subr.bf16.mxu0 %v3078_v9 }
  0xe6   : > { %3011 = vmatprep.subr.bf16.mxu1 %v3927_v3 }
  0xe7   : > { %2566 = vmatmul.mubr.f32.gmra.mrb[2].mxu0 %v806_v48 }
  0xe8   : > { %2568 = vmatprep.mubr.f32.mxu0 %v807_v49  ;;  %3081 = vmatpush3.bf16.msra.mxu0 %v3078_v9  ;;  %v1005_v49 = vld [vmem:[#allocation10 + $0x10] sm:$0xff]  ;;  %v3018_v9 = vpack.c.bf16 %v1008_v63, %v1007_v62 }
  0xe9   : > { %3083 = vmatprep.subr.bf16.mxu0 %v3082_v12 }
  0xeb   : > { %2569 = vmatmul.mubr.f32.gmra.mrb[4].mxu0 %v808_v50  ;;  %v1006_v50 = vld [vmem:[#allocation10 + $0x18] sm:$0xff] }
  0xec   : > { %2571 = vmatprep.mubr.f32.mxu0 %v809_v51  ;;  %3085 = vmatpush3.bf16.msra.mxu0 %v3082_v12  ;;  %v3014_v59 = vpack.c.bf16 %v1006_v50, %v1005_v49  ;;  %v1009_v12 = vld [vmem:[#allocation10 + $0x30] sm:$0xff]  ;;  %v1267_v50 = vld [vmem:[#allocation10 + $0x120] sm:$0xff] }
  0xed   : > { %3087 = vmatprep.subr.bf16.mxu0 %v3086_v17 }
  0xef   : > { %2572 = vmatmul.mubr.f32.gmra.mrb[6].mxu0 %v810_v52 }
  0xf0   : > { %3089 = vmatpush3.bf16.msra.mxu0 %v3086_v17 }
  0xf1   : > { %3091 = vmatprep.subr.bf16.mxu0 %v3090_v20 }
  0xf4   : > { %3093 = vmatpush3.bf16.msra.mxu0 %v3090_v20  ;;  %v3022_v20 = vpack.c.bf16 %v1010_v13, %v1009_v12 }
 0x199   : > { %v2476_v21 = vpop.f32.mrb[0].mxu1 }
 0x19a   : > { %v659_v22 = vpop.f32.mrb[1].mxu1 }
 0x19d   : > { %v2479_v23 = vpop.f32.mrb[2].mxu1 }
 0x19e   : > { %v669_v24 = vpop.f32.mrb[3].mxu1 }
 0x1a1   : > { %v2482_v25 = vpop.f32.mrb[4].mxu1 }
 0x1a2   : > { %v679_v26 = vpop.f32.mrb[5].mxu1 }
 0x1a5   : > { %v2485_v27 = vpop.f32.mrb[6].mxu1 }
 0x1a6   : > { %v689_v28 = vpop.f32.mrb[7].mxu1 }
 0x1b6   : > { %v2564_v31 = vpop.f32.mrb[0].mxu0 }
 0x1b7   : > { %v3202_v33 = vadd.f32 %v2564_v31, %v2476_v21  ;;  %v894_v34 = vpop.f32.mrb[1].mxu0 }
 0x1b8   : > { %v3203_v36 = vadd.f32 %v894_v34, %v659_v22  ;;  %v1011_v22 = vld [vmem:[#allocation10 + $0x40] sm:$0xff]  ;;  %v1016_v34 = vld [vmem:[#allocation10 + $0x68] sm:$0xff] }
 0x1b9   : > { %v949_v39 = vmul.f32 %v3202_v33, %v2184_v32  ;;  %v1015_v33 = vld [vmem:[#allocation10 + $0x60] sm:$0xff] }
 0x1ba   : > { %v948_v40 = vmul.f32 %v3203_v36, %v2184_v32  ;;  %v2567_v41 = vpop.f32.mrb[2].mxu0  ;;  %v1017_v36 = vld [vmem:[#allocation10 + $0x70] sm:$0xff] }
 0x1bb   : > { %v964_v42 = vadd.f32 %v2185_v35, %v949_v39  ;;  %v3204_v45 = vadd.f32 %v2567_v41, %v2479_v23  ;;  %v904_v46 = vpop.f32.mrb[3].mxu0  ;;  %v1012_v23 = vld [vmem:[#allocation10 + $0x48] sm:$0xff]  ;;  %v1018_v39 = vld [vmem:[#allocation10 + $0x78] sm:$0xff]  ;;  %v1263_v41 = vld [vmem:[#allocation10 + $0x100] sm:$0xff] }
 0x1bc   : > { %v963_v47 = vadd.f32 %v2185_v35, %v948_v40  ;;  %v3205_v48 = vadd.f32 %v904_v46, %v669_v24  ;;  %v3038_v40 = vpack.c.bf16 %v1018_v39, %v1017_v36  ;;  %v1265_v46 = vld [vmem:[#allocation10 + $0x110] sm:$0xff]  ;;  %v1868_v39 = vld [vmem:[#allocation13 + $0x18] sm:$0xff] }
 0x1bd   : > { %v972_v51 = vmax.f32 %v964_v42, 0.0  ;;  %v951_v52 = vmul.f32 %v3204_v45, %v2184_v32  ;;  %v1264_v42 = vld [vmem:[#allocation10 + $0x108] sm:$0xff]  ;;  %v1867_v36 = vld [vmem:[#allocation13 + $0x10] sm:$0xff] }
 0x1be   : > { %v971_v53 = vmax.f32 %v963_v47, 0.0  ;;  %v950_v54 = vmul.f32 %v3205_v48, %v2184_v32  ;;  %v2570_v55 = vpop.f32.mrb[4].mxu0  ;;  %v3042_v45 = vpack.c.bf16 %v1264_v42, %v1263_v41  ;;  %v1266_v47 = vld [vmem:[#allocation10 + $0x118] sm:$0xff]  ;;  %v1869_v41 = vld [vmem:[#allocation13 + $0x20] sm:$0xff]  ;;  %v1870_v42 = vld [vmem:[#allocation13 + $0x28] sm:$0xff] }
 0x1bf   : > { %988 = vst [vmem:[#allocation3 + $0x9] sm:$0xff] %v972_v51  ;;  %v966_v56 = vadd.f32 %v2185_v35, %v951_v52  ;;  %v3206_v57 = vadd.f32 %v2570_v55, %v2482_v25  ;;  %v914_v58 = vpop.f32.mrb[5].mxu0  ;;  %v3046_v48 = vpack.c.bf16 %v1266_v47, %v1265_v46  ;;  %v1269_v55 = vld [vmem:[#allocation10 + $0x130] sm:$0xff]  ;;  %v1872_v47 = vld [vmem:[#allocation13 + $0x38] sm:$0xff] }
 0x1c0   : > { %987 = vst [vmem:[#allocation3 + $0x1] sm:$0xff] %v971_v53  ;;  %v965_v60 = vadd.f32 %v2185_v35, %v950_v54  ;;  %v3207_v61 = vadd.f32 %v914_v58, %v679_v26  ;;  %2606 = vmatprep.mubr.f32.mxu1 %v971_v53  ;;  %v3026_v26 = vpack.c.bf16 %v1012_v23, %v1011_v22  ;;  %v1483_v23 = vld [vmem:[#allocation11 + $0xe0] sm:$0xff]  ;;  %v1871_v46 = vld [vmem:[#allocation13 + $0x30] sm:$0xff] }
 0x1c1   : > { %v974_v0 = vmax.f32 %v966_v56, 0.0  ;;  %v953_v1 = vmul.f32 %v3206_v57, %v2184_v32  ;;  %2607 = vmatmul.mubr.f32.vlgmr.msra.gmra.mrb[8].mxu1 %v972_v51  ;;  %v1268_v51 = vld [vmem:[#allocation10 + $0x128] sm:$0xff]  ;;  %v1270_v56 = vld [vmem:[#allocation10 + $0x138] sm:$0xff] }
 0x1c2   : > { %v973_v2 = vmax.f32 %v965_v60, 0.0  ;;  %v952_v4 = vmul.f32 %v3207_v61, %v2184_v32  ;;  %v2573_v5 = vpop.f32.mrb[6].mxu0  ;;  %3013 = vmatpush3.bf16.msra.mxu1 %v3927_v3  ;;  %v3050_v53 = vpack.c.bf16 %v1268_v51, %v1267_v50  ;;  %v3054_v58 = vpack.c.bf16 %v1270_v56, %v1269_v55  ;;  %v1271_v60 = vld [vmem:[#allocation10 + $0x140] sm:$0xff]  ;;  %v1272_v61 = vld [vmem:[#allocation10 + $0x148] sm:$0xff] }
 0x1c3   : > { %990 = vst [vmem:[#allocation3 + $0x21] sm:$0xff] %v974_v0  ;;  %v968_v6 = vadd.f32 %v2185_v35, %v953_v1  ;;  %v3208_v7 = vadd.f32 %v2573_v5, %v2485_v27  ;;  %v924_v8 = vpop.f32.mrb[7].mxu0  ;;  %3015 = vmatprep.subr.bf16.mxu1 %v3014_v59  ;;  %v1013_v27 = vld [vmem:[#allocation10 + $0x50] sm:$0xff]  ;;  %v3058_v63 = vpack.c.bf16 %v1272_v61, %v1271_v60  ;;  %v1874_v50 = vld [vmem:[#allocation13 + $0x48] sm:$0xff]  ;;  %v1877_v55 = vld [vmem:[#allocation13 + $0x60] sm:$0xff] }
 0x1c4   : > { %989 = vst [vmem:[#allocation3 + $0x19] sm:$0xff] %v973_v2  ;;  %v967_v10 = vadd.f32 %v2185_v35, %v952_v4  ;;  %v3209_v11 = vadd.f32 %v924_v8, %v689_v28  ;;  %2609 = vmatprep.mubr.f32.mxu1 %v973_v2  ;;  %v1014_v28 = vld [vmem:[#allocation10 + $0x58] sm:$0xff]  ;;  %v1273_v1 = vld [vmem:[#allocation10 + $0x150] sm:$0xff]  ;;  %v1878_v56 = vld [vmem:[#allocation13 + $0x68] sm:$0xff] }
 0x1c5   : > { %v976_v14 = vmax.f32 %v968_v6, 0.0  ;;  %v955_v17 = vmul.f32 %v3208_v7, %v2184_v32  ;;  %2610 = vmatmul.mubr.f32.gmra.mrb[10].mxu1 %v974_v0  ;;  %v1274_v2 = vld [vmem:[#allocation10 + $0x158] sm:$0xff]  ;;  %v1275_v6 = vld [vmem:[#allocation10 + $0x160] sm:$0xff]  ;;  %v1276_v7 = vld [vmem:[#allocation10 + $0x168] sm:$0xff] }
 0x1c6   : > { %v975_v18 = vmax.f32 %v967_v10, 0.0  ;;  %v954_v19 = vmul.f32 %v3209_v11, %v2184_v32  ;;  %3017 = vmatpush3.bf16.msra.mxu1 %v3014_v59  ;;  %v3030_v32 = vpack.c.bf16 %v1014_v28, %v1013_v27  ;;  %v3062_v5 = vpack.c.bf16 %v1274_v2, %v1273_v1  ;;  %v1278_v10 = vld [vmem:[#allocation10 + $0x178] sm:$0xff]  ;;  %v1255_v12 = vld [vmem:[#allocation3 + $0xa] sm:$0xff]  ;;  %v2186_v61 = vld [vmem:[%s4035_s5] ss:$0 sm:$0xff] }
 0x1c7   : > { %992 = vst [vmem:[#allocation3 + $0x39] sm:$0xff] %v976_v14  ;;  %v970_v3 = vadd.f32 %v2185_v35, %v955_v17  ;;  %3019 = vmatprep.subr.bf16.mxu1 %v3018_v9  ;;  %v995_v31 = vld [vmem:[#allocation3] sm:$0xff]  ;;  %v996_v49 = vld [vmem:[#allocation3 + $0x8] sm:$0xff]  ;;  %v3066_v8 = vpack.c.bf16 %v1276_v7, %v1275_v6  ;;  %v1486_v27 = vld [vmem:[#allocation11 + $0xf8] sm:$0xff] }
 0x1c8   : > { %991 = vst [vmem:[#allocation3 + $0x31] sm:$0xff] %v975_v18  ;;  %v969_v21 = vadd.f32 %v2185_v35, %v954_v19  ;;  %2612 = vmatprep.mubr.f32.mxu1 %v975_v18  ;;  %v3034_v35 = vpack.c.bf16 %v1016_v34, %v1015_v33  ;;  %v1254_v4 = vld [vmem:[#allocation3 + $0x2] sm:$0xff] }
 0x1c9   : > { %v978_v24 = vmax.f32 %v970_v3, 0.0  ;;  %2613 = vmatmul.mubr.f32.gmra.mrb[12].mxu1 %v976_v14  ;;  %v1866_v34 = vld [vmem:[#allocation13 + $0x8] sm:$0xff]  ;;  %v1450_v6 = vld [vmem:[#allocation11 + $0x20] sm:$0xff] }
 0x1ca   : > { %v977_v25 = vmax.f32 %v969_v21, 0.0  ;;  %3021 = vmatpush3.bf16.msra.mxu1 %v3018_v9  ;;  %v1277_v9 = vld [vmem:[#allocation10 + $0x170] sm:$0xff]  ;;  %v1257_v14 = vld [vmem:[#allocation3 + $0x22] sm:$0xff]  ;;  %v1482_v21 = vld [vmem:[#allocation11 + $0xd8] sm:$0xff] }
 0x1cb   : > { %994 = vst [vmem:[#allocation3 + $0x51] sm:$0xff] %v978_v24  ;;  %3023 = vmatprep.subr.bf16.mxu1 %v3022_v20  ;;  %v997_v52 = vld [vmem:[#allocation3 + $0x18] sm:$0xff]  ;;  %v998_v54 = vld [vmem:[#allocation3 + $0x20] sm:$0xff]  ;;  %v3070_v11 = vpack.c.bf16 %v1278_v10, %v1277_v9  ;;  %v1451_v7 = vld [vmem:[#allocation11 + $0x28] sm:$0xff] }
 0x1cc   : > { %993 = vst [vmem:[#allocation3 + $0x49] sm:$0xff] %v977_v25  ;;  %2615 = vmatprep.mubr.f32.mxu1 %v977_v25  ;;  %v1256_v13 = vld [vmem:[#allocation3 + $0x1a] sm:$0xff] }
 0x1cd   : > { %2616 = vmatmul.mubr.f32.gmra.mrb[14].mxu1 %v978_v24  ;;  %v1484_v24 = vld [vmem:[#allocation11 + $0xe8] sm:$0xff] }
 0x1ce   : > { %3025 = vmatpush3.bf16.msra.mxu1 %v3022_v20  ;;  %2650 = vmatprep.mubr.f32.mxu1 %v995_v31  ;;  %v1259_v18 = vld [vmem:[#allocation3 + $0x3a] sm:$0xff]  ;;  %v1481_v20 = vld [vmem:[#allocation11 + $0xd0] sm:$0xff]  ;;  %v3098_v25 = vpack.c.bf16 %v1484_v24, %v1483_v23 }
 0x1cf   : > { %3027 = vmatprep.subr.bf16.mxu1 %v3026_v26  ;;  %v999_v57 = vld [vmem:[#allocation3 + $0x30] sm:$0xff]  ;;  %v1000_v59 = vld [vmem:[#allocation3 + $0x38] sm:$0xff]  ;;  %v3094_v22 = vpack.c.bf16 %v1482_v21, %v1481_v20  ;;  %v1446_v31 = vld [vmem:[#allocation11] sm:$0xff] }
 0x1d0   : > { %v1258_v17 = vld [vmem:[#allocation3 + $0x32] sm:$0xff] }
 0x1d1   : > { %3095 = vmatprep.subr.bf16.mxu0 %v3094_v22 }
 0x1d2   : > { %3029 = vmatpush3.bf16.msra.mxu1 %v3026_v26  ;;  %v1261_v3 = vld [vmem:[#allocation3 + $0x52] sm:$0xff]  ;;  %3097 = vmatpush3.bf16.msra.mxu0 %v3094_v22 }
 0x1d3   : > { %3031 = vmatprep.subr.bf16.mxu1 %v3030_v32  ;;  %v1001_v62 = vld [vmem:[#allocation3 + $0x48] sm:$0xff]  ;;  %v1002_v0 = vld [vmem:[#allocation3 + $0x50] sm:$0xff]  ;;  %3099 = vmatprep.subr.bf16.mxu0 %v3098_v25 }
 0x1d4   : > { %v1260_v19 = vld [vmem:[#allocation3 + $0x4a] sm:$0xff] }
 0x1d5   : > { %v1485_v26 = vld [vmem:[#allocation11 + $0xf0] sm:$0xff] }
 0x1d6   : > { %3033 = vmatpush3.bf16.msra.mxu1 %v3030_v32  ;;  %3101 = vmatpush3.bf16.msra.mxu0 %v3098_v25  ;;  %v3102_v28 = vpack.c.bf16 %v1486_v27, %v1485_v26  ;;  %v1447_v32 = vld [vmem:[#allocation11 + $0x8] sm:$0xff]  ;;  %v1454_v25 = vld [vmem:[#allocation11 + $0x40] sm:$0xff] }
 0x1d7   : > { %3035 = vmatprep.subr.bf16.mxu1 %v3034_v35  ;;  %v3938_v33 = vpack.c.bf16 %v1447_v32, %v1446_v31  ;;  %v1455_v26 = vld [vmem:[#allocation11 + $0x48] sm:$0xff]  ;;  %v1456_v32 = vld [vmem:[#allocation11 + $0x50] sm:$0xff] }
 0x1d8   : > { %3103 = vmatprep.subr.bf16.mxu0 %v3102_v28  ;;  %v3122_v31 = vpack.c.bf16 %v1455_v26, %v1454_v25  ;;  %v2191_v25 = vld [vmem:[%s4072_s14] ss:$0 sm:$0xff]  ;;  %s3484_s14 = scalar_lea.vmem %s3984_s20, 1024 }
 0x1d9   : > { %v2188_v26 = vld [vmem:[%s4073_s24] ss:$0 sm:$0xff]  ;;  %p3485_p3 = scmp.ne.s32.totalorder %s3984_s20, %s3484_s14  ;;  %s3490_s24 = scalar_lea.vmem %s3489_s15, 2048 }
 0x1da   : > { %3037 = vmatpush3.bf16.msra.mxu1 %v3034_v35  ;;  %3105 = vmatpush3.bf16.msra.mxu0 %v3102_v28  ;;  %p3492_p1 = scmp.lt.s32.totalorder %s3490_s24, %s3484_s14 }
 0x1db   : > { %3039 = vmatprep.subr.bf16.mxu1 %v3038_v40  ;;  %3107 = vmatprep.subr.bf16.mxu0 %v3938_v33  ;;  %p3486_p5 = pnand %p3485_p3, %p3812_p10 }
 0x1dc   : > { %p3493_p2 = por %p3492_p1, %p3491_p12 }
 0x1dd   : > { %p3487_p7 = pneg %p3486_p5 }
 0x1de   : > { %3041 = vmatpush3.bf16.msra.mxu1 %v3038_v40  ;;  %v3174_v40 = vpack.c.bf16 %v1868_v39, %v1867_v36  ;;  %v1459_v36 = vld [vmem:[#allocation11 + $0x68] sm:$0xff] }
 0x1df   : > { %3043 = vmatprep.subr.bf16.mxu1 %v3042_v45  ;;  %p3494_p13 = pnand %p3493_p2, %p3487_p7 }
 0x1e1   : > { %2651 = vmatmul.mubr.f32.vlgmr.msra.gmra.mrb[8].mxu1 %v996_v49  ;;  %v1873_v49 = vld [vmem:[#allocation13 + $0x40] sm:$0xff] }
 0x1e2   : > { %2653 = vmatprep.mubr.f32.mxu1 %v997_v52  ;;  %3045 = vmatpush3.bf16.msra.mxu1 %v3042_v45  ;;  %v3178_v45 = vpack.c.bf16 %v1870_v42, %v1869_v41  ;;  %v3186_v51 = vpack.c.bf16 %v1874_v50, %v1873_v49  ;;  %v1875_v52 = vld [vmem:[#allocation13 + $0x50] sm:$0xff]  ;;  %v1461_v41 = vld [vmem:[#allocation11 + $0x78] sm:$0xff] }
 0x1e3   : > { %3047 = vmatprep.subr.bf16.mxu1 %v3046_v48  ;;  %v1709_v49 = vld [vmem:[#allocation11 + $0x118] sm:$0xff] }
 0x1e5   : > { %2654 = vmatmul.mubr.f32.gmra.mrb[10].mxu1 %v998_v54 }
 0x1e6   : > { %2656 = vmatprep.mubr.f32.mxu1 %v999_v57  ;;  %3049 = vmatpush3.bf16.msra.mxu1 %v3046_v48  ;;  %v3182_v48 = vpack.c.bf16 %v1872_v47, %v1871_v46  ;;  %v3194_v57 = vpack.c.bf16 %v1878_v56, %v1877_v55  ;;  %v1707_v46 = vld [vmem:[#allocation11 + $0x108] sm:$0xff] }
 0x1e7   : > { %3051 = vmatprep.subr.bf16.mxu1 %v3050_v53 }
 0x1e9   : > { %2657 = vmatmul.mubr.f32.gmra.mrb[12].mxu1 %v1000_v59  ;;  %v1880_v59 = vld [vmem:[#allocation13 + $0x78] sm:$0xff] }
 0x1ea   : > { %2659 = vmatprep.mubr.f32.mxu1 %v1001_v62  ;;  %3053 = vmatpush3.bf16.msra.mxu1 %v3050_v53  ;;  %v1876_v53 = vld [vmem:[#allocation13 + $0x58] sm:$0xff] }
 0x1eb   : > { %3055 = vmatprep.subr.bf16.mxu1 %v3054_v58  ;;  %v3190_v54 = vpack.c.bf16 %v1876_v53, %v1875_v52  ;;  %v1710_v52 = vld [vmem:[#allocation11 + $0x120] sm:$0xff]  ;;  %v1711_v53 = vld [vmem:[#allocation11 + $0x128] sm:$0xff] }
 0x1ec   : > { %v3146_v55 = vpack.c.bf16 %v1711_v53, %v1710_v52 }
 0x1ed   : > { %2660 = vmatmul.mubr.f32.gmra.mrb[14].mxu1 %v1002_v0  ;;  %v1448_v0 = vld [vmem:[#allocation11 + $0x10] sm:$0xff] }
 0x1ee   : > { %3057 = vmatpush3.bf16.msra.mxu1 %v3054_v58  ;;  %2694 = vmatprep.mubr.f32.mxu1 %v1254_v4  ;;  %v1879_v58 = vld [vmem:[#allocation13 + $0x70] sm:$0xff] }
 0x1ef   : > { %3059 = vmatprep.subr.bf16.mxu1 %v3058_v63  ;;  %v3198_v60 = vpack.c.bf16 %v1880_v59, %v1879_v58  ;;  %v1713_v58 = vld [vmem:[#allocation11 + $0x138] sm:$0xff] }
 0x1f2   : > { %3061 = vmatpush3.bf16.msra.mxu1 %v3058_v63 }
 0x1f3   : > { %3063 = vmatprep.subr.bf16.mxu1 %v3062_v5 }
 0x1f6   : > { %3065 = vmatpush3.bf16.msra.mxu1 %v3062_v5 }
 0x1f7   : > { %3067 = vmatprep.subr.bf16.mxu1 %v3066_v8 }
 0x1fa   : > { %3069 = vmatpush3.bf16.msra.mxu1 %v3066_v8 }
 0x1fb   : > { %3071 = vmatprep.subr.bf16.mxu1 %v3070_v11 }
 0x1fe   : > { %3073 = vmatpush3.bf16.msra.mxu1 %v3070_v11 }
 0x201   : > { %2695 = vmatmul.mubr.f32.vlgmr.msra.gmra.mrb[8].mxu1 %v1255_v12 }
 0x202   : > { %2697 = vmatprep.mubr.f32.mxu1 %v1256_v13  ;;  %v3114_v13 = vpack.c.bf16 %v1451_v7, %v1450_v6 }
 0x205   : > { %2698 = vmatmul.mubr.f32.gmra.mrb[10].mxu1 %v1257_v14 }
 0x206   : > { %2700 = vmatprep.mubr.f32.mxu1 %v1258_v17  ;;  %v1452_v17 = vld [vmem:[#allocation11 + $0x30] sm:$0xff] }
 0x209   : > { %2701 = vmatmul.mubr.f32.gmra.mrb[12].mxu1 %v1259_v18  ;;  %v1453_v18 = vld [vmem:[#allocation11 + $0x38] sm:$0xff] }
 0x20a   : > { %2703 = vmatprep.mubr.f32.mxu1 %v1260_v19  ;;  %v3118_v23 = vpack.c.bf16 %v1453_v18, %v1452_v17 }
 0x20d   : > { %2704 = vmatmul.mubr.f32.gmra.mrb[14].mxu1 %v1261_v3 }
 0x20e   : > { %2870 = vmatprep.mubr.f32.mxu1 %v3888_v15  ;;  %v1865_v15 = vld [vmem:[#allocation13] sm:$0xff] }
 0x20f   : > { %v3170_v35 = vpack.c.bf16 %v1866_v34, %v1865_v15 }
 0x211   : > { %3171 = vmatprep.subr.bf16.mxu1 %v3170_v35 }
 0x212   : > { %3173 = vmatpush3.bf16.msra.mxu1 %v3170_v35  ;;  %v1458_v35 = vld [vmem:[#allocation11 + $0x60] sm:$0xff] }
 0x213   : > { %3175 = vmatprep.subr.bf16.mxu1 %v3174_v40  ;;  %v3130_v39 = vpack.c.bf16 %v1459_v36, %v1458_v35 }
 0x216   : > { %3177 = vmatpush3.bf16.msra.mxu1 %v3174_v40  ;;  %v1460_v40 = vld [vmem:[#allocation11 + $0x70] sm:$0xff] }
 0x217   : > { %3179 = vmatprep.subr.bf16.mxu1 %v3178_v45  ;;  %v3134_v42 = vpack.c.bf16 %v1461_v41, %v1460_v40 }
 0x21a   : > { %3181 = vmatpush3.bf16.msra.mxu1 %v3178_v45  ;;  %v1706_v45 = vld [vmem:[#allocation11 + $0x100] sm:$0xff] }
 0x21b   : > { %3183 = vmatprep.subr.bf16.mxu1 %v3182_v48  ;;  %v3138_v47 = vpack.c.bf16 %v1707_v46, %v1706_v45 }
 0x21e   : > { %3185 = vmatpush3.bf16.msra.mxu1 %v3182_v48  ;;  %v1708_v48 = vld [vmem:[#allocation11 + $0x110] sm:$0xff] }
 0x21f   : > { %3187 = vmatprep.subr.bf16.mxu1 %v3186_v51  ;;  %v3142_v50 = vpack.c.bf16 %v1709_v49, %v1708_v48 }
 0x222   : > { %3189 = vmatpush3.bf16.msra.mxu1 %v3186_v51 }
 0x223   : > { %3191 = vmatprep.subr.bf16.mxu1 %v3190_v54 }
 0x226   : > { %3193 = vmatpush3.bf16.msra.mxu1 %v3190_v54 }
 0x227   : > { %3195 = vmatprep.subr.bf16.mxu1 %v3194_v57 }
 0x22a   : > { %3197 = vmatpush3.bf16.msra.mxu1 %v3194_v57  ;;  %v1712_v57 = vld [vmem:[#allocation11 + $0x130] sm:$0xff] }
 0x22b   : > { %3199 = vmatprep.subr.bf16.mxu1 %v3198_v60 }
 0x22e   : > { %3201 = vmatpush3.bf16.msra.mxu1 %v3198_v60  ;;  %v3150_v60 = vpack.c.bf16 %v1713_v58, %v1712_v57 }
 0x231   : > { %2871 = vmatmul.mubr.f32.vlgmr.msra.gmra.mrb[16].mxu1 %v3892_v16  ;;  %v2187_v16 = vld [vmem:[%s4036_s6] ss:$0 sm:$0xff] }
 0x232   : > { %2873 = vmatprep.mubr.f32.mxu1 %v3897_v29 }
 0x235   : > { %2874 = vmatmul.mubr.f32.gmra.mrb[18].mxu1 %v3900_v30 }
 0x236   : > { %2876 = vmatprep.mubr.f32.mxu1 %v3905_v37  ;;  %v1449_v37 = vld [vmem:[#allocation11 + $0x18] sm:$0xff] }
 0x237   : > { %v3110_v4 = vpack.c.bf16 %v1449_v37, %v1448_v0  ;;  %v1716_v0 = vld [vmem:[#allocation11 + $0x150] sm:$0xff]  ;;  %v1717_v37 = vld [vmem:[#allocation11 + $0x158] sm:$0xff] }
 0x239   : > { %2877 = vmatmul.mubr.f32.gmra.mrb[20].mxu1 %v3908_v38 }
 0x23a   : > { %2879 = vmatprep.mubr.f32.mxu1 %v3913_v43 }
 0x23d   : > { %2880 = vmatmul.mubr.f32.gmra.mrb[22].mxu1 %v3916_v44 }
 0x2d4   : > { %v2696_v62 = vpop.f32.mrb[8].mxu1 }
 0x2d5   : > { %v1400_v29 = vmul.f32 %v2696_v62, %v2186_v61  ;;  %v1345_v63 = vpop.f32.mrb[9].mxu1  ;;  %v1714_v62 = vld [vmem:[#allocation11 + $0x140] sm:$0xff] }
 0x2d6   : > { %v1399_v30 = vmul.f32 %v2186_v61, %v1345_v63 }
 0x2d7   : > { %v1415_v1 = vadd.f32 %v2187_v16, %v1400_v29 }
 0x2d8   : > { %v1414_v38 = vadd.f32 %v2187_v16, %v1399_v30  ;;  %v2699_v2 = vpop.f32.mrb[10].mxu1 }
 0x2d9   : > { %1431 = vst [vmem:[#allocation4 + $0x9] sm:$0xff] %v1415_v1  ;;  %v1402_v43 = vmul.f32 %v2699_v2, %v2186_v61  ;;  %v1355_v44 = vpop.f32.mrb[11].mxu1  ;;  %v1718_v2 = vld [vmem:[#allocation11 + $0x160] sm:$0xff] }
 0x2da   : > { %1430 = vst [vmem:[#allocation4 + $0x1] sm:$0xff] %v1414_v38  ;;  %v1401_v5 = vmul.f32 %v2186_v61, %v1355_v44  ;;  %2738 = vmatprep.mubr.f32.mxu0 %v1414_v38  ;;  %v3158_v38 = vpack.c.bf16 %v1717_v37, %v1716_v0 }
 0x2db   : > { %v1417_v8 = vadd.f32 %v2187_v16, %v1402_v43  ;;  %2739 = vmatmul.mubr.f32.vlgmr.msra.gmra.mrb[8].mxu0 %v1415_v1  ;;  %v1719_v43 = vld [vmem:[#allocation11 + $0x168] sm:$0xff] }
 0x2dc   : > { %v1416_v9 = vadd.f32 %v2187_v16, %v1401_v5  ;;  %v2702_v10 = vpop.f32.mrb[12].mxu1  ;;  %3109 = vmatpush3.bf16.msra.mxu0 %v3938_v33  ;;  %v1457_v33 = vld [vmem:[#allocation11 + $0x58] sm:$0xff]  ;;  %v3162_v44 = vpack.c.bf16 %v1719_v43, %v1718_v2 }
 0x2dd   : > { %1433 = vst [vmem:[#allocation4 + $0x21] sm:$0xff] %v1417_v8  ;;  %v1404_v11 = vmul.f32 %v2702_v10, %v2186_v61  ;;  %v1365_v12 = vpop.f32.mrb[13].mxu1  ;;  %3111 = vmatprep.subr.bf16.mxu0 %v3110_v4  ;;  %v3126_v34 = vpack.c.bf16 %v1457_v33, %v1456_v32  ;;  %v1721_v5 = vld [vmem:[#allocation11 + $0x178] sm:$0xff] }
 0x2de   : > { %1432 = vst [vmem:[#allocation4 + $0x19] sm:$0xff] %v1416_v9  ;;  %v1403_v14 = vmul.f32 %v2186_v61, %v1365_v12  ;;  %2741 = vmatprep.mubr.f32.mxu0 %v1416_v9 }
 0x2df   : > { %v1419_v19 = vadd.f32 %v2187_v16, %v1404_v11  ;;  %2742 = vmatmul.mubr.f32.gmra.mrb[10].mxu0 %v1417_v8 }
 0x2e0   : > { %v1418_v3 = vadd.f32 %v2187_v16, %v1403_v14  ;;  %v2705_v20 = vpop.f32.mrb[14].mxu1  ;;  %3113 = vmatpush3.bf16.msra.mxu0 %v3110_v4  ;;  %v1720_v4 = vld [vmem:[#allocation11 + $0x170] sm:$0xff] }
 0x2e1   : > { %1435 = vst [vmem:[#allocation4 + $0x39] sm:$0xff] %v1419_v19  ;;  %v1406_v21 = vmul.f32 %v2705_v20, %v2186_v61  ;;  %v1375_v22 = vpop.f32.mrb[15].mxu1  ;;  %3115 = vmatprep.subr.bf16.mxu0 %v3114_v13  ;;  %v1438_v15 = vld [vmem:[#allocation4] sm:$0xff]  ;;  %v1439_v51 = vld [vmem:[#allocation4 + $0x8] sm:$0xff]  ;;  %v3166_v6 = vpack.c.bf16 %v1721_v5, %v1720_v4 }
 0x2e2   : > { %1434 = vst [vmem:[#allocation4 + $0x31] sm:$0xff] %v1418_v3  ;;  %v1405_v24 = vmul.f32 %v2186_v61, %v1375_v22  ;;  %2744 = vmatprep.mubr.f32.mxu0 %v1418_v3  ;;  %v1697_v1 = vld [vmem:[#allocation4 + $0x2] sm:$0xff]  ;;  %v1698_v7 = vld [vmem:[#allocation4 + $0xa] sm:$0xff] }
 0x2e3   : > { %v1421_v27 = vadd.f32 %v2187_v16, %v1406_v21  ;;  %2745 = vmatmul.mubr.f32.gmra.mrb[12].mxu0 %v1419_v19 }
 0x2e4   : > { %v1420_v28 = vadd.f32 %v2187_v16, %v1405_v24  ;;  %3117 = vmatpush3.bf16.msra.mxu0 %v3114_v13  ;;  %v1715_v16 = vld [vmem:[#allocation11 + $0x148] sm:$0xff] }
 0x2e5   : > { %1437 = vst [vmem:[#allocation4 + $0x51] sm:$0xff] %v1421_v27  ;;  %3119 = vmatprep.subr.bf16.mxu0 %v3118_v23  ;;  %v1440_v54 = vld [vmem:[#allocation4 + $0x18] sm:$0xff]  ;;  %v1441_v56 = vld [vmem:[#allocation4 + $0x20] sm:$0xff]  ;;  %v3154_v63 = vpack.c.bf16 %v1715_v16, %v1714_v62 }
 0x2e6   : > { %1436 = vst [vmem:[#allocation4 + $0x49] sm:$0xff] %v1420_v28  ;;  %2747 = vmatprep.mubr.f32.mxu0 %v1420_v28  ;;  %v1699_v8 = vld [vmem:[#allocation4 + $0x1a] sm:$0xff]  ;;  %v1700_v9 = vld [vmem:[#allocation4 + $0x22] sm:$0xff] }
 0x2e7   : > { %2748 = vmatmul.mubr.f32.gmra.mrb[14].mxu0 %v1421_v27 }
 0x2e8   : > { %3121 = vmatpush3.bf16.msra.mxu0 %v3118_v23  ;;  %2782 = vmatprep.mubr.f32.mxu0 %v1438_v15  ;;  %v1702_v11 = vld [vmem:[#allocation4 + $0x3a] sm:$0xff] }
 0x2e9   : > { %3123 = vmatprep.subr.bf16.mxu0 %v3122_v31  ;;  %v1442_v59 = vld [vmem:[#allocation4 + $0x30] sm:$0xff]  ;;  %v1443_v61 = vld [vmem:[#allocation4 + $0x38] sm:$0xff]  ;;  %v2190_v23 = vld [vmem:[%s4071_s25] ss:$0 sm:$0xff] }
 0x2ea   : > { %v1701_v10 = vld [vmem:[#allocation4 + $0x32] sm:$0xff] }
 0x2ec   : > { %3125 = vmatpush3.bf16.msra.mxu0 %v3122_v31  ;;  %v1704_v13 = vld [vmem:[#allocation4 + $0x52] sm:$0xff]  ;;  %v2189_v31 = vld [vmem:[%s4074_s19] ss:$0 sm:$0xff] }
 0x2ed   : > { %3127 = vmatprep.subr.bf16.mxu0 %v3126_v34  ;;  %v1444_v29 = vld [vmem:[#allocation4 + $0x48] sm:$0xff]  ;;  %v1445_v30 = vld [vmem:[#allocation4 + $0x50] sm:$0xff] }
 0x2ee   : > { %v1703_v12 = vld [vmem:[#allocation4 + $0x4a] sm:$0xff] }
 0x2f0   : > { %3129 = vmatpush3.bf16.msra.mxu0 %v3126_v34 }
 0x2f1   : > { %3131 = vmatprep.subr.bf16.mxu0 %v3130_v39 }
 0x2f4   : > { %3133 = vmatpush3.bf16.msra.mxu0 %v3130_v39 }
 0x2f5   : > { %3135 = vmatprep.subr.bf16.mxu0 %v3134_v42 }
 0x2f8   : > { %3137 = vmatpush3.bf16.msra.mxu0 %v3134_v42 }
 0x2f9   : > { %3139 = vmatprep.subr.bf16.mxu0 %v3138_v47 }
 0x2fb   : > { %2783 = vmatmul.mubr.f32.vlgmr.msra.gmra.mrb[8].mxu0 %v1439_v51 }
 0x2fc   : > { %2785 = vmatprep.mubr.f32.mxu0 %v1440_v54  ;;  %3141 = vmatpush3.bf16.msra.mxu0 %v3138_v47 }
 0x2fd   : > { %3143 = vmatprep.subr.bf16.mxu0 %v3142_v50 }
 0x2ff   : > { %2786 = vmatmul.mubr.f32.gmra.mrb[10].mxu0 %v1441_v56 }
 0x300   : > { %2788 = vmatprep.mubr.f32.mxu0 %v1442_v59  ;;  %3145 = vmatpush3.bf16.msra.mxu0 %v3142_v50 }
 0x301   : > { %3147 = vmatprep.subr.bf16.mxu0 %v3146_v55 }
 0x303   : > { %2789 = vmatmul.mubr.f32.gmra.mrb[12].mxu0 %v1443_v61 }
 0x304   : > { %2791 = vmatprep.mubr.f32.mxu0 %v1444_v29  ;;  %3149 = vmatpush3.bf16.msra.mxu0 %v3146_v55  ;;  %v2872_v14 = vpop.f32.mrb[16].mxu1 }
 0x305   : > { %3151 = vmatprep.subr.bf16.mxu0 %v3150_v60  ;;  %v1947_v17 = vpop.f32.mrb[17].mxu1  ;;  %v1994_v24 = vmul.f32 %v2872_v14, %v2190_v23 }
 0x306   : > { %v1993_v27 = vmul.f32 %v2190_v23, %v1947_v17 }
 0x307   : > { %2792 = vmatmul.mubr.f32.gmra.mrb[14].mxu0 %v1445_v30  ;;  %v2009_v32 = vadd.f32 %v2191_v25, %v1994_v24 }
 0x308   : > { %3153 = vmatpush3.bf16.msra.mxu0 %v3150_v60  ;;  %2826 = vmatprep.mubr.f32.mxu0 %v1697_v1  ;;  %v2875_v18 = vpop.f32.mrb[18].mxu1  ;;  %v2008_v35 = vadd.f32 %v2191_v25, %v1993_v27 }
 0x309   : > { %3155 = vmatprep.subr.bf16.mxu0 %v3154_v63  ;;  %v1957_v19 = vpop.f32.mrb[19].mxu1  ;;  %v1996_v34 = vmul.f32 %v2875_v18, %v2190_v23 }
 0x30a   : > { %v1995_v39 = vmul.f32 %v2190_v23, %v1957_v19 }
 0x30b   : > { %v2011_v46 = vadd.f32 %v2191_v25, %v1996_v34 }
 0x30c   : > { %3157 = vmatpush3.bf16.msra.mxu0 %v3154_v63  ;;  %v2878_v3 = vpop.f32.mrb[20].mxu1  ;;  %v2010_v51 = vadd.f32 %v2191_v25, %v1995_v39 }
 0x30d   : > { %3159 = vmatprep.subr.bf16.mxu0 %v3158_v38  ;;  %v1967_v20 = vpop.f32.mrb[21].mxu1  ;;  %v1998_v49 = vmul.f32 %v2878_v3, %v2190_v23 }
 0x30e   : > { %v1997_v53 = vmul.f32 %v2190_v23, %v1967_v20 }
 0x30f   : > { %v2013_v60 = vadd.f32 %v2191_v25, %v1998_v49 }
 0x310   : > { %3161 = vmatpush3.bf16.msra.mxu0 %v3158_v38  ;;  %v2881_v21 = vpop.f32.mrb[22].mxu1  ;;  %v2012_v63 = vadd.f32 %v2191_v25, %v1997_v53 }
 0x311   : > { %3163 = vmatprep.subr.bf16.mxu0 %v3162_v44  ;;  %v1977_v22 = vpop.f32.mrb[23].mxu1  ;;  %v2000_v16 = vmul.f32 %v2881_v21, %v2190_v23 }
 0x312   : > { %v1999_v0 = vmul.f32 %v2190_v23, %v1977_v22 }
 0x313   : > { %v2015_v4 = vadd.f32 %v2191_v25, %v2000_v16 }
 0x314   : > { %3165 = vmatpush3.bf16.msra.mxu0 %v3162_v44 }
 0x315   : > { %3167 = vmatprep.subr.bf16.mxu0 %v3166_v6 }
 0x318   : > { %3169 = vmatpush3.bf16.msra.mxu0 %v3166_v6 }
 0x31b   : > { %2827 = vmatmul.mubr.f32.vlgmr.msra.gmra.mrb[8].mxu0 %v1698_v7 }
 0x31c   : > { %2829 = vmatprep.mubr.f32.mxu0 %v1699_v8  ;;  %v2014_v8 = vadd.f32 %v2191_v25, %v1999_v0 }
 0x31f   : > { %2830 = vmatmul.mubr.f32.gmra.mrb[10].mxu0 %v1700_v9 }
 0x320   : > { %2832 = vmatprep.mubr.f32.mxu0 %v1701_v10 }
 0x323   : > { %2833 = vmatmul.mubr.f32.gmra.mrb[12].mxu0 %v1702_v11 }
 0x324   : > { %2835 = vmatprep.mubr.f32.mxu0 %v1703_v12 }
 0x327   : > { %2836 = vmatmul.mubr.f32.gmra.mrb[14].mxu0 %v1704_v13 }
 0x3ee   : > { %v2828_v28 = vpop.f32.mrb[8].mxu0 }
 0x3ef   : > { %v1843_v33 = vmul.f32 %v2828_v28, %v2188_v26  ;;  %v1788_v15 = vpop.f32.mrb[9].mxu0 }
 0x3f0   : > { %v1842_v36 = vmul.f32 %v2188_v26, %v1788_v15 }
 0x3f1   : > { %v1858_v40 = vadd.f32 %v2189_v31, %v1843_v33 }
 0x3f2   : > { %v1857_v41 = vadd.f32 %v2189_v31, %v1842_v36  ;;  %v2831_v42 = vpop.f32.mrb[10].mxu0 }
 0x3f3   : > { %v2017_v45 = vadd.f32 %v2009_v32, %v1858_v40  ;;  %v1845_v47 = vmul.f32 %v2831_v42, %v2188_v26  ;;  %v1798_v48 = vpop.f32.mrb[11].mxu0 }
 0x3f4   : > { %v2016_v50 = vadd.f32 %v2008_v35, %v1857_v41  ;;  %v1844_v52 = vmul.f32 %v2188_v26, %v1798_v48 }
 0x3f5   : > { %v2025_v54 = vmax.f32 %v2017_v45, 0.0  ;;  %v1860_v55 = vadd.f32 %v2189_v31, %v1845_v47 }
 0x3f6   : > { %v2024_v56 = vmax.f32 %v2016_v50, 0.0  ;;  %v1859_v57 = vadd.f32 %v2189_v31, %v1844_v52  ;;  %v2834_v58 = vpop.f32.mrb[12].mxu0 }
 0x3f7   : > { %2033 = vst [vmem:[%s3969_s17 + $0x8] sm:$0xff] %v2025_v54  ;;  %v2019_v59 = vadd.f32 %v2011_v46, %v1860_v55  ;;  %v1847_v61 = vmul.f32 %v2834_v58, %v2188_v26  ;;  %v1808_v62 = vpop.f32.mrb[13].mxu0 }
 0x3f8   : > { %2032 = vst [vmem:[%s3969_s17] sm:$0xff] %v2024_v56  ;;  %v2018_v29 = vadd.f32 %v2010_v51, %v1859_v57  ;;  %v1846_v30 = vmul.f32 %v2188_v26, %v1808_v62 }
 0x3f9   : > { %v2027_v37 = vmax.f32 %v2019_v59, 0.0  ;;  %v1862_v1 = vadd.f32 %v2189_v31, %v1847_v61 }
 0x3fa   : > { %v2026_v38 = vmax.f32 %v2018_v29, 0.0  ;;  %v1861_v2 = vadd.f32 %v2189_v31, %v1846_v30  ;;  %v2837_v43 = vpop.f32.mrb[14].mxu0 }
 0x3fb   : > { %2035 = vst [vmem:[%s3969_s17 + $0x18] sm:$0xff] %v2027_v37  ;;  %v2021_v44 = vadd.f32 %v2013_v60, %v1862_v1  ;;  %v1849_v5 = vmul.f32 %v2837_v43, %v2188_v26  ;;  %v1818_v6 = vpop.f32.mrb[15].mxu0 }
 0x3fc   : > { %2034 = vst [vmem:[%s3969_s17 + $0x10] sm:$0xff] %v2026_v38  ;;  %v2020_v7 = vadd.f32 %v2012_v63, %v1861_v2  ;;  %v1848_v9 = vmul.f32 %v2188_v26, %v1818_v6 }
 0x3fd   : > { %v2029_v10 = vmax.f32 %v2021_v44, 0.0  ;;  %v1864_v11 = vadd.f32 %v2189_v31, %v1849_v5 }
 0x3fe   : > { %v2028_v12 = vmax.f32 %v2020_v7, 0.0  ;;  %v1863_v13 = vadd.f32 %v2189_v31, %v1848_v9 }
 0x3ff   : > { %2037 = vst [vmem:[%s3969_s17 + $0x28] sm:$0xff] %v2029_v10  ;;  %v2023_v14 = vadd.f32 %v2015_v4, %v1864_v11 }
 0x400   : > { %2036 = vst [vmem:[%s3969_s17 + $0x20] sm:$0xff] %v2028_v12  ;;  %v2022_v17 = vadd.f32 %v2014_v8, %v1863_v13 }
 0x401   : > { %v2031_v18 = vmax.f32 %v2023_v14, 0.0 }
 0x402   : > { %v2030_v19 = vmax.f32 %v2022_v17, 0.0 }
 0x403   : > { %2039 = vst [vmem:[%s3969_s17 + $0x38] sm:$0xff] %v2031_v18 }
 0x404   : > { %2038 = vst [vmem:[%s3969_s17 + $0x30] sm:$0xff] %v2030_v19 }
 0x405   : > { %3497 = shalt.err (!%p3494_p13)
}
 0x406   : > { %s3498_s18 = scalar_lea.hbm %s3982_s8, 1024  ;;  %s3502_s17 = scalar_lea.hbm %s4075_s23, 2048 }
 0x407   : > { %p3499_p9 = scmp.ne.s32.totalorder %s3982_s8, %s3498_s18  ;;  %p3503_p4 = scmp.lt.u32.totalorder %s3982_s8, %s4075_s23 }
 0x408   : > { %p3504_p8 = scmp.lt.u32.totalorder %s3502_s17, %s3498_s18  ;;  %p3506_p3 = scmp.lt.u32.totalorder %s3498_s18, %s3982_s8 }
 0x409   : > { %p3500_p0 = pnand %p3499_p9, %p3812_p10 }
 0x40a   : > { %p3505_p6 = por %p3504_p8, %p3503_p4 }
 0x40b   : > { %p3501_p11 = pneg %p3500_p0 }
 0x40c   : > { %p3507_p5 = por %p3506_p3, %p3505_p6 }
 0x40e   : > { %p3508_p7 = pnand %p3507_p5, %p3501_p11 }
 0x410   : > { %3511 = shalt.err (!%p3508_p7)
}
 0x411   : > { %s3569_s25 = smov 128   ;;  %s3570_s14 = smov 8  }
 0x412   : > { %3268 = dma.vmem_to_hbm [thread:$0]  (%p3812_p10), %s3984_s20, 1024, %s3982_s8, %s2041_s29, %s3569_s25, %s3569_s25, %s3570_s14  }
 0x413 PF: > { %s4076_s16 = sld [smem:[#allocation19_spill]]  ;;  %s4077_s15 = sld [smem:[#allocation20_spill]] }
 0x414   : > { %p4079_p1 = scmp.ge.s32.totalorder %s3558_s28, 2 }
 0x419   : > { %s2070_s24 = sand.u32 1, %s4076_s16   ;;  %p4078_p12 = scmp.ne.s32.totalorder %s4077_s15, 0 }
 0x41a   : > { %s2071_s18 = scalar_lea.sflag [#allocation7], %s2070_s24 }
 0x41b   : > { %p3288_p2 = pnand %p4079_p1, %p4078_p12 }
 0x41d   : > { %3541 = dma.done.wait (!%p3288_p2), %s2071_s18, 1024  }
 0x41e   : > { %3543 = vsyncadd (!%p3288_p2), %s2071_s18, 4294966272  ;;  %p28_p13 = scmp.ge.s32.totalorder %s3802_s13, 4   ;;  %s4080_s25 = smov %s3550_s26 }
 0x41f   : > { %s4081_s26 = smov %s3554_s27  ;;  %s4082_s27 = smov %s3818_s30 }
 0x420   : > { %s4083_s28 = smov %s3802_s13  ;;  %30 = sbr.rel (!%p28_p13) target bundleno = 13 (0xd), region = 139 }
 0x427   :  { %2076 = vsyncpa [#allocation6], 1 }
 0x428   :  { %2078 = vsyncpa [#allocation6 + $0x1], 1 }
 0x429   :  { %2079 = vsyncpa [#allocation9], 1 }
 0x42a   :  { %2080 = vsyncpa [#allocation12], 1 }
 0x42b   :  { %2081 = vsyncpa [#allocation7], 1 }
 0x42c   :  { %2083 = vsyncpa [#allocation7 + $0x1], 1 }

</bundles_post_ra>
